<compile_context>
chip_gen: v7x
topology: tpu7x:2x2x1
jax: 0.10.0
libtpu: 0.0.40
codegen_flags: <defaults>
</compile_context>

<pallas_src>
import functools

import jax
import jax.numpy as jnp
from jax import lax
from jax.experimental import pallas as pl
from jax.experimental.pallas import tpu as pltpu


def _round_up(x, m):
    return ((x + m - 1) // m) * m


# ----------------------------------------------------------------------------
# Kernel: one grid step = one chunk of Tt timesteps.
# ----------------------------------------------------------------------------
def _dgst_kernel(eps, seq_len, need_mask, emit_cache, unroll, mxu_dtype,
                 gi_ref,     # (B_pad, Tt, 3H) f32 : x @ W_ih^T + (b_ih + [b_hh_r, b_hh_z, 0])
                 whh_ref,    # (H, 3H)             : fused recurrent weights (W_hh^T)
                 bhn_ref,    # (1, H)              : b_hh for the n gate
                 tsel_ref,   # (B_pad, 1) i32      : timestep to select per row
                 lng_ref,    # (1, H)              : LayerNorm gamma
                 lnb_ref,    # (1, H)              : LayerNorm beta
                 whead_ref,  # (H, EpS_pad)        : [W_embeds^T | W_scores^T | 0-pad]
                 *rest):
    if emit_cache:
        head_ref, hout_ref, last_ref, h_scr, hsel_scr = rest
    else:
        head_ref, h_scr, hsel_scr = rest
        hout_ref = last_ref = None

    B_pad, Tt, threeH = gi_ref.shape
    H = threeH // 3

    chunk = pl.program_id(0)
    n_chunks = pl.num_programs(0)

    @pl.when(chunk == 0)
    def _():
        h_scr[...] = jnp.zeros_like(h_scr)
        hsel_scr[...] = jnp.zeros_like(hsel_scr)

    whh = whh_ref[...]            # stays VMEM-resident across the whole grid
    bhn = bhn_ref[...]
    t_sel = tsel_ref[...]
    t_base = chunk * Tt

    def step(lt, carry):
        h, h_sel = carry
        g = gi_ref[:, lt, :]                                        # (B_pad, 3H)
        gh = jnp.dot(h.astype(mxu_dtype), whh,
                     preferred_element_type=jnp.float32)            # (B_pad, 3H)
        r = jax.nn.sigmoid(g[:, :H] + gh[:, :H])
        z = jax.nn.sigmoid(g[:, H:2 * H] + gh[:, H:2 * H])
        n = jnp.tanh(g[:, 2 * H:] + r * (gh[:, 2 * H:] + bhn))
        h_new = (1.0 - z) * n + z * h
        if emit_cache:
            hout_ref[:, pl.ds(lt, 1), :] = h_new[:, None, :]        # batch-first write
        gt = t_base + lt
        if need_mask:                                               # tail (padded T) steps
            h_new = jnp.where(gt < seq_len, h_new, h)
        h_sel = jnp.where(t_sel == gt, h_new, h_sel)
        return h_new, h_sel

    h, h_sel = lax.fori_loop(0, Tt, step, (h_scr[...], hsel_scr[...]),
                             unroll=unroll)
    h_scr[...] = h
    hsel_scr[...] = h_sel

    @pl.when(chunk == n_chunks - 1)
    def _():
        if emit_cache:
            last_ref[...] = h
        # LayerNorm (biased variance, eps inside rsqrt) + fused heads.
        mean = jnp.mean(h_sel, axis=-1, keepdims=True)
        var = jnp.mean(jnp.square(h_sel - mean), axis=-1, keepdims=True)
        y = (h_sel - mean) * lax.rsqrt(var + eps) * lng_ref[...] + lnb_ref[...]
        head_ref[...] = jnp.dot(y.astype(mxu_dtype), whead_ref[...],
                                preferred_element_type=jnp.float32)


# ----------------------------------------------------------------------------
# Full DGST forward
# ----------------------------------------------------------------------------
def dgst_forward(params, input_embeds, attention_mask=None, use_cache=False,
                 gst_scores_shape=(4, 8), t_chunk=64, use_bf16_mxu=False):
    B, T, H = input_embeds.shape
    E = params["w_embeds"].shape[0]
    S = params["w_scores"].shape[0]
    EpS = E + S
    EpS_pad = _round_up(EpS, 128)                # lane-dense head output
    B_pad = max(8, _round_up(B, 8))              # f32 sublane tile
    Tt = min(_round_up(T, 8), max(8, _round_up(t_chunk, 8)))
    T_pad = _round_up(T, Tt)
    n_chunks = T_pad // Tt
    need_mask = (T_pad != T)
    unroll = True if Tt <= 8 else 8
    mxu_dtype = jnp.bfloat16 if use_bf16_mxu else jnp.float32

    # --- Hoisted input projection in natural (B, T, 3H) layout. ---------------
    b_hh = params["b_hh"]
    b_gi = params["b_ih"] + jnp.concatenate(
        [b_hh[:2 * H], jnp.zeros((H,), b_hh.dtype)])          # fold r/z recurrent bias
    x_pad = jnp.pad(input_embeds.astype(jnp.float32),
                    ((0, B_pad - B), (0, T_pad - T), (0, 0)))
    gi = jnp.dot(x_pad, params["w_ih"].T,
                 preferred_element_type=jnp.float32) + b_gi   # (B_pad, T_pad, 3H)

    # --- Fused recurrent weights / n-gate bias. -------------------------------
    whh = params["w_hh"].T.astype(mxu_dtype)                  # (H, 3H)
    bhn = b_hh[2 * H:].reshape(1, H).astype(jnp.float32)

    # --- Selection index: last position where the mask is 1. ------------------
    if attention_mask is not None:
        t_sel = jnp.argmax(jnp.cumsum(attention_mask, axis=1), axis=1).astype(jnp.int32)
    else:
        t_sel = jnp.full((B,), T - 1, jnp.int32)
    t_sel = jnp.pad(t_sel, (0, B_pad - B)).reshape(B_pad, 1)

    # --- Fused, lane-padded head weights. --------------------------------------
    w_head = jnp.concatenate(
        [jnp.transpose(params["w_embeds"]), jnp.transpose(params["w_scores"])],
        axis=1)                                               # (H, E+S)
    w_head = jnp.pad(w_head, ((0, 0), (0, EpS_pad - EpS))).astype(mxu_dtype)
    ln_g = params["ln_g"].reshape(1, H).astype(jnp.float32)
    ln_b = params["ln_b"].reshape(1, H).astype(jnp.float32)

    # --- Specs. ----------------------------------------------------------------
    in_specs = [
        pl.BlockSpec((B_pad, Tt, 3 * H), lambda c: (0, c, 0)),   # gi (streamed)
        pl.BlockSpec((H, 3 * H), lambda c: (0, 0)),              # whh (resident)
        pl.BlockSpec((1, H), lambda c: (0, 0)),                  # bhn
        pl.BlockSpec((B_pad, 1), lambda c: (0, 0)),              # t_sel
        pl.BlockSpec((1, H), lambda c: (0, 0)),                  # ln gamma
        pl.BlockSpec((1, H), lambda c: (0, 0)),                  # ln beta
        pl.BlockSpec((H, EpS_pad), lambda c: (0, 0)),            # head weights
    ]
    out_shape = [jax.ShapeDtypeStruct((B_pad, EpS_pad), jnp.float32)]
    out_specs = [pl.BlockSpec((B_pad, EpS_pad), lambda c: (0, 0))]
    if use_cache:
        out_shape += [jax.ShapeDtypeStruct((B_pad, T_pad, H), jnp.float32),
                      jax.ShapeDtypeStruct((B_pad, H), jnp.float32)]
        out_specs += [pl.BlockSpec((B_pad, Tt, H), lambda c: (0, c, 0)),
                      pl.BlockSpec((B_pad, H), lambda c: (0, 0))]

    w_item = 2 if use_bf16_mxu else 4
    vmem_est = (2 * B_pad * Tt * 3 * H * 4          # gi (double-buffered)
                + H * 3 * H * w_item                # whh
                + H * EpS_pad * w_item              # head weights
                + (3 * H + B_pad) * 4               # small residents
                + 2 * B_pad * EpS_pad * 4           # head out
                + 4 * B_pad * H * 4)                # scratch + last
    if use_cache:
        vmem_est += 2 * B_pad * Tt * H * 4
    vmem_limit = int(min(100 * 2**20, max(16 * 2**20, 2 * vmem_est)))

    outs = pl.pallas_call(
        functools.partial(_dgst_kernel, float(params["ln_eps"]), int(T),
                          bool(need_mask), bool(use_cache), unroll, mxu_dtype),
        out_shape=tuple(out_shape),
        grid_spec=pltpu.PrefetchScalarGridSpec(
            num_scalar_prefetch=0,
            grid=(n_chunks,),
            in_specs=in_specs,
            out_specs=tuple(out_specs),
            scratch_shapes=[pltpu.VMEM((B_pad, H), jnp.float32),   # h carry
                            pltpu.VMEM((B_pad, H), jnp.float32)],  # h_sel carry
        ),
        compiler_params=pltpu.CompilerParams(
            dimension_semantics=("arbitrary",),
            vmem_limit_bytes=vmem_limit),
    )(gi, whh, bhn, t_sel, ln_g, ln_b, w_head)

    head_out = outs[0][:B, :EpS]
    gst_embeds = head_out[:, :E]
    gst_scores = head_out[:, E:].reshape(-1, *gst_scores_shape)

    if use_cache:
        hidden_outputs = outs[1][:B, :T, :]          # already batch-first
        last_hidden_state = outs[2][:B][None]        # (1, B, H)
        cache = (hidden_outputs, last_hidden_state)
    else:
        cache = None

    return {"gst_embeds": gst_embeds, "gst_scores": gst_scores, "cache": cache}


# ----------------------------------------------------------------------------
# Params + pure-JAX reference (for sanity checking)
# ----------------------------------------------------------------------------
def init_params(key, hidden_size, gst_embeds_size, gst_scores_shape):
    H = hidden_size
    S = gst_scores_shape[0] * gst_scores_shape[1]
    keys = jax.random.split(key, 8)
    s = 1.0 / jnp.sqrt(H)
    u = lambda k, shape: jax.random.uniform(k, shape, jnp.float32, -s, s)
    return {
        "w_ih": u(keys[0], (3 * H, H)),
        "w_hh": u(keys[1], (3 * H, H)),
        "b_ih": u(keys[2], (3 * H,)),
        "b_hh": u(keys[3], (3 * H,)),
        "ln_g": jnp.ones((H,), jnp.float32),
        "ln_b": jnp.zeros((H,), jnp.float32),
        "w_embeds": u(keys[4], (gst_embeds_size, H)),
        "w_scores": u(keys[5], (S, H)),
        "ln_eps": 1e-5,
    }


def _dgst_reference(params, x, attention_mask, gst_scores_shape):
    B, T, H = x.shape
    w_ih, w_hh = params["w_ih"], params["w_hh"]
    b_ih, b_hh = params["b_ih"], params["b_hh"]

    def cell(h, x_t):
        gi = x_t @ w_ih.T + b_ih
        gh = h @ w_hh.T + b_hh
        r = jax.nn.sigmoid(gi[:, :H] + gh[:, :H])
        z = jax.nn.sigmoid(gi[:, H:2 * H] + gh[:, H:2 * H])
        n = jnp.tanh(gi[:, 2 * H:] + r * gh[:, 2 * H:])
        h_new = (1.0 - z) * n + z * h
        return h_new, h_new

    h0 = jnp.zeros((B, H), jnp.float32)
    h_last, outs = lax.scan(cell, h0, jnp.transpose(x, (1, 0, 2)))
    hidden_outputs = jnp.transpose(outs, (1, 0, 2))
    if attention_mask is not None:
        t_sel = jnp.argmax(jnp.cumsum(attention_mask, axis=1), axis=1)
        hs = hidden_outputs[jnp.arange(B), t_sel]
    else:
        hs = h_last
    mean = hs.mean(-1, keepdims=True)
    var = ((hs - mean) ** 2).mean(-1, keepdims=True)
    y = (hs - mean) / jnp.sqrt(var + params["ln_eps"]) * params["ln_g"] + params["ln_b"]
    emb = y @ params["w_embeds"].T
    sco = (y @ params["w_scores"].T).reshape(-1, *gst_scores_shape)
    return emb, sco, hidden_outputs, h_last[None]


if __name__ == "__main__":
    gst_embeds_size = 16
    gst_scores_shape = (4, 8)
    key = jax.random.PRNGKey(0)
    k_param, k_x1, k_x2 = jax.random.split(key, 3)

    # ---- Test 1: small shapes, single T-chunk, with mask + cache. ------------
    B, T, H = 2, 8, 32
    params = init_params(k_param, H, gst_embeds_size, gst_scores_shape)
    input_embeds = jax.random.normal(k_x1, (B, T, H), jnp.float32)
    attention_mask = jnp.array(
        [[1, 1, 1, 1, 1, 1, 1, 1],
         [1, 1, 1, 1, 1, 0, 0, 0]], dtype=jnp.float32)

    out = dgst_forward(params, input_embeds, attention_mask=attention_mask,
                       use_cache=True, gst_scores_shape=gst_scores_shape)
    jax.block_until_ready(out["gst_embeds"])

    assert out["gst_embeds"].shape == (B, gst_embeds_size)
    assert out["gst_scores"].shape == (B,) + gst_scores_shape
    assert out["cache"][0].shape == (B, T, H)
    assert out["cache"][1].shape == (1, B, H)

    ref_emb, ref_sco, ref_hout, ref_last = _dgst_reference(
        params, input_embeds, attention_mask, gst_scores_shape)
    assert jnp.allclose(out["gst_embeds"], ref_emb, atol=5e-2, rtol=5e-2)
    assert jnp.allclose(out["gst_scores"], ref_sco, atol=5e-2, rtol=5e-2)
    assert jnp.allclose(out["cache"][0], ref_hout, atol=5e-2, rtol=5e-2)
    assert jnp.allclose(out["cache"][1], ref_last, atol=5e-2, rtol=5e-2)

    # ---- Test 2: multi-chunk grid (T=20, Tt=8 -> 3 chunks, tail masked),
    #      batch padding (B=3 -> 8), no mask, no cache. -------------------------
    B2, T2 = 3, 20
    x2 = jax.random.normal(k_x2, (B2, T2, H), jnp.float32)
    out2 = dgst_forward(params, x2, attention_mask=None, use_cache=False,
                        gst_scores_shape=gst_scores_shape, t_chunk=8)
    jax.block_until_ready(out2["gst_embeds"])
    assert out2["cache"] is None
    ref2_emb, ref2_sco, _, _ = _dgst_reference(params, x2, None, gst_scores_shape)
    assert jnp.allclose(out2["gst_embeds"], ref2_emb, atol=5e-2, rtol=5e-2)
    assert jnp.allclose(out2["gst_scores"], ref2_sco, atol=5e-2, rtol=5e-2)

    # ---- Test 3: multi-chunk with mask + cache (exercises pipelined
    #      batch-first cache writeback across chunks). -------------------------
    mask2 = (jnp.arange(T2)[None, :] < jnp.array([20, 13, 5])[:, None]).astype(jnp.float32)
    out3 = dgst_forward(params, x2, attention_mask=mask2, use_cache=True,
                        gst_scores_shape=gst_scores_shape, t_chunk=8)
    jax.block_until_ready(out3["gst_embeds"])
    ref3_emb, ref3_sco, ref3_hout, ref3_last = _dgst_reference(
        params, x2, mask2, gst_scores_shape)
    assert jnp.allclose(out3["gst_embeds"], ref3_emb, atol=5e-2, rtol=5e-2)
    assert jnp.allclose(out3["gst_scores"], ref3_sco, atol=5e-2, rtol=5e-2)
    assert jnp.allclose(out3["cache"][0], ref3_hout, atol=5e-2, rtol=5e-2)
    assert jnp.allclose(out3["cache"][1], ref3_last, atol=5e-2, rtol=5e-2)

    print("KERNEL_OK")
</pallas_src>

<mosaic_0001>
module attributes {stable_mosaic.version = 11 : i64} {
  func.func @_dgst_kernel(%arg0: i32, %arg1: memref<8x8x96xf32, #tpu.memory_space<vmem>>, %arg2: memref<32x96xf32, #tpu.memory_space<vmem>>, %arg3: memref<1x32xf32, #tpu.memory_space<vmem>>, %arg4: memref<8x1xi32, #tpu.memory_space<vmem>>, %arg5: memref<1x32xf32, #tpu.memory_space<vmem>>, %arg6: memref<1x32xf32, #tpu.memory_space<vmem>>, %arg7: memref<32x128xf32, #tpu.memory_space<vmem>>, %arg8: memref<8x128xf32, #tpu.memory_space<vmem>>, %arg9: memref<8x8x32xf32, #tpu.memory_space<vmem>>, %arg10: memref<8x32xf32, #tpu.memory_space<vmem>>, %arg11: memref<8x32xf32, #tpu.memory_space<vmem>>, %arg12: memref<8x32xf32, #tpu.memory_space<vmem>>) attributes {dimension_semantics = [#tpu.dimension_semantics<arbitrary>], iteration_bounds = array<i64: 1>, scalar_prefetch = 0 : i64, scratch_operands = 2 : i64, tpu.core_type = #tpu.core_type<tc>, window_params = [{transform_indices = @transform_0, window_bounds = array<i64: 8, 8, 96>}, {pipeline_mode = #tpu.pipeline_mode<synchronous>, transform_indices = @transform_1, window_bounds = array<i64: 32, 96>}, {pipeline_mode = #tpu.pipeline_mode<synchronous>, transform_indices = @transform_2, window_bounds = array<i64: 1, 32>}, {pipeline_mode = #tpu.pipeline_mode<synchronous>, transform_indices = @transform_3, window_bounds = array<i64: 8, 1>}, {pipeline_mode = #tpu.pipeline_mode<synchronous>, transform_indices = @transform_4, window_bounds = array<i64: 1, 32>}, {pipeline_mode = #tpu.pipeline_mode<synchronous>, transform_indices = @transform_5, window_bounds = array<i64: 1, 32>}, {pipeline_mode = #tpu.pipeline_mode<synchronous>, transform_indices = @transform_6, window_bounds = array<i64: 32, 128>}, {pipeline_mode = #tpu.pipeline_mode<synchronous>, transform_indices = @transform_7, window_bounds = array<i64: 8, 128>}, {transform_indices = @transform_8, window_bounds = array<i64: 8, 8, 32>}, {pipeline_mode = #tpu.pipeline_mode<synchronous>, transform_indices = @transform_9, window_bounds = array<i64: 8, 32>}]} {
    %c0_i32 = arith.constant 0 : i32
    %0 = arith.cmpi eq, %arg0, %c0_i32 : i32
    %1 = arith.extui %0 : i1 to i32
    %c0_i32_0 = arith.constant 0 : i32
    %2 = arith.cmpi ne, %1, %c0_i32_0 : i32
    scf.if %2 {
      %cst_81 = arith.constant 0.000000e+00 : f32
      %342 = vector.broadcast %cst_81 : f32 to vector<8x32xf32>
      %c0_82 = arith.constant 0 : index
      %c0_83 = arith.constant 0 : index
      %343 = vector.load %arg11[%c0_82, %c0_83] : memref<8x32xf32, #tpu.memory_space<vmem>>, vector<8x32xf32>
      tpu.vector_store %arg11[%c0_82, %c0_83], %342 {strides = array<i32>} : memref<8x32xf32, #tpu.memory_space<vmem>>, vector<8x32xf32>,
      %cst_84 = arith.constant 0.000000e+00 : f32
      %344 = vector.broadcast %cst_84 : f32 to vector<8x32xf32>
      %c0_85 = arith.constant 0 : index
      %c0_86 = arith.constant 0 : index
      %345 = vector.load %arg12[%c0_85, %c0_86] : memref<8x32xf32, #tpu.memory_space<vmem>>, vector<8x32xf32>
      tpu.vector_store %arg12[%c0_85, %c0_86], %344 {strides = array<i32>} : memref<8x32xf32, #tpu.memory_space<vmem>>, vector<8x32xf32>,
    } else {
    }
    %c0 = arith.constant 0 : index
    %c0_1 = arith.constant 0 : index
    %3 = vector.load %arg2[%c0, %c0_1] : memref<32x96xf32, #tpu.memory_space<vmem>>, vector<32x96xf32>
    %c0_2 = arith.constant 0 : index
    %c0_3 = arith.constant 0 : index
    %4 = vector.load %arg3[%c0_2, %c0_3] : memref<1x32xf32, #tpu.memory_space<vmem>>, vector<1x32xf32>
    %c0_4 = arith.constant 0 : index
    %c0_5 = arith.constant 0 : index
    %5 = vector.load %arg4[%c0_4, %c0_5] : memref<8x1xi32, #tpu.memory_space<vmem>>, vector<8x1xi32>
    %c8_i32 = arith.constant 8 : i32
    %6 = arith.muli %arg0, %c8_i32 : i32
    %c0_6 = arith.constant 0 : index
    %c0_7 = arith.constant 0 : index
    %7 = vector.load %arg11[%c0_6, %c0_7] : memref<8x32xf32, #tpu.memory_space<vmem>>, vector<8x32xf32>
    %c0_8 = arith.constant 0 : index
    %c0_9 = arith.constant 0 : index
    %8 = vector.load %arg12[%c0_8, %c0_9] : memref<8x32xf32, #tpu.memory_space<vmem>>, vector<8x32xf32>
    %c0_i32_10 = arith.constant 0 : i32
    %c0_11 = arith.constant 0 : index
    %9 = arith.index_cast %c0_i32_10 : i32 to index
    %c0_12 = arith.constant 0 : index
    %10 = vector.load %arg1[%c0_11, %9, %c0_12] : memref<8x8x96xf32, #tpu.memory_space<vmem>>, vector<8x1x96xf32>
    %11 = vector.shape_cast %10 : vector<8x1x96xf32> to vector<8x96xf32>
    %cst = arith.constant dense<0.000000e+00> : vector<8x96xf32>
    %12 = tpu.matmul %7, %3, %cst {dimension_numbers = #tpu.dot_dimension_numbers<[1], [0], [0], [1], [0, 0, 1, 1], [], []>} : vector<8x32xf32>, vector<32x96xf32>, vector<8x96xf32> -> vector<8x96xf32>
    %13 = vector.extract_strided_slice %11 {offsets = [0, 0], sizes = [8, 32], strides = [1, 1]} : vector<8x96xf32> to vector<8x32xf32>
    %14 = vector.extract_strided_slice %12 {offsets = [0, 0], sizes = [8, 32], strides = [1, 1]} : vector<8x96xf32> to vector<8x32xf32>
    %15 = arith.addf %13, %14 : vector<8x32xf32>
    %16 = arith.negf %15 : vector<8x32xf32>
    %17 = math.exp %16 : vector<8x32xf32>
    %cst_13 = arith.constant 1.000000e+00 : f32
    %18 = vector.broadcast %cst_13 : f32 to vector<8x32xf32>
    %19 = arith.addf %18, %17 : vector<8x32xf32>
    %20 = arith.divf %18, %19 : vector<8x32xf32>
    %21 = vector.extract_strided_slice %11 {offsets = [0, 32], sizes = [8, 32], strides = [1, 1]} : vector<8x96xf32> to vector<8x32xf32>
    %22 = vector.extract_strided_slice %12 {offsets = [0, 32], sizes = [8, 32], strides = [1, 1]} : vector<8x96xf32> to vector<8x32xf32>
    %23 = arith.addf %21, %22 : vector<8x32xf32>
    %24 = arith.negf %23 : vector<8x32xf32>
    %25 = math.exp %24 : vector<8x32xf32>
    %cst_14 = arith.constant 1.000000e+00 : f32
    %26 = vector.broadcast %cst_14 : f32 to vector<8x32xf32>
    %27 = arith.addf %26, %25 : vector<8x32xf32>
    %28 = arith.divf %26, %27 : vector<8x32xf32>
    %29 = vector.extract_strided_slice %11 {offsets = [0, 64], sizes = [8, 32], strides = [1, 1]} : vector<8x96xf32> to vector<8x32xf32>
    %30 = vector.extract_strided_slice %12 {offsets = [0, 64], sizes = [8, 32], strides = [1, 1]} : vector<8x96xf32> to vector<8x32xf32>
    %31 = vector.broadcast %4 : vector<1x32xf32> to vector<8x32xf32>
    %32 = arith.addf %30, %31 : vector<8x32xf32>
    %33 = arith.mulf %20, %32 : vector<8x32xf32>
    %34 = arith.addf %29, %33 : vector<8x32xf32>
    %35 = math.tanh %34 : vector<8x32xf32>
    %cst_15 = arith.constant 1.000000e+00 : f32
    %36 = vector.broadcast %cst_15 : f32 to vector<8x32xf32>
    %37 = arith.subf %36, %28 : vector<8x32xf32>
    %38 = arith.mulf %37, %35 : vector<8x32xf32>
    %39 = arith.mulf %28, %7 : vector<8x32xf32>
    %40 = arith.addf %38, %39 : vector<8x32xf32>
    %41 = vector.shape_cast %40 : vector<8x32xf32> to vector<8x1x32xf32>
    %c0_16 = arith.constant 0 : index
    %42 = arith.index_cast %c0_i32_10 : i32 to index
    %c0_17 = arith.constant 0 : index
    %43 = vector.load %arg9[%c0_16, %42, %c0_17] : memref<8x8x32xf32, #tpu.memory_space<vmem>>, vector<8x1x32xf32>
    tpu.vector_store %arg9[%c0_16, %42, %c0_17], %41 {strides = array<i32>} : memref<8x8x32xf32, #tpu.memory_space<vmem>>, vector<8x1x32xf32>,
    %44 = arith.addi %6, %c0_i32_10 : i32
    %45 = vector.broadcast %44 : i32 to vector<8x1xi32>
    %46 = arith.cmpi eq, %5, %45 : vector<8x1xi32>
    %47 = vector.shape_cast %46 : vector<8x1xi1> to vector<8x1xi1>
    %48 = vector.broadcast %47 : vector<8x1xi1> to vector<8x32xi1>
    %49 = arith.select %48, %40, %8 : vector<8x32xi1>, vector<8x32xf32>
    %c1_i32 = arith.constant 1 : i32
    %c0_18 = arith.constant 0 : index
    %50 = arith.index_cast %c1_i32 : i32 to index
    %c0_19 = arith.constant 0 : index
    %51 = vector.load %arg1[%c0_18, %50, %c0_19] : memref<8x8x96xf32, #tpu.memory_space<vmem>>, vector<8x1x96xf32>
    %52 = vector.shape_cast %51 : vector<8x1x96xf32> to vector<8x96xf32>
    %cst_20 = arith.constant dense<0.000000e+00> : vector<8x96xf32>
    %53 = tpu.matmul %40, %3, %cst_20 {dimension_numbers = #tpu.dot_dimension_numbers<[1], [0], [0], [1], [0, 0, 1, 1], [], []>} : vector<8x32xf32>, vector<32x96xf32>, vector<8x96xf32> -> vector<8x96xf32>
    %54 = vector.extract_strided_slice %52 {offsets = [0, 0], sizes = [8, 32], strides = [1, 1]} : vector<8x96xf32> to vector<8x32xf32>
    %55 = vector.extract_strided_slice %53 {offsets = [0, 0], sizes = [8, 32], strides = [1, 1]} : vector<8x96xf32> to vector<8x32xf32>
    %56 = arith.addf %54, %55 : vector<8x32xf32>
    %57 = arith.negf %56 : vector<8x32xf32>
    %58 = math.exp %57 : vector<8x32xf32>
    %cst_21 = arith.constant 1.000000e+00 : f32
    %59 = vector.broadcast %cst_21 : f32 to vector<8x32xf32>
    %60 = arith.addf %59, %58 : vector<8x32xf32>
    %61 = arith.divf %59, %60 : vector<8x32xf32>
    %62 = vector.extract_strided_slice %52 {offsets = [0, 32], sizes = [8, 32], strides = [1, 1]} : vector<8x96xf32> to vector<8x32xf32>
    %63 = vector.extract_strided_slice %53 {offsets = [0, 32], sizes = [8, 32], strides = [1, 1]} : vector<8x96xf32> to vector<8x32xf32>
    %64 = arith.addf %62, %63 : vector<8x32xf32>
    %65 = arith.negf %64 : vector<8x32xf32>
    %66 = math.exp %65 : vector<8x32xf32>
    %cst_22 = arith.constant 1.000000e+00 : f32
    %67 = vector.broadcast %cst_22 : f32 to vector<8x32xf32>
    %68 = arith.addf %67, %66 : vector<8x32xf32>
    %69 = arith.divf %67, %68 : vector<8x32xf32>
    %70 = vector.extract_strided_slice %52 {offsets = [0, 64], sizes = [8, 32], strides = [1, 1]} : vector<8x96xf32> to vector<8x32xf32>
    %71 = vector.extract_strided_slice %53 {offsets = [0, 64], sizes = [8, 32], strides = [1, 1]} : vector<8x96xf32> to vector<8x32xf32>
    %72 = vector.broadcast %4 : vector<1x32xf32> to vector<8x32xf32>
    %73 = arith.addf %71, %72 : vector<8x32xf32>
    %74 = arith.mulf %61, %73 : vector<8x32xf32>
    %75 = arith.addf %70, %74 : vector<8x32xf32>
    %76 = math.tanh %75 : vector<8x32xf32>
    %cst_23 = arith.constant 1.000000e+00 : f32
    %77 = vector.broadcast %cst_23 : f32 to vector<8x32xf32>
    %78 = arith.subf %77, %69 : vector<8x32xf32>
    %79 = arith.mulf %78, %76 : vector<8x32xf32>
    %80 = arith.mulf %69, %40 : vector<8x32xf32>
    %81 = arith.addf %79, %80 : vector<8x32xf32>
    %82 = vector.shape_cast %81 : vector<8x32xf32> to vector<8x1x32xf32>
    %c0_24 = arith.constant 0 : index
    %83 = arith.index_cast %c1_i32 : i32 to index
    %c0_25 = arith.constant 0 : index
    %84 = vector.load %arg9[%c0_24, %83, %c0_25] : memref<8x8x32xf32, #tpu.memory_space<vmem>>, vector<8x1x32xf32>
    tpu.vector_store %arg9[%c0_24, %83, %c0_25], %82 {strides = array<i32>} : memref<8x8x32xf32, #tpu.memory_space<vmem>>, vector<8x1x32xf32>,
    %85 = arith.addi %6, %c1_i32 : i32
    %86 = vector.broadcast %85 : i32 to vector<8x1xi32>
    %87 = arith.cmpi eq, %5, %86 : vector<8x1xi32>
    %88 = vector.shape_cast %87 : vector<8x1xi1> to vector<8x1xi1>
    %89 = vector.broadcast %88 : vector<8x1xi1> to vector<8x32xi1>
    %90 = arith.select %89, %81, %49 : vector<8x32xi1>, vector<8x32xf32>
    %c2_i32 = arith.constant 2 : i32
    %c0_26 = arith.constant 0 : index
    %91 = arith.index_cast %c2_i32 : i32 to index
    %c0_27 = arith.constant 0 : index
    %92 = vector.load %arg1[%c0_26, %91, %c0_27] : memref<8x8x96xf32, #tpu.memory_space<vmem>>, vector<8x1x96xf32>
    %93 = vector.shape_cast %92 : vector<8x1x96xf32> to vector<8x96xf32>
    %cst_28 = arith.constant dense<0.000000e+00> : vector<8x96xf32>
    %94 = tpu.matmul %81, %3, %cst_28 {dimension_numbers = #tpu.dot_dimension_numbers<[1], [0], [0], [1], [0, 0, 1, 1], [], []>} : vector<8x32xf32>, vector<32x96xf32>, vector<8x96xf32> -> vector<8x96xf32>
    %95 = vector.extract_strided_slice %93 {offsets = [0, 0], sizes = [8, 32], strides = [1, 1]} : vector<8x96xf32> to vector<8x32xf32>
    %96 = vector.extract_strided_slice %94 {offsets = [0, 0], sizes = [8, 32], strides = [1, 1]} : vector<8x96xf32> to vector<8x32xf32>
    %97 = arith.addf %95, %96 : vector<8x32xf32>
    %98 = arith.negf %97 : vector<8x32xf32>
    %99 = math.exp %98 : vector<8x32xf32>
    %cst_29 = arith.constant 1.000000e+00 : f32
    %100 = vector.broadcast %cst_29 : f32 to vector<8x32xf32>
    %101 = arith.addf %100, %99 : vector<8x32xf32>
    %102 = arith.divf %100, %101 : vector<8x32xf32>
    %103 = vector.extract_strided_slice %93 {offsets = [0, 32], sizes = [8, 32], strides = [1, 1]} : vector<8x96xf32> to vector<8x32xf32>
    %104 = vector.extract_strided_slice %94 {offsets = [0, 32], sizes = [8, 32], strides = [1, 1]} : vector<8x96xf32> to vector<8x32xf32>
    %105 = arith.addf %103, %104 : vector<8x32xf32>
    %106 = arith.negf %105 : vector<8x32xf32>
    %107 = math.exp %106 : vector<8x32xf32>
    %cst_30 = arith.constant 1.000000e+00 : f32
    %108 = vector.broadcast %cst_30 : f32 to vector<8x32xf32>
    %109 = arith.addf %108, %107 : vector<8x32xf32>
    %110 = arith.divf %108, %109 : vector<8x32xf32>
    %111 = vector.extract_strided_slice %93 {offsets = [0, 64], sizes = [8, 32], strides = [1, 1]} : vector<8x96xf32> to vector<8x32xf32>
    %112 = vector.extract_strided_slice %94 {offsets = [0, 64], sizes = [8, 32], strides = [1, 1]} : vector<8x96xf32> to vector<8x32xf32>
    %113 = vector.broadcast %4 : vector<1x32xf32> to vector<8x32xf32>
    %114 = arith.addf %112, %113 : vector<8x32xf32>
    %115 = arith.mulf %102, %114 : vector<8x32xf32>
    %116 = arith.addf %111, %115 : vector<8x32xf32>
    %117 = math.tanh %116 : vector<8x32xf32>
    %cst_31 = arith.constant 1.000000e+00 : f32
    %118 = vector.broadcast %cst_31 : f32 to vector<8x32xf32>
    %119 = arith.subf %118, %110 : vector<8x32xf32>
    %120 = arith.mulf %119, %117 : vector<8x32xf32>
    %121 = arith.mulf %110, %81 : vector<8x32xf32>
    %122 = arith.addf %120, %121 : vector<8x32xf32>
    %123 = vector.shape_cast %122 : vector<8x32xf32> to vector<8x1x32xf32>
    %c0_32 = arith.constant 0 : index
    %124 = arith.index_cast %c2_i32 : i32 to index
    %c0_33 = arith.constant 0 : index
    %125 = vector.load %arg9[%c0_32, %124, %c0_33] : memref<8x8x32xf32, #tpu.memory_space<vmem>>, vector<8x1x32xf32>
    tpu.vector_store %arg9[%c0_32, %124, %c0_33], %123 {strides = array<i32>} : memref<8x8x32xf32, #tpu.memory_space<vmem>>, vector<8x1x32xf32>,
    %126 = arith.addi %6, %c2_i32 : i32
    %127 = vector.broadcast %126 : i32 to vector<8x1xi32>
    %128 = arith.cmpi eq, %5, %127 : vector<8x1xi32>
    %129 = vector.shape_cast %128 : vector<8x1xi1> to vector<8x1xi1>
    %130 = vector.broadcast %129 : vector<8x1xi1> to vector<8x32xi1>
    %131 = arith.select %130, %122, %90 : vector<8x32xi1>, vector<8x32xf32>
    %c3_i32 = arith.constant 3 : i32
    %c0_34 = arith.constant 0 : index
    %132 = arith.index_cast %c3_i32 : i32 to index
    %c0_35 = arith.constant 0 : index
    %133 = vector.load %arg1[%c0_34, %132, %c0_35] : memref<8x8x96xf32, #tpu.memory_space<vmem>>, vector<8x1x96xf32>
    %134 = vector.shape_cast %133 : vector<8x1x96xf32> to vector<8x96xf32>
    %cst_36 = arith.constant dense<0.000000e+00> : vector<8x96xf32>
    %135 = tpu.matmul %122, %3, %cst_36 {dimension_numbers = #tpu.dot_dimension_numbers<[1], [0], [0], [1], [0, 0, 1, 1], [], []>} : vector<8x32xf32>, vector<32x96xf32>, vector<8x96xf32> -> vector<8x96xf32>
    %136 = vector.extract_strided_slice %134 {offsets = [0, 0], sizes = [8, 32], strides = [1, 1]} : vector<8x96xf32> to vector<8x32xf32>
    %137 = vector.extract_strided_slice %135 {offsets = [0, 0], sizes = [8, 32], strides = [1, 1]} : vector<8x96xf32> to vector<8x32xf32>
    %138 = arith.addf %136, %137 : vector<8x32xf32>
    %139 = arith.negf %138 : vector<8x32xf32>
    %140 = math.exp %139 : vector<8x32xf32>
    %cst_37 = arith.constant 1.000000e+00 : f32
    %141 = vector.broadcast %cst_37 : f32 to vector<8x32xf32>
    %142 = arith.addf %141, %140 : vector<8x32xf32>
    %143 = arith.divf %141, %142 : vector<8x32xf32>
    %144 = vector.extract_strided_slice %134 {offsets = [0, 32], sizes = [8, 32], strides = [1, 1]} : vector<8x96xf32> to vector<8x32xf32>
    %145 = vector.extract_strided_slice %135 {offsets = [0, 32], sizes = [8, 32], strides = [1, 1]} : vector<8x96xf32> to vector<8x32xf32>
    %146 = arith.addf %144, %145 : vector<8x32xf32>
    %147 = arith.negf %146 : vector<8x32xf32>
    %148 = math.exp %147 : vector<8x32xf32>
    %cst_38 = arith.constant 1.000000e+00 : f32
    %149 = vector.broadcast %cst_38 : f32 to vector<8x32xf32>
    %150 = arith.addf %149, %148 : vector<8x32xf32>
    %151 = arith.divf %149, %150 : vector<8x32xf32>
    %152 = vector.extract_strided_slice %134 {offsets = [0, 64], sizes = [8, 32], strides = [1, 1]} : vector<8x96xf32> to vector<8x32xf32>
    %153 = vector.extract_strided_slice %135 {offsets = [0, 64], sizes = [8, 32], strides = [1, 1]} : vector<8x96xf32> to vector<8x32xf32>
    %154 = vector.broadcast %4 : vector<1x32xf32> to vector<8x32xf32>
    %155 = arith.addf %153, %154 : vector<8x32xf32>
    %156 = arith.mulf %143, %155 : vector<8x32xf32>
    %157 = arith.addf %152, %156 : vector<8x32xf32>
    %158 = math.tanh %157 : vector<8x32xf32>
    %cst_39 = arith.constant 1.000000e+00 : f32
    %159 = vector.broadcast %cst_39 : f32 to vector<8x32xf32>
    %160 = arith.subf %159, %151 : vector<8x32xf32>
    %161 = arith.mulf %160, %158 : vector<8x32xf32>
    %162 = arith.mulf %151, %122 : vector<8x32xf32>
    %163 = arith.addf %161, %162 : vector<8x32xf32>
    %164 = vector.shape_cast %163 : vector<8x32xf32> to vector<8x1x32xf32>
    %c0_40 = arith.constant 0 : index
    %165 = arith.index_cast %c3_i32 : i32 to index
    %c0_41 = arith.constant 0 : index
    %166 = vector.load %arg9[%c0_40, %165, %c0_41] : memref<8x8x32xf32, #tpu.memory_space<vmem>>, vector<8x1x32xf32>
    tpu.vector_store %arg9[%c0_40, %165, %c0_41], %164 {strides = array<i32>} : memref<8x8x32xf32, #tpu.memory_space<vmem>>, vector<8x1x32xf32>,
    %167 = arith.addi %6, %c3_i32 : i32
    %168 = vector.broadcast %167 : i32 to vector<8x1xi32>
    %169 = arith.cmpi eq, %5, %168 : vector<8x1xi32>
    %170 = vector.shape_cast %169 : vector<8x1xi1> to vector<8x1xi1>
    %171 = vector.broadcast %170 : vector<8x1xi1> to vector<8x32xi1>
    %172 = arith.select %171, %163, %131 : vector<8x32xi1>, vector<8x32xf32>
    %c4_i32 = arith.constant 4 : i32
    %c0_42 = arith.constant 0 : index
    %173 = arith.index_cast %c4_i32 : i32 to index
    %c0_43 = arith.constant 0 : index
    %174 = vector.load %arg1[%c0_42, %173, %c0_43] : memref<8x8x96xf32, #tpu.memory_space<vmem>>, vector<8x1x96xf32>
    %175 = vector.shape_cast %174 : vector<8x1x96xf32> to vector<8x96xf32>
    %cst_44 = arith.constant dense<0.000000e+00> : vector<8x96xf32>
    %176 = tpu.matmul %163, %3, %cst_44 {dimension_numbers = #tpu.dot_dimension_numbers<[1], [0], [0], [1], [0, 0, 1, 1], [], []>} : vector<8x32xf32>, vector<32x96xf32>, vector<8x96xf32> -> vector<8x96xf32>
    %177 = vector.extract_strided_slice %175 {offsets = [0, 0], sizes = [8, 32], strides = [1, 1]} : vector<8x96xf32> to vector<8x32xf32>
    %178 = vector.extract_strided_slice %176 {offsets = [0, 0], sizes = [8, 32], strides = [1, 1]} : vector<8x96xf32> to vector<8x32xf32>
    %179 = arith.addf %177, %178 : vector<8x32xf32>
    %180 = arith.negf %179 : vector<8x32xf32>
    %181 = math.exp %180 : vector<8x32xf32>
    %cst_45 = arith.constant 1.000000e+00 : f32
    %182 = vector.broadcast %cst_45 : f32 to vector<8x32xf32>
    %183 = arith.addf %182, %181 : vector<8x32xf32>
    %184 = arith.divf %182, %183 : vector<8x32xf32>
    %185 = vector.extract_strided_slice %175 {offsets = [0, 32], sizes = [8, 32], strides = [1, 1]} : vector<8x96xf32> to vector<8x32xf32>
    %186 = vector.extract_strided_slice %176 {offsets = [0, 32], sizes = [8, 32], strides = [1, 1]} : vector<8x96xf32> to vector<8x32xf32>
    %187 = arith.addf %185, %186 : vector<8x32xf32>
    %188 = arith.negf %187 : vector<8x32xf32>
    %189 = math.exp %188 : vector<8x32xf32>
    %cst_46 = arith.constant 1.000000e+00 : f32
    %190 = vector.broadcast %cst_46 : f32 to vector<8x32xf32>
    %191 = arith.addf %190, %189 : vector<8x32xf32>
    %192 = arith.divf %190, %191 : vector<8x32xf32>
    %193 = vector.extract_strided_slice %175 {offsets = [0, 64], sizes = [8, 32], strides = [1, 1]} : vector<8x96xf32> to vector<8x32xf32>
    %194 = vector.extract_strided_slice %176 {offsets = [0, 64], sizes = [8, 32], strides = [1, 1]} : vector<8x96xf32> to vector<8x32xf32>
    %195 = vector.broadcast %4 : vector<1x32xf32> to vector<8x32xf32>
    %196 = arith.addf %194, %195 : vector<8x32xf32>
    %197 = arith.mulf %184, %196 : vector<8x32xf32>
    %198 = arith.addf %193, %197 : vector<8x32xf32>
    %199 = math.tanh %198 : vector<8x32xf32>
    %cst_47 = arith.constant 1.000000e+00 : f32
    %200 = vector.broadcast %cst_47 : f32 to vector<8x32xf32>
    %201 = arith.subf %200, %192 : vector<8x32xf32>
    %202 = arith.mulf %201, %199 : vector<8x32xf32>
    %203 = arith.mulf %192, %163 : vector<8x32xf32>
    %204 = arith.addf %202, %203 : vector<8x32xf32>
    %205 = vector.shape_cast %204 : vector<8x32xf32> to vector<8x1x32xf32>
    %c0_48 = arith.constant 0 : index
    %206 = arith.index_cast %c4_i32 : i32 to index
    %c0_49 = arith.constant 0 : index
    %207 = vector.load %arg9[%c0_48, %206, %c0_49] : memref<8x8x32xf32, #tpu.memory_space<vmem>>, vector<8x1x32xf32>
    tpu.vector_store %arg9[%c0_48, %206, %c0_49], %205 {strides = array<i32>} : memref<8x8x32xf32, #tpu.memory_space<vmem>>, vector<8x1x32xf32>,
    %208 = arith.addi %6, %c4_i32 : i32
    %209 = vector.broadcast %208 : i32 to vector<8x1xi32>
    %210 = arith.cmpi eq, %5, %209 : vector<8x1xi32>
    %211 = vector.shape_cast %210 : vector<8x1xi1> to vector<8x1xi1>
    %212 = vector.broadcast %211 : vector<8x1xi1> to vector<8x32xi1>
    %213 = arith.select %212, %204, %172 : vector<8x32xi1>, vector<8x32xf32>
    %c5_i32 = arith.constant 5 : i32
    %c0_50 = arith.constant 0 : index
    %214 = arith.index_cast %c5_i32 : i32 to index
    %c0_51 = arith.constant 0 : index
    %215 = vector.load %arg1[%c0_50, %214, %c0_51] : memref<8x8x96xf32, #tpu.memory_space<vmem>>, vector<8x1x96xf32>
    %216 = vector.shape_cast %215 : vector<8x1x96xf32> to vector<8x96xf32>
    %cst_52 = arith.constant dense<0.000000e+00> : vector<8x96xf32>
    %217 = tpu.matmul %204, %3, %cst_52 {dimension_numbers = #tpu.dot_dimension_numbers<[1], [0], [0], [1], [0, 0, 1, 1], [], []>} : vector<8x32xf32>, vector<32x96xf32>, vector<8x96xf32> -> vector<8x96xf32>
    %218 = vector.extract_strided_slice %216 {offsets = [0, 0], sizes = [8, 32], strides = [1, 1]} : vector<8x96xf32> to vector<8x32xf32>
    %219 = vector.extract_strided_slice %217 {offsets = [0, 0], sizes = [8, 32], strides = [1, 1]} : vector<8x96xf32> to vector<8x32xf32>
    %220 = arith.addf %218, %219 : vector<8x32xf32>
    %221 = arith.negf %220 : vector<8x32xf32>
    %222 = math.exp %221 : vector<8x32xf32>
    %cst_53 = arith.constant 1.000000e+00 : f32
    %223 = vector.broadcast %cst_53 : f32 to vector<8x32xf32>
    %224 = arith.addf %223, %222 : vector<8x32xf32>
    %225 = arith.divf %223, %224 : vector<8x32xf32>
    %226 = vector.extract_strided_slice %216 {offsets = [0, 32], sizes = [8, 32], strides = [1, 1]} : vector<8x96xf32> to vector<8x32xf32>
    %227 = vector.extract_strided_slice %217 {offsets = [0, 32], sizes = [8, 32], strides = [1, 1]} : vector<8x96xf32> to vector<8x32xf32>
    %228 = arith.addf %226, %227 : vector<8x32xf32>
    %229 = arith.negf %228 : vector<8x32xf32>
    %230 = math.exp %229 : vector<8x32xf32>
    %cst_54 = arith.constant 1.000000e+00 : f32
    %231 = vector.broadcast %cst_54 : f32 to vector<8x32xf32>
    %232 = arith.addf %231, %230 : vector<8x32xf32>
    %233 = arith.divf %231, %232 : vector<8x32xf32>
    %234 = vector.extract_strided_slice %216 {offsets = [0, 64], sizes = [8, 32], strides = [1, 1]} : vector<8x96xf32> to vector<8x32xf32>
    %235 = vector.extract_strided_slice %217 {offsets = [0, 64], sizes = [8, 32], strides = [1, 1]} : vector<8x96xf32> to vector<8x32xf32>
    %236 = vector.broadcast %4 : vector<1x32xf32> to vector<8x32xf32>
    %237 = arith.addf %235, %236 : vector<8x32xf32>
    %238 = arith.mulf %225, %237 : vector<8x32xf32>
    %239 = arith.addf %234, %238 : vector<8x32xf32>
    %240 = math.tanh %239 : vector<8x32xf32>
    %cst_55 = arith.constant 1.000000e+00 : f32
    %241 = vector.broadcast %cst_55 : f32 to vector<8x32xf32>
    %242 = arith.subf %241, %233 : vector<8x32xf32>
    %243 = arith.mulf %242, %240 : vector<8x32xf32>
    %244 = arith.mulf %233, %204 : vector<8x32xf32>
    %245 = arith.addf %243, %244 : vector<8x32xf32>
    %246 = vector.shape_cast %245 : vector<8x32xf32> to vector<8x1x32xf32>
    %c0_56 = arith.constant 0 : index
    %247 = arith.index_cast %c5_i32 : i32 to index
    %c0_57 = arith.constant 0 : index
    %248 = vector.load %arg9[%c0_56, %247, %c0_57] : memref<8x8x32xf32, #tpu.memory_space<vmem>>, vector<8x1x32xf32>
    tpu.vector_store %arg9[%c0_56, %247, %c0_57], %246 {strides = array<i32>} : memref<8x8x32xf32, #tpu.memory_space<vmem>>, vector<8x1x32xf32>,
    %249 = arith.addi %6, %c5_i32 : i32
    %250 = vector.broadcast %249 : i32 to vector<8x1xi32>
    %251 = arith.cmpi eq, %5, %250 : vector<8x1xi32>
    %252 = vector.shape_cast %251 : vector<8x1xi1> to vector<8x1xi1>
    %253 = vector.broadcast %252 : vector<8x1xi1> to vector<8x32xi1>
    %254 = arith.select %253, %245, %213 : vector<8x32xi1>, vector<8x32xf32>
    %c6_i32 = arith.constant 6 : i32
    %c0_58 = arith.constant 0 : index
    %255 = arith.index_cast %c6_i32 : i32 to index
    %c0_59 = arith.constant 0 : index
    %256 = vector.load %arg1[%c0_58, %255, %c0_59] : memref<8x8x96xf32, #tpu.memory_space<vmem>>, vector<8x1x96xf32>
    %257 = vector.shape_cast %256 : vector<8x1x96xf32> to vector<8x96xf32>
    %cst_60 = arith.constant dense<0.000000e+00> : vector<8x96xf32>
    %258 = tpu.matmul %245, %3, %cst_60 {dimension_numbers = #tpu.dot_dimension_numbers<[1], [0], [0], [1], [0, 0, 1, 1], [], []>} : vector<8x32xf32>, vector<32x96xf32>, vector<8x96xf32> -> vector<8x96xf32>
    %259 = vector.extract_strided_slice %257 {offsets = [0, 0], sizes = [8, 32], strides = [1, 1]} : vector<8x96xf32> to vector<8x32xf32>
    %260 = vector.extract_strided_slice %258 {offsets = [0, 0], sizes = [8, 32], strides = [1, 1]} : vector<8x96xf32> to vector<8x32xf32>
    %261 = arith.addf %259, %260 : vector<8x32xf32>
    %262 = arith.negf %261 : vector<8x32xf32>
    %263 = math.exp %262 : vector<8x32xf32>
    %cst_61 = arith.constant 1.000000e+00 : f32
    %264 = vector.broadcast %cst_61 : f32 to vector<8x32xf32>
    %265 = arith.addf %264, %263 : vector<8x32xf32>
    %266 = arith.divf %264, %265 : vector<8x32xf32>
    %267 = vector.extract_strided_slice %257 {offsets = [0, 32], sizes = [8, 32], strides = [1, 1]} : vector<8x96xf32> to vector<8x32xf32>
    %268 = vector.extract_strided_slice %258 {offsets = [0, 32], sizes = [8, 32], strides = [1, 1]} : vector<8x96xf32> to vector<8x32xf32>
    %269 = arith.addf %267, %268 : vector<8x32xf32>
    %270 = arith.negf %269 : vector<8x32xf32>
    %271 = math.exp %270 : vector<8x32xf32>
    %cst_62 = arith.constant 1.000000e+00 : f32
    %272 = vector.broadcast %cst_62 : f32 to vector<8x32xf32>
    %273 = arith.addf %272, %271 : vector<8x32xf32>
    %274 = arith.divf %272, %273 : vector<8x32xf32>
    %275 = vector.extract_strided_slice %257 {offsets = [0, 64], sizes = [8, 32], strides = [1, 1]} : vector<8x96xf32> to vector<8x32xf32>
    %276 = vector.extract_strided_slice %258 {offsets = [0, 64], sizes = [8, 32], strides = [1, 1]} : vector<8x96xf32> to vector<8x32xf32>
    %277 = vector.broadcast %4 : vector<1x32xf32> to vector<8x32xf32>
    %278 = arith.addf %276, %277 : vector<8x32xf32>
    %279 = arith.mulf %266, %278 : vector<8x32xf32>
    %280 = arith.addf %275, %279 : vector<8x32xf32>
    %281 = math.tanh %280 : vector<8x32xf32>
    %cst_63 = arith.constant 1.000000e+00 : f32
    %282 = vector.broadcast %cst_63 : f32 to vector<8x32xf32>
    %283 = arith.subf %282, %274 : vector<8x32xf32>
    %284 = arith.mulf %283, %281 : vector<8x32xf32>
    %285 = arith.mulf %274, %245 : vector<8x32xf32>
    %286 = arith.addf %284, %285 : vector<8x32xf32>
    %287 = vector.shape_cast %286 : vector<8x32xf32> to vector<8x1x32xf32>
    %c0_64 = arith.constant 0 : index
    %288 = arith.index_cast %c6_i32 : i32 to index
    %c0_65 = arith.constant 0 : index
    %289 = vector.load %arg9[%c0_64, %288, %c0_65] : memref<8x8x32xf32, #tpu.memory_space<vmem>>, vector<8x1x32xf32>
    tpu.vector_store %arg9[%c0_64, %288, %c0_65], %287 {strides = array<i32>} : memref<8x8x32xf32, #tpu.memory_space<vmem>>, vector<8x1x32xf32>,
    %290 = arith.addi %6, %c6_i32 : i32
    %291 = vector.broadcast %290 : i32 to vector<8x1xi32>
    %292 = arith.cmpi eq, %5, %291 : vector<8x1xi32>
    %293 = vector.shape_cast %292 : vector<8x1xi1> to vector<8x1xi1>
    %294 = vector.broadcast %293 : vector<8x1xi1> to vector<8x32xi1>
    %295 = arith.select %294, %286, %254 : vector<8x32xi1>, vector<8x32xf32>
    %c7_i32 = arith.constant 7 : i32
    %c0_66 = arith.constant 0 : index
    %296 = arith.index_cast %c7_i32 : i32 to index
    %c0_67 = arith.constant 0 : index
    %297 = vector.load %arg1[%c0_66, %296, %c0_67] : memref<8x8x96xf32, #tpu.memory_space<vmem>>, vector<8x1x96xf32>
    %298 = vector.shape_cast %297 : vector<8x1x96xf32> to vector<8x96xf32>
    %cst_68 = arith.constant dense<0.000000e+00> : vector<8x96xf32>
    %299 = tpu.matmul %286, %3, %cst_68 {dimension_numbers = #tpu.dot_dimension_numbers<[1], [0], [0], [1], [0, 0, 1, 1], [], []>} : vector<8x32xf32>, vector<32x96xf32>, vector<8x96xf32> -> vector<8x96xf32>
    %300 = vector.extract_strided_slice %298 {offsets = [0, 0], sizes = [8, 32], strides = [1, 1]} : vector<8x96xf32> to vector<8x32xf32>
    %301 = vector.extract_strided_slice %299 {offsets = [0, 0], sizes = [8, 32], strides = [1, 1]} : vector<8x96xf32> to vector<8x32xf32>
    %302 = arith.addf %300, %301 : vector<8x32xf32>
    %303 = arith.negf %302 : vector<8x32xf32>
    %304 = math.exp %303 : vector<8x32xf32>
    %cst_69 = arith.constant 1.000000e+00 : f32
    %305 = vector.broadcast %cst_69 : f32 to vector<8x32xf32>
    %306 = arith.addf %305, %304 : vector<8x32xf32>
    %307 = arith.divf %305, %306 : vector<8x32xf32>
    %308 = vector.extract_strided_slice %298 {offsets = [0, 32], sizes = [8, 32], strides = [1, 1]} : vector<8x96xf32> to vector<8x32xf32>
    %309 = vector.extract_strided_slice %299 {offsets = [0, 32], sizes = [8, 32], strides = [1, 1]} : vector<8x96xf32> to vector<8x32xf32>
    %310 = arith.addf %308, %309 : vector<8x32xf32>
    %311 = arith.negf %310 : vector<8x32xf32>
    %312 = math.exp %311 : vector<8x32xf32>
    %cst_70 = arith.constant 1.000000e+00 : f32
    %313 = vector.broadcast %cst_70 : f32 to vector<8x32xf32>
    %314 = arith.addf %313, %312 : vector<8x32xf32>
    %315 = arith.divf %313, %314 : vector<8x32xf32>
    %316 = vector.extract_strided_slice %298 {offsets = [0, 64], sizes = [8, 32], strides = [1, 1]} : vector<8x96xf32> to vector<8x32xf32>
    %317 = vector.extract_strided_slice %299 {offsets = [0, 64], sizes = [8, 32], strides = [1, 1]} : vector<8x96xf32> to vector<8x32xf32>
    %318 = vector.broadcast %4 : vector<1x32xf32> to vector<8x32xf32>
    %319 = arith.addf %317, %318 : vector<8x32xf32>
    %320 = arith.mulf %307, %319 : vector<8x32xf32>
    %321 = arith.addf %316, %320 : vector<8x32xf32>
    %322 = math.tanh %321 : vector<8x32xf32>
    %cst_71 = arith.constant 1.000000e+00 : f32
    %323 = vector.broadcast %cst_71 : f32 to vector<8x32xf32>
    %324 = arith.subf %323, %315 : vector<8x32xf32>
    %325 = arith.mulf %324, %322 : vector<8x32xf32>
    %326 = arith.mulf %315, %286 : vector<8x32xf32>
    %327 = arith.addf %325, %326 : vector<8x32xf32>
    %328 = vector.shape_cast %327 : vector<8x32xf32> to vector<8x1x32xf32>
    %c0_72 = arith.constant 0 : index
    %329 = arith.index_cast %c7_i32 : i32 to index
    %c0_73 = arith.constant 0 : index
    %330 = vector.load %arg9[%c0_72, %329, %c0_73] : memref<8x8x32xf32, #tpu.memory_space<vmem>>, vector<8x1x32xf32>
    tpu.vector_store %arg9[%c0_72, %329, %c0_73], %328 {strides = array<i32>} : memref<8x8x32xf32, #tpu.memory_space<vmem>>, vector<8x1x32xf32>,
    %331 = arith.addi %6, %c7_i32 : i32
    %332 = vector.broadcast %331 : i32 to vector<8x1xi32>
    %333 = arith.cmpi eq, %5, %332 : vector<8x1xi32>
    %334 = vector.shape_cast %333 : vector<8x1xi1> to vector<8x1xi1>
    %335 = vector.broadcast %334 : vector<8x1xi1> to vector<8x32xi1>
    %336 = arith.select %335, %327, %295 : vector<8x32xi1>, vector<8x32xf32>
    %c8_i32_74 = arith.constant 8 : i32
    %c0_75 = arith.constant 0 : index
    %c0_76 = arith.constant 0 : index
    %337 = vector.load %arg11[%c0_75, %c0_76] : memref<8x32xf32, #tpu.memory_space<vmem>>, vector<8x32xf32>
    tpu.vector_store %arg11[%c0_75, %c0_76], %327 {strides = array<i32>} : memref<8x32xf32, #tpu.memory_space<vmem>>, vector<8x32xf32>,
    %c0_77 = arith.constant 0 : index
    %c0_78 = arith.constant 0 : index
    %338 = vector.load %arg12[%c0_77, %c0_78] : memref<8x32xf32, #tpu.memory_space<vmem>>, vector<8x32xf32>
    tpu.vector_store %arg12[%c0_77, %c0_78], %336 {strides = array<i32>} : memref<8x32xf32, #tpu.memory_space<vmem>>, vector<8x32xf32>,
    %c0_i32_79 = arith.constant 0 : i32
    %339 = arith.cmpi eq, %arg0, %c0_i32_79 : i32
    %340 = arith.extui %339 : i1 to i32
    %c0_i32_80 = arith.constant 0 : i32
    %341 = arith.cmpi ne, %340, %c0_i32_80 : i32
    scf.if %341 {
      %c0_81 = arith.constant 0 : index
      %c0_82 = arith.constant 0 : index
      %342 = vector.load %arg10[%c0_81, %c0_82] : memref<8x32xf32, #tpu.memory_space<vmem>>, vector<8x32xf32>
      tpu.vector_store %arg10[%c0_81, %c0_82], %327 {strides = array<i32>} : memref<8x32xf32, #tpu.memory_space<vmem>>, vector<8x32xf32>,
      %cst_83 = arith.constant dense<0.000000e+00> : vector<8xf32>
      %343 = vector.multi_reduction <add>, %336, %cst_83 [1] : vector<8x32xf32> to vector<8xf32>
      %344 = vector.shape_cast %343 : vector<8xf32> to vector<8x1xf32>
      %cst_84 = arith.constant 3.200000e+01 : f32
      %345 = vector.broadcast %cst_84 : f32 to vector<8x1xf32>
      %346 = arith.divf %344, %345 : vector<8x1xf32>
      %347 = vector.broadcast %346 : vector<8x1xf32> to vector<8x32xf32>
      %348 = arith.subf %336, %347 : vector<8x32xf32>
      %349 = arith.mulf %348, %348 : vector<8x32xf32>
      %cst_85 = arith.constant dense<0.000000e+00> : vector<8xf32>
      %350 = vector.multi_reduction <add>, %349, %cst_85 [1] : vector<8x32xf32> to vector<8xf32>
      %351 = vector.shape_cast %350 : vector<8xf32> to vector<8x1xf32>
      %cst_86 = arith.constant 3.200000e+01 : f32
      %352 = vector.broadcast %cst_86 : f32 to vector<8x1xf32>
      %353 = arith.divf %351, %352 : vector<8x1xf32>
      %354 = vector.broadcast %346 : vector<8x1xf32> to vector<8x32xf32>
      %355 = arith.subf %336, %354 : vector<8x32xf32>
      %cst_87 = arith.constant 9.99999974E-6 : f32
      %356 = vector.broadcast %cst_87 : f32 to vector<8x1xf32>
      %357 = arith.addf %353, %356 : vector<8x1xf32>
      %358 = math.rsqrt %357 : vector<8x1xf32>
      %359 = vector.broadcast %358 : vector<8x1xf32> to vector<8x32xf32>
      %360 = arith.mulf %355, %359 : vector<8x32xf32>
      %c0_88 = arith.constant 0 : index
      %c0_89 = arith.constant 0 : index
      %361 = vector.load %arg5[%c0_88, %c0_89] : memref<1x32xf32, #tpu.memory_space<vmem>>, vector<1x32xf32>
      %362 = vector.broadcast %361 : vector<1x32xf32> to vector<8x32xf32>
      %363 = arith.mulf %360, %362 : vector<8x32xf32>
      %c0_90 = arith.constant 0 : index
      %c0_91 = arith.constant 0 : index
      %364 = vector.load %arg6[%c0_90, %c0_91] : memref<1x32xf32, #tpu.memory_space<vmem>>, vector<1x32xf32>
      %365 = vector.broadcast %364 : vector<1x32xf32> to vector<8x32xf32>
      %366 = arith.addf %363, %365 : vector<8x32xf32>
      %c0_92 = arith.constant 0 : index
      %c0_93 = arith.constant 0 : index
      %367 = vector.load %arg7[%c0_92, %c0_93] : memref<32x128xf32, #tpu.memory_space<vmem>>, vector<32x128xf32>
      %cst_94 = arith.constant dense<0.000000e+00> : vector<8x128xf32>
      %368 = tpu.matmul %366, %367, %cst_94 {dimension_numbers = #tpu.dot_dimension_numbers<[1], [0], [0], [1], [0, 0, 1, 1], [], []>} : vector<8x32xf32>, vector<32x128xf32>, vector<8x128xf32> -> vector<8x128xf32>
      %c0_95 = arith.constant 0 : index
      %c0_96 = arith.constant 0 : index
      %369 = vector.load %arg8[%c0_95, %c0_96] : memref<8x128xf32, #tpu.memory_space<vmem>>, vector<8x128xf32>
      tpu.vector_store %arg8[%c0_95, %c0_96], %368 {strides = array<i32>} : memref<8x128xf32, #tpu.memory_space<vmem>>, vector<8x128xf32>,
    } else {
    }
    return
  }
  func.func @transform_0(%arg0: i32) -> (i32, i32, i32) {
    %c0_i32 = arith.constant 0 : i32
    %c0_i32_0 = arith.constant 0 : i32
    %c0_i32_1 = arith.constant 0 : i32
    return %c0_i32, %arg0, %c0_i32_0 : i32, i32, i32
  }
  func.func @transform_1(%arg0: i32) -> (i32, i32) {
    %c0_i32 = arith.constant 0 : i32
    %c0_i32_0 = arith.constant 0 : i32
    %c0_i32_1 = arith.constant 0 : i32
    return %c0_i32, %c0_i32_0 : i32, i32
  }
  func.func @transform_2(%arg0: i32) -> (i32, i32) {
    %c0_i32 = arith.constant 0 : i32
    %c0_i32_0 = arith.constant 0 : i32
    %c0_i32_1 = arith.constant 0 : i32
    return %c0_i32, %c0_i32_0 : i32, i32
  }
  func.func @transform_3(%arg0: i32) -> (i32, i32) {
    %c0_i32 = arith.constant 0 : i32
    %c0_i32_0 = arith.constant 0 : i32
    %c0_i32_1 = arith.constant 0 : i32
    return %c0_i32, %c0_i32_0 : i32, i32
  }
  func.func @transform_4(%arg0: i32) -> (i32, i32) {
    %c0_i32 = arith.constant 0 : i32
    %c0_i32_0 = arith.constant 0 : i32
    %c0_i32_1 = arith.constant 0 : i32
    return %c0_i32, %c0_i32_0 : i32, i32
  }
  func.func @transform_5(%arg0: i32) -> (i32, i32) {
    %c0_i32 = arith.constant 0 : i32
    %c0_i32_0 = arith.constant 0 : i32
    %c0_i32_1 = arith.constant 0 : i32
    return %c0_i32, %c0_i32_0 : i32, i32
  }
  func.func @transform_6(%arg0: i32) -> (i32, i32) {
    %c0_i32 = arith.constant 0 : i32
    %c0_i32_0 = arith.constant 0 : i32
    %c0_i32_1 = arith.constant 0 : i32
    return %c0_i32, %c0_i32_0 : i32, i32
  }
  func.func @transform_7(%arg0: i32) -> (i32, i32) {
    %c0_i32 = arith.constant 0 : i32
    %c0_i32_0 = arith.constant 0 : i32
    %c0_i32_1 = arith.constant 0 : i32
    return %c0_i32, %c0_i32_0 : i32, i32
  }
  func.func @transform_8(%arg0: i32) -> (i32, i32, i32) {
    %c0_i32 = arith.constant 0 : i32
    %c0_i32_0 = arith.constant 0 : i32
    %c0_i32_1 = arith.constant 0 : i32
    return %c0_i32, %arg0, %c0_i32_0 : i32, i32, i32
  }
  func.func @transform_9(%arg0: i32) -> (i32, i32) {
    %c0_i32 = arith.constant 0 : i32
    %c0_i32_0 = arith.constant 0 : i32
    %c0_i32_1 = arith.constant 0 : i32
    return %c0_i32, %c0_i32_0 : i32, i32
  }
}

</mosaic_0001>

<bundles_post_ra>
// kernel: tpu_custom_call.1
= control target key start
LH: loop header
LB: loop body
LE: loop exit
PB: predicated region body
PF: predicated region fallthrough
CT: control target
= control target key end

     0   :  { %15 = vsyncpa [#allocation5], 0  ;;  %s5667_s0 = inlined_call_operand.hbm [shape: f32[8,8,96], index: 0, kind: input, shape index: {}]   ;;  %s5668_s1 = inlined_call_operand.hbm [shape: f32[32,96], index: 1, kind: input, shape index: {}]   ;;  %s5669_s2 = inlined_call_operand.vmem [shape: f32[1,32], index: 2, kind: input, shape index: {}]   ;;  %s5670_s3 = inlined_call_operand.vmem [shape: s32[8,1], index: 3, kind: input, shape index: {}]   ;;  %s5671_s4 = inlined_call_operand.vmem [shape: f32[1,32], index: 4, kind: input, shape index: {}]   ;;  %s5672_s5 = inlined_call_operand.vmem [shape: f32[1,32], index: 5, kind: input, shape index: {}]   ;;  %s5673_s6 = inlined_call_operand.hbm [shape: f32[32,128], index: 6, kind: input, shape index: {}]   ;;  %s5674_s7 = inlined_call_operand.hbm [shape: f32[8,128], index: 7, kind: output, shape index: {0}]   ;;  %s5675_s8 = inlined_call_operand.hbm [shape: f32[8,8,32], index: 8, kind: output, shape index: {1}]   ;;  %s5676_s9 = inlined_call_operand.hbm [shape: f32[8,32], index: 9, kind: output, shape index: {2}]  }
   0x1   :  { %16 = vsyncpa [#allocation8], 0 }
   0x2   :  { %17 = vsyncpa [#allocation6], 0 }
   0x3   :  { %18 = vsyncpa [#allocation12], 0  ;;  %s4080_s30 = smov [#allocation7]   ;;  %s4081_s11 = smov [#allocation4]  }
   0x4   :  { %s36_s10 = sshll.u32 %s4080_s30, 4  ;;  %s24_s12 = sshll.u32 %s4081_s11, 4  ;;  %s37_s10 = int_to_ptr.vmem [resolvable:$true] %s36_s10  ;;  %s4145_s12 = int_to_ptr.vmem [resolvable:$true] %s24_s12 }
   0x5   :  { %s3940_s15 = scalar_lea.hbm %s5668_s1, 512 }
   0x6   :  { %p3941_p0 = scmp.ne.s32.totalorder %s5668_s1, %s3940_s15  ;;  %p3944_p1 = scmp.lt.u32.totalorder %s3940_s15, %s5668_s1 }
   0x8   :  { %p3946_p2 = pnand %p3944_p1, %p3941_p0 }
   0xa   :  { %3949 = shalt.err (!%p3946_p2)
}
   0xb   :  { %s3950_s20 = scalar_lea.vmem %s37_s10, 512  ;;  %p3955_p4 = scmp.lt.s32.totalorder %s37_s10, %s37_s10 }
   0xc   :  { %p3951_p3 = scmp.ne.s32.totalorder %s37_s10, %s3950_s20  ;;  %p3956_p5 = scmp.lt.s32.totalorder %s3950_s20, %s3950_s20 }
   0xe   :  { %p3957_p6 = por %p3956_p5, %p3955_p4 }
  0x10   :  { %p3958_p7 = pnand %p3957_p6, %p3951_p3 }
  0x12   :  { %3961 = shalt.err (!%p3958_p7)
}
  0x13   :  { %s4082_s21 = smov 128   ;;  %s4083_s22 = smov 8  }
  0x14   :  { %42 = dma.hbm_to_vmem [thread:$0]  %s5668_s1, 512, %s37_s10, [#allocation8], %s4082_s21, %s4082_s21, %s4083_s22  }
  0x15   :  { %s3962_s27 = scalar_lea.hbm %s5667_s0, 1024 }
  0x16   :  { %p3963_p8 = scmp.ne.s32.totalorder %s5667_s0, %s3962_s27  ;;  %p3966_p9 = scmp.lt.u32.totalorder %s3962_s27, %s5667_s0 }
  0x18   :  { %p3968_p10 = pnand %p3966_p9, %p3963_p8 }
  0x1a   :  { %3971 = shalt.err (!%p3968_p10)
}
  0x1b   :  { %s3972_s13 = scalar_lea.vmem %s4145_s12, 1024  ;;  %p3977_p12 = scmp.lt.s32.totalorder %s4145_s12, %s4145_s12 }
  0x1c   :  { %p3973_p11 = scmp.ne.s32.totalorder %s4145_s12, %s3972_s13  ;;  %p3978_p13 = scmp.lt.s32.totalorder %s3972_s13, %s3972_s13 }
  0x1e   :  { %p3979_p0 = por %p3978_p13, %p3977_p12 }
  0x20   :  { %p3980_p1 = pnand %p3979_p0, %p3973_p11 }
  0x22   :  { %3983 = shalt.err (!%p3980_p1)
}
  0x23   :  { %30 = dma.hbm_to_vmem [thread:$0]  %s5667_s0, 1024, %s4145_s12, [#allocation5], %s4082_s21, %s4082_s21, %s4083_s22  }
  0x24   :  { %s4084_s14 = smov [#allocation9]   ;;  %s3984_s18 = scalar_lea.hbm %s5673_s6, 512 }
  0x25   :  { %s56_s15 = sshll.u32 %s4084_s14, 4  ;;  %p3985_p2 = scmp.ne.s32.totalorder %s5673_s6, %s3984_s18  ;;  %s57_s15 = int_to_ptr.vmem [resolvable:$true] %s56_s15 }
  0x26   :  { %p3988_p3 = scmp.lt.u32.totalorder %s3984_s18, %s5673_s6 }
  0x28   :  { %p3990_p4 = pnand %p3988_p3, %p3985_p2 }
  0x2a   :  { %3993 = shalt.err (!%p3990_p4)
}
  0x2b   :  { %s3994_s25 = scalar_lea.vmem %s57_s15, 512  ;;  %p3999_p6 = scmp.lt.s32.totalorder %s57_s15, %s57_s15 }
  0x2c   :  { %p3995_p5 = scmp.ne.s32.totalorder %s57_s15, %s3994_s25  ;;  %p4000_p7 = scmp.lt.s32.totalorder %s3994_s25, %s3994_s25 }
  0x2e   :  { %p4001_p8 = por %p4000_p7, %p3999_p6 }
  0x30   :  { %p4002_p9 = pnand %p4001_p8, %p3995_p5 }
  0x32   :  { %4005 = shalt.err (!%p4002_p9)
}
  0x33   :  { %62 = dma.hbm_to_vmem [thread:$0]  %s5673_s6, 512, %s57_s15, [#allocation8], %s4082_s21, %s4082_s21, %s4083_s22  }
  0x34   :  { %4072 = dma.done.wait [#allocation5], 1024  }
  0x35   :  { %4073 = vsyncadd [#allocation5], 4294966272 }
  0x36   :  { %4074 = dma.done.wait [#allocation8], 1024  }
  0x37   :  { %4075 = vsyncadd [#allocation8], 4294966272  ;;  %vm76_vm0 = vcmask 261120   ;;  %v5677_v0 = vmov 0.0|0.0   ;;  %vm4086_vm1 = vmmov 0   ;;  %v5679_v1 = vmov 0.0  }
  0x38   :  { %3483 = vmatprep.subr.bf16.mxu0 %v5677_v0  ;;  %3392 = vmatprep.mubr.msk.f32.mxu0 %vm4086_vm1, %v5679_v1  ;;  %77 = vst.msk [vmem:[#allocation2] sm:$0xff] %vm76_vm0, %v5679_v1  ;;  %78 = vst.msk [vmem:[#allocation3] sm:$0xff] %vm76_vm0, %v5679_v1  ;;  %v79_v2 = vld [vmem:[#allocation7] sm:$0xff]  ;;  %v80_v3 = vld [vmem:[#allocation7 + $0x8] sm:$0xff]  ;;  %s4088_s27 = smov 64   ;;  %s4090_s28 = smov 96  }
  0x39   :  { %3489 = vmatprep.subr.bf16.mxu1 %v5677_v0  ;;  %3403 = vmatprep.mubr.msk.f32.mxu1 %vm4086_vm1, %v5679_v1  ;;  %v81_v4 = vld [vmem:[#allocation7 + $0x10] sm:$0xff]  ;;  %v4207_v5 = vpack.c.bf16 %v80_v3, %v79_v2  ;;  %v82_v6 = vld [vmem:[#allocation7 + $0x18] sm:$0xff]  ;;  %v4244_v21 = vld [vmem:[#allocation4] sm:$0x1]  ;;  %vm483_vm2 = vcmask 1041409   ;;  %vm486_vm3 = vcmask 1042434  }
  0x3a   :  { %v3272_v7 = vld [vmem:[%s5669_s2] ss:$0 sm:$0xff]  ;;  %v4214_v8 = vpack.c.bf16 %v82_v6, %v81_v4  ;;  %v4246_v23 = vld [vmem:[#allocation4 + $0x8] sm:$0x1]  ;;  %v4252_v29 = vld [vmem:[#allocation4 + $0x18] sm:$0x1] }
  0x3b   :  { %247 = vrot.lane.b32.xlu0 %v3272_v7, %s4088_s27  ;;  %3485 = vmatpush3.bf16.msra.mxu0 %v4207_v5  ;;  %v4249_v26 = vld [vmem:[#allocation4 + $0x10] sm:$0x1]  ;;  %v4255_v33 = vld [vmem:[#allocation4 + $0x20] sm:$0x1]  ;;  %v4258_v37 = vld [vmem:[#allocation4 + $0x28] sm:$0x1] }
  0x3c   :  { %3491 = vmatpush3.bf16.msra.mxu1 %v4207_v5  ;;  %3486 = vmatprep.subr.bf16.mxu0 %v5677_v0  ;;  %v4261_v41 = vld [vmem:[#allocation4 + $0x30] sm:$0x1]  ;;  %v4265_v47 = vld [vmem:[#allocation4 + $0x38] sm:$0x1]  ;;  %s4089_s2 = smov 32   ;;  %vm489_vm4 = vcmask 1043459  }
  0x3d   :  { %3492 = vmatprep.subr.bf16.mxu1 %v5677_v0  ;;  %vm492_vm5 = vcmask 1044484   ;;  %vm495_vm6 = vcmask 1045509   ;;  %vm498_vm7 = vcmask 1046534   ;;  %vm501_vm8 = vcmask 1047559   ;;  %s4093_s10 = smov [#allocation13]  }
  0x3e   :  { %s3246_s14 = sshll.u32 %s4093_s10, 4  ;;  %s3247_s14 = int_to_ptr.vmem [resolvable:$true] %s3246_s14 }
  0x3f   :  { %3488 = vmatpush3.bf16.msra.mxu0 %v4214_v8  ;;  %v4220_v9 = vld [vmem:[#allocation2] sm:$0xff] }
  0x40   :  { %3494 = vmatpush3.bf16.msra.mxu1 %v4214_v8  ;;  %3495 = vmatprep.subr.bf16.mxu0 %v5677_v0 }
  0x41   :  { %3501 = vmatprep.subr.bf16.mxu1 %v5677_v0 }
  0x42   :  { %3393 = vmatmul.mubr.msk.f32.vlgmr.msra.gmra.mrb[0].mxu0 %vm76_vm0, %v4220_v9 }
  0x43   :  { %3497 = vmatpush3.bf16.msra.mxu0 %v4207_v5  ;;  %3414 = vmatprep.mubr.msk.f32.mxu0 %vm4086_vm1, %v5679_v1 }
  0x44   :  { %3498 = vmatprep.subr.bf16.mxu0 %v5677_v0 }
  0x47   :  { %3500 = vmatpush3.bf16.msra.mxu0 %v4214_v8 }
  0x48   :  { %3507 = vmatprep.subr.bf16.mxu0 %v5677_v0 }
  0xad   :  { %v4233_v12 = vpop.permute.xlu0 %247 }
 0x115   :  { %v166_v10 = vpop.f32.mrb[0].mxu0 }
 0x116   :  { %v3394_v11 = vpop.f32.mrb[1].mxu0  ;;  %v250_v13 = vadd.f32 %v4233_v12, %v166_v10  ;;  %v171_v22 = vrot.slane %v166_v10, 1  ;;  %v172_v24 = vrot.slane %v166_v10, 2  ;;  %v186_v25 = vadd.f32 %v166_v10, %v4244_v21 }
 0x117   :  { %v173_v27 = vrot.slane %v166_v10, 3  ;;  %v174_v30 = vrot.slane %v166_v10, 4  ;;  %v175_v34 = vrot.slane %v166_v10, 5  ;;  %v176_v38 = vrot.slane %v166_v10, 6 }
 0x118   :  { %259 = vrot.lane.b32.xlu1 %v250_v13, %s4088_s27  ;;  %v252_v14 = vrot.slane %v250_v13, 1  ;;  %v253_v15 = vrot.slane %v250_v13, 2  ;;  %v254_v16 = vrot.slane %v250_v13, 3  ;;  %v255_v17 = vrot.slane %v250_v13, 4 }
 0x119   :  { %v256_v18 = vrot.slane %v250_v13, 5  ;;  %v257_v19 = vrot.slane %v250_v13, 6  ;;  %v258_v20 = vrot.slane %v250_v13, 7  ;;  %v187_v28 = vadd.f32 %v171_v22, %v4246_v23 }
 0x11a   :  { %261 = vrot.lane.b32.xlu0 %v252_v14, %s4088_s27  ;;  %v188_v31 = vadd.f32 %v172_v24, %v4249_v26  ;;  %v3264_v32 = vmul.f32 -1.442695, %v186_v25  ;;  %v189_v35 = vadd.f32 %v173_v27, %v4252_v29  ;;  %v190_v39 = vadd.f32 %v174_v30, %v4255_v33 }
 0x11b   :  { %v3265_v36 = vmul.f32 -1.442695, %v187_v28  ;;  %v191_v42 = vadd.f32 %v175_v34, %v4258_v37  ;;  %v177_v44 = vrot.slane %v166_v10, 7  ;;  %v192_v45 = vadd.f32 %v176_v38, %v4261_v41 }
 0x11c   :  { %263 = vrot.lane.b32.xlu1 %v253_v15, %s4088_s27  ;;  %3554 = vpow2.f32 %v3264_v32  ;;  %v3266_v40 = vmul.f32 -1.442695, %v188_v31  ;;  %v3267_v43 = vmul.f32 -1.442695, %v189_v35  ;;  %v3268_v46 = vmul.f32 -1.442695, %v190_v39 }
 0x11d   :  { %3556 = vpow2.f32 %v3265_v36  ;;  %v3269_v48 = vmul.f32 -1.442695, %v191_v42  ;;  %v193_v49 = vadd.f32 %v177_v44, %v4265_v47  ;;  %v3270_v50 = vmul.f32 -1.442695, %v192_v45 }
 0x11e   :  { %265 = vrot.lane.b32.xlu0 %v254_v16, %s4088_s27  ;;  %3558 = vpow2.f32 %v3266_v40  ;;  %v387_v40 = vrot.slane %v4220_v9, 1  ;;  %v388_v42 = vrot.slane %v4220_v9, 2  ;;  %v390_v44 = vrot.slane %v4220_v9, 4 }
 0x11f   :  { %3560 = vpow2.f32 %v3267_v43  ;;  %v3271_v52 = vmul.f32 -1.442695, %v193_v49  ;;  %v389_v43 = vrot.slane %v4220_v9, 3  ;;  %v391_v45 = vrot.slane %v4220_v9, 5 }
 0x120   :  { %267 = vrot.lane.b32.xlu1 %v255_v17, %s4088_s27  ;;  %3562 = vpow2.f32 %v3268_v46  ;;  %v392_v46 = vrot.slane %v4220_v9, 6 }
 0x121   :  { %3564 = vpow2.f32 %v3269_v48 }
 0x122   :  { %269 = vrot.lane.b32.xlu0 %v256_v18, %s4088_s27  ;;  %3566 = vpow2.f32 %v3270_v50 }
 0x123   :  { %3568 = vpow2.f32 %v3271_v52 }
 0x124   :  { %271 = vrot.lane.b32.xlu1 %v257_v19, %s4088_s27 }
 0x126   :  { %273 = vrot.lane.b32.xlu0 %v258_v20, %s4088_s27  ;;  %v3555_v51 = vpop.eup %3554 }
 0x127   :  { %v3557_v53 = vpop.eup %3556  ;;  %v218_v54 = vadd.f32 1.0, %v3555_v51 }
 0x128   :  { %v3559_v55 = vpop.eup %3558  ;;  %v219_v56 = vadd.f32 1.0, %v3557_v53 }
 0x129   :  { %v3561_v57 = vpop.eup %3560  ;;  %3570 = vrcp.f32 %v218_v54  ;;  %v220_v58 = vadd.f32 1.0, %v3559_v55 }
 0x12a   :  { %v3563_v59 = vpop.eup %3562  ;;  %3572 = vrcp.f32 %v219_v56  ;;  %v221_v60 = vadd.f32 1.0, %v3561_v57 }
 0x12b   :  { %v3565_v61 = vpop.eup %3564  ;;  %3574 = vrcp.f32 %v220_v58  ;;  %v222_v62 = vadd.f32 1.0, %v3563_v59 }
 0x12c   :  { %v3567_v63 = vpop.eup %3566  ;;  %3576 = vrcp.f32 %v221_v60  ;;  %v223_v2 = vadd.f32 1.0, %v3565_v61 }
 0x12d   :  { %3578 = vrcp.f32 %v222_v62  ;;  %v224_v3 = vadd.f32 1.0, %v3567_v63  ;;  %v3569_v4 = vpop.eup %3568 }
 0x12e   :  { %3580 = vrcp.f32 %v223_v2  ;;  %v225_v13 = vadd.f32 1.0, %v3569_v4 }
 0x12f   :  { %3582 = vrcp.f32 %v224_v3 }
 0x130   :  { %3584 = vrcp.f32 %v225_v13 }
 0x133   :  { %v4268_v6 = vpop.eup %3570 }
 0x134   :  { %v4271_v14 = vpop.eup %3572 }
 0x135   :  { %v4274_v15 = vpop.eup %3574 }
 0x136   :  { %v4278_v20 = vpop.eup %3576 }
 0x137   :  { %v4282_v22 = vpop.eup %3578 }
 0x138   :  { %v4286_v30 = vpop.eup %3580 }
 0x139   :  { %v4290_v31 = vpop.eup %3582 }
 0x13a   :  { %v4296_v38 = vpop.eup %3584 }
 0x18a   :  { %v260_v7 = vpop.permute.xlu1 %259 }
 0x18b   :  { %v283_v10 = vmul.f32 %v4268_v6, %v260_v7 }
 0x18c   :  { %v262_v11 = vpop.permute.xlu0 %261 }
 0x18d   :  { %299 = vrot.lane.b32.xlu1 %v283_v10, %s4088_s27  ;;  %v284_v17 = vmul.f32 %v4271_v14, %v262_v11 }
 0x18e   :  { %v264_v16 = vpop.permute.xlu1 %263 }
 0x18f   :  { %v285_v18 = vmul.f32 %v4274_v15, %v264_v16 }
 0x190   :  { %v266_v19 = vpop.permute.xlu0 %265 }
 0x191   :  { %303 = vrot.lane.b32.xlu0 %v285_v18, %s4088_s27  ;;  %301 = vrot.lane.b32.xlu1 %v284_v17, %s4088_s27  ;;  %v286_v25 = vmul.f32 %v4278_v20, %v266_v19  ;;  %v340_v19 = vsub.f32 1.0, %v4271_v14 }
 0x192   :  { %v268_v24 = vpop.permute.xlu1 %267 }
 0x193   :  { %v287_v27 = vmul.f32 %v4282_v22, %v268_v24  ;;  %v341_v24 = vsub.f32 1.0, %v4274_v15 }
 0x194   :  { %v270_v28 = vpop.permute.xlu0 %269 }
 0x195   :  { %305 = vrot.lane.b32.xlu0 %v286_v25, %s4088_s27  ;;  %307 = vrot.lane.b32.xlu1 %v287_v27, %s4088_s27  ;;  %v288_v34 = vmul.f32 %v4286_v30, %v270_v28 }
 0x196   :  { %v272_v32 = vpop.permute.xlu1 %271 }
 0x197   :  { %v289_v35 = vmul.f32 %v4290_v31, %v272_v32 }
 0x198   :  { %v274_v36 = vpop.permute.xlu0 %273 }
 0x199   :  { %309 = vrot.lane.b32.xlu0 %v288_v34, %s4088_s27  ;;  %311 = vrot.lane.b32.xlu1 %v289_v35, %s4088_s27  ;;  %v290_v39 = vmul.f32 %v4296_v38, %v274_v36  ;;  %v342_v35 = vsub.f32 1.0, %v4278_v20 }
 0x19d   :  { %313 = vrot.lane.b32.xlu0 %v290_v39, %s4088_s27  ;;  %394 = vrot.lane.b32.xlu1 %v4220_v9, %s4089_s2  ;;  %v343_v39 = vsub.f32 1.0, %v4282_v22 }
 0x1a1   :  { %396 = vrot.lane.b32.xlu0 %v387_v40, %s4089_s2  ;;  %v339_v40 = vsub.f32 1.0, %v4268_v6 }
 0x1a5   :  { %398 = vrot.lane.b32.xlu0 %v388_v42, %s4089_s2 }
 0x1a9   :  { %400 = vrot.lane.b32.xlu0 %v389_v43, %s4089_s2 }
 0x1ad   :  { %402 = vrot.lane.b32.xlu0 %v390_v44, %s4089_s2  ;;  %v344_v44 = vsub.f32 1.0, %v4286_v30 }
 0x1b1   :  { %404 = vrot.lane.b32.xlu0 %v391_v45, %s4089_s2 }
 0x1b5   :  { %406 = vrot.lane.b32.xlu0 %v392_v46, %s4089_s2 }
 0x1ff   :  { %v300_v48 = vpop.permute.xlu1 %299 }
 0x200   :  { %v323_v49 = vadd.f32 %v300_v48, %v4244_v21 }
 0x202   :  { %3586 = vtanh.f32 %v323_v49 }
 0x203   :  { %v304_v50 = vpop.permute.xlu0 %303  ;;  %v302_v51 = vpop.permute.xlu1 %301 }
 0x204   :  { %v324_v52 = vadd.f32 %v302_v51, %v4246_v23  ;;  %v325_v53 = vadd.f32 %v304_v50, %v4249_v26 }
 0x206   :  { %3588 = vtanh.f32 %v324_v52 }
 0x207   :  { %v306_v54 = vpop.permute.xlu0 %305  ;;  %v308_v56 = vpop.permute.xlu1 %307 }
 0x208   :  { %v326_v55 = vadd.f32 %v306_v54, %v4252_v29  ;;  %v327_v57 = vadd.f32 %v308_v56, %v4255_v33  ;;  %v393_v33 = vrot.slane %v4220_v9, 7 }
 0x20a   :  { %3590 = vtanh.f32 %v326_v55 }
 0x20b   :  { %3592 = vtanh.f32 %v325_v53  ;;  %v310_v59 = vpop.permute.xlu0 %309  ;;  %v312_v23 = vpop.permute.xlu1 %311 }
 0x20c   :  { %v3587_v58 = vpop.eup %3586  ;;  %3594 = vtanh.f32 %v327_v57  ;;  %v328_v21 = vadd.f32 %v310_v59, %v4258_v37  ;;  %v329_v26 = vadd.f32 %v312_v23, %v4261_v41 }
 0x20d   :  { %355 = vrot.lane.b32.xlu1 %v3587_v58, %s4090_s28 }
 0x20e   :  { %3596 = vtanh.f32 %v328_v21 }
 0x20f   :  { %v314_v61 = vpop.permute.xlu0 %313  ;;  %3598 = vtanh.f32 %v329_v26  ;;  %v395_v10 = vpop.permute.xlu1 %394  ;;  %v346_v26 = vsub.f32 1.0, %v4296_v38 }
 0x210   :  { %v3589_v60 = vpop.eup %3588  ;;  %v330_v63 = vadd.f32 %v314_v61, %v4265_v47  ;;  %v418_v52 = vmul.f32 %v4268_v6, %v395_v10 }
 0x211   :  { %357 = vrot.lane.b32.xlu1 %v3589_v60, %s4090_s28 }
 0x212   :  { %3600 = vtanh.f32 %v330_v63 }
 0x213   :  { %v397_v9 = vpop.permute.xlu0 %396 }
 0x214   :  { %v3591_v29 = vpop.eup %3590  ;;  %v419_v34 = vmul.f32 %v4271_v14, %v397_v9 }
 0x215   :  { %v3593_v62 = vpop.eup %3592  ;;  %361 = vrot.lane.b32.xlu0 %v3591_v29, %s4090_s28 }
 0x216   :  { %359 = vrot.lane.b32.xlu1 %v3593_v62, %s4090_s28  ;;  %v3595_v37 = vpop.eup %3594 }
 0x217   :  { %v399_v4 = vpop.permute.xlu0 %398 }
 0x218   :  { %v3597_v2 = vpop.eup %3596  ;;  %v420_v36 = vmul.f32 %v4274_v15, %v399_v4  ;;  %v345_v15 = vsub.f32 1.0, %v4290_v31 }
 0x219   :  { %408 = vrot.lane.b32.xlu0 %v393_v33, %s4089_s2  ;;  %v3599_v41 = vpop.eup %3598 }
 0x21a   :  { %363 = vrot.lane.b32.xlu1 %v3595_v37, %s4090_s28 }
 0x21b   :  { %v401_v7 = vpop.permute.xlu0 %400 }
 0x21c   :  { %v3601_v3 = vpop.eup %3600  ;;  %v421_v49 = vmul.f32 %v4278_v20, %v401_v7 }
 0x21e   :  { %365 = vrot.lane.b32.xlu1 %v3597_v2, %s4090_s28 }
 0x21f   :  { %v403_v47 = vpop.permute.xlu0 %402 }
 0x220   :  { %v422_v51 = vmul.f32 %v4282_v22, %v403_v47 }
 0x222   :  { %367 = vrot.lane.b32.xlu1 %v3599_v41, %s4090_s28 }
 0x223   :  { %v405_v13 = vpop.permute.xlu0 %404 }
 0x224   :  { %v423_v53 = vmul.f32 %v4286_v30, %v405_v13 }
 0x226   :  { %369 = vrot.lane.b32.xlu1 %v3601_v3, %s4090_s28 }
 0x227   :  { %v407_v17 = vpop.permute.xlu0 %406 }
 0x228   :  { %v424_v58 = vmul.f32 %v4290_v31, %v407_v17 }
 0x27f   :  { %v356_v11 = vpop.permute.xlu1 %355 }
 0x280   :  { %v379_v14 = vmul.f32 %v356_v11, %v339_v40 }
 0x282   :  { %v4356_v22 = vadd.f32 %v418_v52, %v379_v14  ;;  %v4410_v14 = vld [vmem:[#allocation4 + $0x21] sm:$0x1]  ;;  %v4413_v52 = vld [vmem:[#allocation4 + $0x29] sm:$0x1] }
 0x283   :  { %v358_v16 = vpop.permute.xlu1 %357 }
 0x284   :  { %v380_v25 = vmul.f32 %v358_v16, %v340_v19 }
 0x286   :  { %v4339_v42 = vadd.f32 %v419_v34, %v380_v25  ;;  %v4401_v34 = vld [vmem:[#allocation4 + $0x11] sm:$0x1] }
 0x287   :  { %v362_v27 = vpop.permute.xlu0 %361 }
 0x288   :  { %v360_v18 = vpop.permute.xlu1 %359  ;;  %5709 = vst [vmem:[#allocation18_spill] sm:$0xff] %v4339_v42  ;;  %v382_v43 = vmul.f32 %v362_v27, %v342_v35  ;;  %v482_v54 = vrot.slane %v4339_v42, 7 }
 0x289   :  { %v381_v28 = vmul.f32 %v360_v18, %v341_v24 }
 0x28a   :  { %v4350_v55 = vadd.f32 %v421_v49, %v382_v43  ;;  %v484_v30 = vsel %vm483_vm2, %v482_v54, %v4356_v22 }
 0x28b   :  { %v4342_v45 = vadd.f32 %v420_v36, %v381_v28  ;;  %v409_v21 = vpop.permute.xlu0 %408  ;;  %v4399_v28 = vld [vmem:[#allocation4 + $0x1] sm:$0x1] }
 0x28c   :  { %v364_v32 = vpop.permute.xlu1 %363  ;;  %5710 = vst [vmem:[#allocation19_spill] sm:$0xff] %v4350_v55  ;;  %v488_v23 = vrot.slane %v4350_v55, 5  ;;  %v425_v62 = vmul.f32 %v4296_v38, %v409_v21 }
 0x28d   :  { %v383_v46 = vmul.f32 %v364_v32, %v343_v39  ;;  %v485_v56 = vrot.slane %v4342_v45, 6  ;;  %v4404_v39 = vld [vmem:[#allocation4 + $0x9] sm:$0x1] }
 0x28f   :  { %v4353_v57 = vadd.f32 %v422_v51, %v383_v46  ;;  %v487_v29 = vsel %vm486_vm3, %v485_v56, %v484_v30  ;;  %v4419_v30 = vld [vmem:[#allocation4 + $0x39] sm:$0x1] }
 0x290   :  { %v366_v48 = vpop.permute.xlu1 %365  ;;  %v490_v41 = vsel %vm489_vm4, %v488_v23, %v487_v29 }
 0x291   :  { %v384_v50 = vmul.f32 %v366_v48, %v344_v44  ;;  %v491_v61 = vrot.slane %v4353_v57, 4  ;;  %v4407_v44 = vld [vmem:[#allocation4 + $0x19] sm:$0x1] }
 0x293   :  { %v4358_v59 = vadd.f32 %v423_v53, %v384_v50  ;;  %v493_v3 = vsel %vm492_vm5, %v491_v61, %v490_v41 }
 0x294   :  { %v368_v20 = vpop.permute.xlu1 %367 }
 0x295   :  { %5711 = vst [vmem:[#allocation20_spill] sm:$0xff] %v4358_v59  ;;  %v385_v6 = vmul.f32 %v368_v20, %v345_v15  ;;  %v494_v33 = vrot.slane %v4358_v59, 3  ;;  %v4416_v20 = vld [vmem:[#allocation4 + $0x31] sm:$0x1] }
 0x297   :  { %v4363_v60 = vadd.f32 %v424_v58, %v385_v6  ;;  %v496_v9 = vsel %vm495_vm6, %v494_v33, %v493_v3 }
 0x298   :  { %v370_v31 = vpop.permute.xlu1 %369 }
 0x299   :  { %v386_v63 = vmul.f32 %v370_v31, %v346_v26  ;;  %v497_v37 = vrot.slane %v4363_v60, 2 }
 0x29b   :  { %v4371_v2 = vadd.f32 %v425_v62, %v386_v63  ;;  %v499_v38 = vsel %vm498_vm7, %v497_v37, %v496_v9 }
 0x29d   :  { %5712 = vst [vmem:[#allocation21_spill] sm:$0xff] %v4371_v2  ;;  %v500_v4 = vrot.slane %v4371_v2, 1 }
 0x29f   :  { %v502_v7 = vsel %vm501_vm8, %v500_v4, %v499_v38 }
 0x2a0   :  { %503 = vrot.lane.b32.xlu1 %v502_v7, %s4090_s28 }
 0x312   :  { %v4380_v10 = vpop.permute.xlu1 %503 }
 0x313   :  { %3404 = vmatmul.mubr.msk.f32.vlgmr.msra.gmra.mrb[0].mxu1 %vm76_vm0, %v4380_v10 }
 0x314   :  { %3503 = vmatpush3.bf16.msra.mxu1 %v4207_v5  ;;  %3425 = vmatprep.mubr.msk.f32.mxu1 %vm4086_vm1, %v5679_v1 }
 0x315   :  { %3504 = vmatprep.subr.bf16.mxu1 %v5677_v0 }
 0x318   :  { %3506 = vmatpush3.bf16.msra.mxu1 %v4214_v8 }
 0x319   :  { %3513 = vmatprep.subr.bf16.mxu1 %v5677_v0 }
 0x3e6   :  { %v583_v47 = vpop.f32.mrb[0].mxu1 }
 0x3e7   :  { %v3405_v11 = vpop.f32.mrb[1].mxu1  ;;  %v659_v13 = vadd.f32 %v583_v47, %v4233_v12  ;;  %v589_v32 = vrot.slane %v583_v47, 2  ;;  %v588_v35 = vrot.slane %v583_v47, 1  ;;  %v603_v36 = vadd.f32 %v583_v47, %v4399_v28 }
 0x3e8   :  { %v590_v40 = vrot.slane %v583_v47, 3  ;;  %v591_v46 = vrot.slane %v583_v47, 4  ;;  %v592_v50 = vrot.slane %v583_v47, 5  ;;  %v593_v53 = vrot.slane %v583_v47, 6 }
 0x3e9   :  { %668 = vrot.lane.b32.xlu0 %v659_v13, %s4088_s27  ;;  %v662_v16 = vrot.slane %v659_v13, 2  ;;  %v661_v17 = vrot.slane %v659_v13, 1  ;;  %v663_v18 = vrot.slane %v659_v13, 3  ;;  %v664_v19 = vrot.slane %v659_v13, 4 }
 0x3ea   :  { %v665_v24 = vrot.slane %v659_v13, 5  ;;  %v666_v25 = vrot.slane %v659_v13, 6  ;;  %v667_v27 = vrot.slane %v659_v13, 7  ;;  %v605_v43 = vadd.f32 %v589_v32, %v4401_v34 }
 0x3eb   :  { %672 = vrot.lane.b32.xlu1 %v662_v16, %s4088_s27  ;;  %v604_v48 = vadd.f32 %v588_v35, %v4404_v39  ;;  %v3274_v49 = vmul.f32 -1.442695, %v603_v36  ;;  %v606_v51 = vadd.f32 %v590_v40, %v4407_v44  ;;  %v607_v54 = vadd.f32 %v591_v46, %v4410_v14 }
 0x3ec   :  { %v3276_v15 = vmul.f32 -1.442695, %v605_v43  ;;  %v594_v58 = vrot.slane %v583_v47, 7  ;;  %v608_v6 = vadd.f32 %v592_v50, %v4413_v52  ;;  %v609_v23 = vadd.f32 %v593_v53, %v4416_v20 }
 0x3ed   :  { %670 = vrot.lane.b32.xlu0 %v661_v17, %s4088_s27  ;;  %3602 = vpow2.f32 %v3274_v49  ;;  %v3275_v56 = vmul.f32 -1.442695, %v604_v48  ;;  %v3277_v21 = vmul.f32 -1.442695, %v606_v51  ;;  %v3278_v26 = vmul.f32 -1.442695, %v607_v54 }
 0x3ee   :  { %3604 = vpow2.f32 %v3276_v15  ;;  %v610_v29 = vadd.f32 %v594_v58, %v4419_v30  ;;  %v3279_v61 = vmul.f32 -1.442695, %v608_v6  ;;  %v3280_v31 = vmul.f32 -1.442695, %v609_v23 }
 0x3ef   :  { %674 = vrot.lane.b32.xlu1 %v663_v18, %s4088_s27  ;;  %3606 = vpow2.f32 %v3275_v56 }
 0x3f0   :  { %3608 = vpow2.f32 %v3277_v21  ;;  %v3281_v33 = vmul.f32 -1.442695, %v610_v29 }
 0x3f1   :  { %676 = vrot.lane.b32.xlu0 %v664_v19, %s4088_s27  ;;  %3610 = vpow2.f32 %v3278_v26 }
 0x3f2   :  { %3612 = vpow2.f32 %v3279_v61 }
 0x3f3   :  { %678 = vrot.lane.b32.xlu1 %v665_v24, %s4088_s27  ;;  %3614 = vpow2.f32 %v3280_v31 }
 0x3f4   :  { %3616 = vpow2.f32 %v3281_v33 }
 0x3f5   :  { %680 = vrot.lane.b32.xlu0 %v666_v25, %s4088_s27 }
 0x3f7   :  { %682 = vrot.lane.b32.xlu1 %v667_v27, %s4088_s27  ;;  %v3603_v62 = vpop.eup %3602 }
 0x3f8   :  { %v3605_v63 = vpop.eup %3604  ;;  %v635_v37 = vadd.f32 1.0, %v3603_v62 }
 0x3f9   :  { %v3607_v41 = vpop.eup %3606  ;;  %v637_v3 = vadd.f32 1.0, %v3605_v63 }
 0x3fa   :  { %v3609_v9 = vpop.eup %3608  ;;  %3618 = vrcp.f32 %v635_v37  ;;  %v636_v4 = vadd.f32 1.0, %v3607_v41 }
 0x3fb   :  { %v3611_v38 = vpop.eup %3610  ;;  %3620 = vrcp.f32 %v637_v3  ;;  %v638_v7 = vadd.f32 1.0, %v3609_v9 }
 0x3fc   :  { %v3613_v47 = vpop.eup %3612  ;;  %3622 = vrcp.f32 %v636_v4  ;;  %v639_v11 = vadd.f32 1.0, %v3611_v38 }
 0x3fd   :  { %v3615_v13 = vpop.eup %3614  ;;  %3624 = vrcp.f32 %v638_v7  ;;  %v640_v16 = vadd.f32 1.0, %v3613_v47 }
 0x3fe   :  { %v3617_v17 = vpop.eup %3616  ;;  %3626 = vrcp.f32 %v639_v11  ;;  %v641_v18 = vadd.f32 1.0, %v3615_v13 }
 0x3ff   :  { %3628 = vrcp.f32 %v640_v16  ;;  %v642_v25 = vadd.f32 1.0, %v3617_v17 }
 0x400   :  { %3630 = vrcp.f32 %v641_v18 }
 0x401   :  { %3632 = vrcp.f32 %v642_v25 }
 0x404   :  { %v4423_v19 = vpop.eup %3618 }
 0x405   :  { %v4426_v32 = vpop.eup %3620 }
 0x406   :  { %v4430_v40 = vpop.eup %3622 }
 0x407   :  { %v4434_v48 = vpop.eup %3624 }
 0x408   :  { %v4438_v51 = vpop.eup %3626 }
 0x409   :  { %v4442_v54 = vpop.eup %3628 }
 0x40a   :  { %v4446_v6 = vpop.eup %3630 }
 0x40b   :  { %v4450_v26 = vpop.eup %3632 }
 0x45b   :  { %v669_v24 = vpop.permute.xlu0 %668 }
 0x45c   :  { %v692_v27 = vmul.f32 %v4423_v19, %v669_v24  ;;  %v750_v24 = vsub.f32 1.0, %v4426_v32 }
 0x45d   :  { %v673_v35 = vpop.permute.xlu1 %672 }
 0x45e   :  { %v694_v36 = vmul.f32 %v4426_v32, %v673_v35  ;;  %708 = vrot.lane.b32.xlu0 %v692_v27, %s4088_s27  ;;  %v748_v27 = vsub.f32 1.0, %v4423_v19 }
 0x45f   :  { %v671_v43 = vpop.permute.xlu0 %670 }
 0x460   :  { %v693_v46 = vmul.f32 %v4430_v40, %v671_v43  ;;  %712 = vrot.lane.b32.xlu1 %v694_v36, %s4088_s27  ;;  %v749_v36 = vsub.f32 1.0, %v4430_v40  ;;  %v798_v43 = vmul.f32 %v4426_v32, %v4342_v45 }
 0x461   :  { %v675_v49 = vpop.permute.xlu1 %674 }
 0x462   :  { %v695_v50 = vmul.f32 %v4434_v48, %v675_v49  ;;  %710 = vrot.lane.b32.xlu0 %v693_v46, %s4088_s27 }
 0x463   :  { %v677_v15 = vpop.permute.xlu0 %676 }
 0x464   :  { %v696_v53 = vmul.f32 %v4438_v51, %v677_v15  ;;  %714 = vrot.lane.b32.xlu1 %v695_v50, %s4088_s27  ;;  %v797_v50 = vmul.f32 %v4430_v40, %v4339_v42  ;;  %v800_v40 = vmul.f32 %v4438_v51, %v4353_v57 }
 0x465   :  { %v679_v56 = vpop.permute.xlu1 %678 }
 0x466   :  { %v697_v58 = vmul.f32 %v4442_v54, %v679_v56  ;;  %716 = vrot.lane.b32.xlu0 %v696_v53, %s4088_s27  ;;  %v751_v53 = vsub.f32 1.0, %v4434_v48  ;;  %v796_v56 = vmul.f32 %v4423_v19, %v4356_v22 }
 0x467   :  { %v681_v21 = vpop.permute.xlu0 %680 }
 0x468   :  { %v698_v23 = vmul.f32 %v4446_v6, %v681_v21  ;;  %718 = vrot.lane.b32.xlu1 %v697_v58, %s4088_s27 }
 0x469   :  { %v683_v29 = vpop.permute.xlu1 %682 }
 0x46a   :  { %v699_v61 = vmul.f32 %v4450_v26, %v683_v29  ;;  %720 = vrot.lane.b32.xlu0 %v698_v23, %s4088_s27  ;;  %v799_v29 = vmul.f32 %v4434_v48, %v4350_v55  ;;  %v801_v48 = vmul.f32 %v4442_v54, %v4358_v59 }
 0x46c   :  { %722 = vrot.lane.b32.xlu1 %v699_v61, %s4088_s27  ;;  %v752_v61 = vsub.f32 1.0, %v4438_v51 }
 0x4d0   :  { %v709_v31 = vpop.permute.xlu0 %708 }
 0x4d1   :  { %v732_v62 = vadd.f32 %v709_v31, %v4399_v28 }
 0x4d2   :  { %v713_v33 = vpop.permute.xlu1 %712 }
 0x4d3   :  { %3634 = vtanh.f32 %v732_v62  ;;  %v734_v63 = vadd.f32 %v713_v33, %v4401_v34  ;;  %v753_v62 = vsub.f32 1.0, %v4442_v54 }
 0x4d4   :  { %v711_v37 = vpop.permute.xlu0 %710 }
 0x4d5   :  { %3636 = vtanh.f32 %v734_v63  ;;  %v733_v41 = vadd.f32 %v711_v37, %v4404_v39 }
 0x4d6   :  { %v715_v3 = vpop.permute.xlu1 %714 }
 0x4d7   :  { %3638 = vtanh.f32 %v733_v41  ;;  %v735_v9 = vadd.f32 %v715_v3, %v4407_v44 }
 0x4d8   :  { %v717_v4 = vpop.permute.xlu0 %716 }
 0x4d9   :  { %3640 = vtanh.f32 %v735_v9  ;;  %v736_v38 = vadd.f32 %v717_v4, %v4410_v14  ;;  %v754_v9 = vsub.f32 1.0, %v4446_v6 }
 0x4da   :  { %v719_v7 = vpop.permute.xlu1 %718 }
 0x4db   :  { %3642 = vtanh.f32 %v736_v38  ;;  %v737_v28 = vadd.f32 %v719_v7, %v4413_v52 }
 0x4dc   :  { %v721_v47 = vpop.permute.xlu0 %720 }
 0x4dd   :  { %v3635_v11 = vpop.eup %3634  ;;  %3644 = vtanh.f32 %v737_v28  ;;  %v738_v34 = vadd.f32 %v721_v47, %v4416_v20  ;;  %v802_v28 = vmul.f32 %v4446_v6, %v4363_v60 }
 0x4de   :  { %v723_v13 = vpop.permute.xlu1 %722  ;;  %764 = vrot.lane.b32.xlu0 %v3635_v11, %s4090_s28  ;;  %v755_v11 = vsub.f32 1.0, %v4450_v26 }
 0x4df   :  { %v3637_v39 = vpop.eup %3636  ;;  %3646 = vtanh.f32 %v738_v34  ;;  %v739_v44 = vadd.f32 %v723_v13, %v4419_v30 }
 0x4e0   :  { %768 = vrot.lane.b32.xlu1 %v3637_v39, %s4090_s28 }
 0x4e1   :  { %v3639_v16 = vpop.eup %3638  ;;  %3648 = vtanh.f32 %v739_v44 }
 0x4e2   :  { %766 = vrot.lane.b32.xlu0 %v3639_v16, %s4090_s28  ;;  %v803_v16 = vmul.f32 %v4450_v26, %v4371_v2 }
 0x4e3   :  { %v3641_v14 = vpop.eup %3640 }
 0x4e4   :  { %770 = vrot.lane.b32.xlu1 %v3641_v14, %s4090_s28 }
 0x4e5   :  { %v3643_v52 = vpop.eup %3642 }
 0x4e6   :  { %772 = vrot.lane.b32.xlu0 %v3643_v52, %s4090_s28 }
 0x4e7   :  { %v3645_v20 = vpop.eup %3644 }
 0x4e8   :  { %774 = vrot.lane.b32.xlu1 %v3645_v20, %s4090_s28 }
 0x4e9   :  { %v3647_v17 = vpop.eup %3646 }
 0x4ea   :  { %776 = vrot.lane.b32.xlu0 %v3647_v17, %s4090_s28 }
 0x4eb   :  { %v3649_v18 = vpop.eup %3648 }
 0x4ec   :  { %778 = vrot.lane.b32.xlu1 %v3649_v18, %s4090_s28 }
 0x550   :  { %v765_v30 = vpop.permute.xlu0 %764 }
 0x551   :  { %v788_v49 = vmul.f32 %v765_v30, %v748_v27 }
 0x552   :  { %v769_v25 = vpop.permute.xlu1 %768 }
 0x553   :  { %v790_v35 = vmul.f32 %v769_v25, %v750_v24  ;;  %v4491_v33 = vadd.f32 %v796_v56, %v788_v49 }
 0x554   :  { %v767_v46 = vpop.permute.xlu0 %766 }
 0x555   :  { %v789_v15 = vmul.f32 %v767_v46, %v749_v36  ;;  %v4481_v58 = vadd.f32 %v798_v43, %v790_v35 }
 0x556   :  { %v771_v21 = vpop.permute.xlu1 %770 }
 0x557   :  { %v4483_v23 = vadd.f32 %v797_v50, %v789_v15  ;;  %v791_v32 = vmul.f32 %v771_v21, %v751_v53  ;;  %v862_v41 = vrot.slane %v4481_v58, 6 }
 0x558   :  { %v773_v31 = vpop.permute.xlu0 %772 }
 0x559   :  { %5713 = vst [vmem:[#allocation22_spill] sm:$0xff] %v4483_v23  ;;  %v860_v19 = vrot.slane %v4483_v23, 7  ;;  %v4494_v63 = vadd.f32 %v799_v29, %v791_v32  ;;  %v792_v37 = vmul.f32 %v773_v31, %v752_v61  ;;  %v4546_v32 = vld [vmem:[#allocation4 + $0x2] sm:$0x1] }
 0x55a   :  { %v775_v3 = vpop.permute.xlu1 %774 }
 0x55b   :  { %5714 = vst [vmem:[#allocation23_spill] sm:$0xff] %v4494_v63  ;;  %v861_v51 = vsel %vm483_vm2, %v860_v19, %v4491_v33  ;;  %v864_v4 = vrot.slane %v4494_v63, 5  ;;  %v4503_v38 = vadd.f32 %v800_v40, %v792_v37  ;;  %v793_v7 = vmul.f32 %v775_v3, %v753_v62  ;;  %v4548_v40 = vld [vmem:[#allocation4 + $0x12] sm:$0x1]  ;;  %v4551_v19 = vld [vmem:[#allocation4 + $0xa] sm:$0x1] }
 0x55c   :  { %v777_v47 = vpop.permute.xlu0 %776  ;;  %v863_v34 = vsel %vm486_vm3, %v862_v41, %v861_v51 }
 0x55d   :  { %v866_v54 = vrot.slane %v4503_v38, 4  ;;  %v4510_v13 = vadd.f32 %v801_v48, %v793_v7  ;;  %v794_v39 = vmul.f32 %v777_v47, %v754_v9  ;;  %v865_v44 = vsel %vm489_vm4, %v864_v4, %v863_v34  ;;  %v4554_v48 = vld [vmem:[#allocation4 + $0x1a] sm:$0x1]  ;;  %v4557_v4 = vld [vmem:[#allocation4 + $0x22] sm:$0x1] }
 0x55e   :  { %v779_v14 = vpop.permute.xlu1 %778 }
 0x55f   :  { %5715 = vst [vmem:[#allocation24_spill] sm:$0xff] %v4510_v13  ;;  %v868_v52 = vrot.slane %v4510_v13, 3  ;;  %v4516_v20 = vadd.f32 %v802_v28, %v794_v39  ;;  %v795_v6 = vmul.f32 %v779_v14, %v755_v11  ;;  %v867_v17 = vsel %vm492_vm5, %v866_v54, %v865_v44  ;;  %v4560_v11 = vld [vmem:[#allocation4 + $0x2a] sm:$0x1]  ;;  %v4563_v44 = vld [vmem:[#allocation4 + $0x32] sm:$0x1] }
 0x561   :  { %v870_v18 = vrot.slane %v4516_v20, 2  ;;  %v4520_v30 = vadd.f32 %v803_v16, %v795_v6  ;;  %v869_v24 = vsel %vm495_vm6, %v868_v52, %v867_v17  ;;  %v4566_v6 = vld [vmem:[#allocation4 + $0x3a] sm:$0x1] }
 0x563   :  { %5716 = vst [vmem:[#allocation25_spill] sm:$0xff] %v4520_v30  ;;  %v871_v25 = vsel %vm498_vm7, %v870_v18, %v869_v24  ;;  %v872_v27 = vrot.slane %v4520_v30, 1 }
 0x565   :  { %v873_v26 = vsel %vm501_vm8, %v872_v27, %v871_v25 }
 0x566   :  { %874 = vrot.lane.b32.xlu0 %v873_v26, %s4090_s28 }
 0x5d8   :  { %v4527_v35 = vpop.permute.xlu0 %874 }
 0x5d9   :  { %3415 = vmatmul.mubr.msk.f32.vlgmr.msra.gmra.mrb[2].mxu0 %vm76_vm0, %v4527_v35 }
 0x5da   :  { %3509 = vmatpush3.bf16.msra.mxu0 %v4207_v5  ;;  %3436 = vmatprep.mubr.msk.f32.mxu0 %vm4086_vm1, %v5679_v1 }
 0x5db   :  { %3510 = vmatprep.subr.bf16.mxu0 %v5677_v0 }
 0x5de   :  { %3512 = vmatpush3.bf16.msra.mxu0 %v4214_v8 }
 0x5df   :  { %3519 = vmatprep.subr.bf16.mxu0 %v5677_v0 }
 0x6ac   :  { %v954_v36 = vpop.f32.mrb[2].mxu0 }
 0x6ad   :  { %v3416_v43 = vpop.f32.mrb[3].mxu0  ;;  %v1030_v46 = vadd.f32 %v954_v36, %v4233_v12  ;;  %v960_v61 = vrot.slane %v954_v36, 2  ;;  %v959_v31 = vrot.slane %v954_v36, 1  ;;  %v974_v62 = vadd.f32 %v954_v36, %v4546_v32 }
 0x6ae   :  { %v961_v37 = vrot.slane %v954_v36, 3  ;;  %v962_v3 = vrot.slane %v954_v36, 4  ;;  %v963_v7 = vrot.slane %v954_v36, 5  ;;  %v964_v34 = vrot.slane %v954_v36, 6 }
 0x6af   :  { %1039 = vrot.lane.b32.xlu1 %v1030_v46, %s4088_s27  ;;  %v1033_v49 = vrot.slane %v1030_v46, 2  ;;  %v1032_v50 = vrot.slane %v1030_v46, 1  ;;  %v1034_v15 = vrot.slane %v1030_v46, 3  ;;  %v1035_v53 = vrot.slane %v1030_v46, 4 }
 0x6b0   :  { %v1036_v56 = vrot.slane %v1030_v46, 5  ;;  %v1037_v21 = vrot.slane %v1030_v46, 6  ;;  %v1038_v29 = vrot.slane %v1030_v46, 7  ;;  %v976_v41 = vadd.f32 %v960_v61, %v4548_v40 }
 0x6b1   :  { %1043 = vrot.lane.b32.xlu0 %v1033_v49, %s4088_s27  ;;  %v975_v9 = vadd.f32 %v959_v31, %v4551_v19  ;;  %v3283_v51 = vmul.f32 -1.442695, %v974_v62  ;;  %v977_v28 = vadd.f32 %v961_v37, %v4554_v48  ;;  %v978_v54 = vadd.f32 %v962_v3, %v4557_v4 }
 0x6b2   :  { %v3285_v47 = vmul.f32 -1.442695, %v976_v41  ;;  %v965_v16 = vrot.slane %v954_v36, 7  ;;  %v979_v14 = vadd.f32 %v963_v7, %v4560_v11  ;;  %v980_v17 = vadd.f32 %v964_v34, %v4563_v44 }
 0x6b3   :  { %1041 = vrot.lane.b32.xlu1 %v1032_v50, %s4088_s27  ;;  %3650 = vpow2.f32 %v3283_v51  ;;  %v3284_v39 = vmul.f32 -1.442695, %v975_v9  ;;  %v3286_v52 = vmul.f32 -1.442695, %v977_v28  ;;  %v3287_v18 = vmul.f32 -1.442695, %v978_v54 }
 0x6b4   :  { %3652 = vpow2.f32 %v3285_v47  ;;  %v981_v24 = vadd.f32 %v965_v16, %v4566_v6  ;;  %v3288_v25 = vmul.f32 -1.442695, %v979_v14  ;;  %v3289_v27 = vmul.f32 -1.442695, %v980_v17 }
 0x6b5   :  { %1045 = vrot.lane.b32.xlu0 %v1034_v15, %s4088_s27  ;;  %3654 = vpow2.f32 %v3284_v39 }
 0x6b6   :  { %3656 = vpow2.f32 %v3286_v52  ;;  %v3290_v43 = vmul.f32 -1.442695, %v981_v24 }
 0x6b7   :  { %1047 = vrot.lane.b32.xlu1 %v1035_v53, %s4088_s27  ;;  %3658 = vpow2.f32 %v3287_v18 }
 0x6b8   :  { %3660 = vpow2.f32 %v3288_v25 }
 0x6b9   :  { %1049 = vrot.lane.b32.xlu0 %v1036_v56, %s4088_s27  ;;  %3662 = vpow2.f32 %v3289_v27 }
 0x6ba   :  { %3664 = vpow2.f32 %v3290_v43 }
 0x6bb   :  { %1051 = vrot.lane.b32.xlu1 %v1037_v21, %s4088_s27 }
 0x6bd   :  { %1053 = vrot.lane.b32.xlu0 %v1038_v29, %s4088_s27  ;;  %v3651_v26 = vpop.eup %3650 }
 0x6be   :  { %v3653_v36 = vpop.eup %3652  ;;  %v1006_v46 = vadd.f32 1.0, %v3651_v26 }
 0x6bf   :  { %v3655_v49 = vpop.eup %3654  ;;  %v1008_v50 = vadd.f32 1.0, %v3653_v36 }
 0x6c0   :  { %v3657_v15 = vpop.eup %3656  ;;  %3666 = vrcp.f32 %v1006_v46  ;;  %v1007_v53 = vadd.f32 1.0, %v3655_v49 }
 0x6c1   :  { %v3659_v56 = vpop.eup %3658  ;;  %3668 = vrcp.f32 %v1008_v50  ;;  %v1009_v21 = vadd.f32 1.0, %v3657_v15 }
 0x6c2   :  { %v3661_v29 = vpop.eup %3660  ;;  %3670 = vrcp.f32 %v1007_v53  ;;  %v1010_v61 = vadd.f32 1.0, %v3659_v56 }
 0x6c3   :  { %v3663_v31 = vpop.eup %3662  ;;  %3672 = vrcp.f32 %v1009_v21  ;;  %v1011_v62 = vadd.f32 1.0, %v3661_v29 }
 0x6c4   :  { %v3665_v37 = vpop.eup %3664  ;;  %3674 = vrcp.f32 %v1010_v61  ;;  %v1012_v41 = vadd.f32 1.0, %v3663_v31 }
 0x6c5   :  { %3676 = vrcp.f32 %v1011_v62  ;;  %v1013_v51 = vadd.f32 1.0, %v3665_v37 }
 0x6c6   :  { %3678 = vrcp.f32 %v1012_v41 }
 0x6c7   :  { %3680 = vrcp.f32 %v1013_v51 }
 0x6ca   :  { %v4570_v3 = vpop.eup %3666 }
 0x6cb   :  { %v4573_v28 = vpop.eup %3668 }
 0x6cc   :  { %v4577_v54 = vpop.eup %3670 }
 0x6cd   :  { %v4581_v14 = vpop.eup %3672 }
 0x6ce   :  { %v4585_v18 = vpop.eup %3674 }
 0x6cf   :  { %v4589_v27 = vpop.eup %3676 }
 0x6d0   :  { %v4593_v36 = vpop.eup %3678 }
 0x6d1   :  { %v4597_v50 = vpop.eup %3680 }
 0x721   :  { %v1040_v9 = vpop.permute.xlu1 %1039 }
 0x722   :  { %v1063_v7 = vmul.f32 %v4570_v3, %v1040_v9 }
 0x723   :  { %v1044_v47 = vpop.permute.xlu0 %1043 }
 0x724   :  { %v1065_v34 = vmul.f32 %v4573_v28, %v1044_v47  ;;  %1079 = vrot.lane.b32.xlu1 %v1063_v7, %s4088_s27 }
 0x725   :  { %v1042_v39 = vpop.permute.xlu1 %1041 }
 0x726   :  { %v1064_v16 = vmul.f32 %v4577_v54, %v1042_v39  ;;  %1083 = vrot.lane.b32.xlu0 %v1065_v34, %s4088_s27 }
 0x727   :  { %v1046_v52 = vpop.permute.xlu0 %1045 }
 0x728   :  { %v1066_v17 = vmul.f32 %v4581_v14, %v1046_v52  ;;  %1081 = vrot.lane.b32.xlu1 %v1064_v16, %s4088_s27 }
 0x729   :  { %v1048_v24 = vpop.permute.xlu1 %1047 }
 0x72a   :  { %v1067_v25 = vmul.f32 %v4585_v18, %v1048_v24  ;;  %1085 = vrot.lane.b32.xlu0 %v1066_v17, %s4088_s27  ;;  %v1121_v24 = vsub.f32 1.0, %v4573_v28 }
 0x72b   :  { %v1050_v26 = vpop.permute.xlu0 %1049 }
 0x72c   :  { %v1068_v43 = vmul.f32 %v4589_v27, %v1050_v26  ;;  %1087 = vrot.lane.b32.xlu1 %v1067_v25, %s4088_s27  ;;  %v1119_v26 = vsub.f32 1.0, %v4570_v3 }
 0x72d   :  { %v1052_v46 = vpop.permute.xlu1 %1051 }
 0x72e   :  { %v1069_v49 = vmul.f32 %v4593_v36, %v1052_v46  ;;  %1089 = vrot.lane.b32.xlu0 %v1068_v43, %s4088_s27  ;;  %v1120_v46 = vsub.f32 1.0, %v4577_v54 }
 0x72f   :  { %v1054_v15 = vpop.permute.xlu0 %1053 }
 0x730   :  { %v1070_v53 = vmul.f32 %v4597_v50, %v1054_v15  ;;  %1091 = vrot.lane.b32.xlu1 %v1069_v49, %s4088_s27  ;;  %v1169_v49 = vmul.f32 %v4573_v28, %v4481_v58 }
 0x732   :  { %1093 = vrot.lane.b32.xlu0 %v1070_v53, %s4088_s27 }
 0x796   :  { %v1080_v56 = vpop.permute.xlu1 %1079 }
 0x797   :  { %v1103_v21 = vadd.f32 %v1080_v56, %v4546_v32  ;;  %v1168_v56 = vmul.f32 %v4577_v54, %v4483_v23  ;;  %v1171_v54 = vmul.f32 %v4585_v18, %v4503_v38 }
 0x798   :  { %v1084_v29 = vpop.permute.xlu0 %1083 }
 0x799   :  { %3682 = vtanh.f32 %v1103_v21  ;;  %v1105_v61 = vadd.f32 %v1084_v29, %v4548_v40  ;;  %v1122_v29 = vsub.f32 1.0, %v4581_v14 }
 0x79a   :  { %v1082_v31 = vpop.permute.xlu1 %1081 }
 0x79b   :  { %3684 = vtanh.f32 %v1105_v61  ;;  %v1104_v62 = vadd.f32 %v1082_v31, %v4551_v19  ;;  %v1167_v61 = vmul.f32 %v4570_v3, %v4491_v33 }
 0x79c   :  { %v1086_v37 = vpop.permute.xlu0 %1085 }
 0x79d   :  { %3686 = vtanh.f32 %v1104_v62  ;;  %v1106_v41 = vadd.f32 %v1086_v37, %v4554_v48 }
 0x79e   :  { %v1088_v9 = vpop.permute.xlu1 %1087 }
 0x79f   :  { %3688 = vtanh.f32 %v1106_v41  ;;  %v1107_v51 = vadd.f32 %v1088_v9, %v4557_v4  ;;  %v1170_v41 = vmul.f32 %v4581_v14, %v4494_v63  ;;  %v1123_v9 = vsub.f32 1.0, %v4585_v18 }
 0x7a0   :  { %v1090_v7 = vpop.permute.xlu0 %1089  ;;  %v1172_v14 = vmul.f32 %v4589_v27, %v4510_v13 }
 0x7a1   :  { %3690 = vtanh.f32 %v1107_v51  ;;  %v1108_v32 = vadd.f32 %v1090_v7, %v4560_v11  ;;  %v1124_v7 = vsub.f32 1.0, %v4589_v27 }
 0x7a2   :  { %v1092_v47 = vpop.permute.xlu1 %1091 }
 0x7a3   :  { %v3683_v34 = vpop.eup %3682  ;;  %3692 = vtanh.f32 %v1108_v32  ;;  %v1109_v40 = vadd.f32 %v1092_v47, %v4563_v44 }
 0x7a4   :  { %v1094_v39 = vpop.permute.xlu0 %1093  ;;  %1135 = vrot.lane.b32.xlu1 %v3683_v34, %s4090_s28 }
 0x7a5   :  { %v3685_v19 = vpop.eup %3684  ;;  %3694 = vtanh.f32 %v1109_v40  ;;  %v1110_v48 = vadd.f32 %v1094_v39, %v4566_v6 }
 0x7a6   :  { %1139 = vrot.lane.b32.xlu0 %v3685_v19, %s4090_s28  ;;  %v1125_v19 = vsub.f32 1.0, %v4593_v36 }
 0x7a7   :  { %v3687_v16 = vpop.eup %3686  ;;  %3696 = vtanh.f32 %v1110_v48 }
 0x7a8   :  { %1137 = vrot.lane.b32.xlu1 %v3687_v16, %s4090_s28 }
 0x7a9   :  { %v3689_v4 = vpop.eup %3688 }
 0x7aa   :  { %1141 = vrot.lane.b32.xlu0 %v3689_v4, %s4090_s28 }
 0x7ab   :  { %v3691_v11 = vpop.eup %3690 }
 0x7ac   :  { %1143 = vrot.lane.b32.xlu1 %v3691_v11, %s4090_s28  ;;  %v1173_v11 = vmul.f32 %v4593_v36, %v4516_v20 }
 0x7ad   :  { %v3693_v44 = vpop.eup %3692 }
 0x7ae   :  { %1145 = vrot.lane.b32.xlu0 %v3693_v44, %s4090_s28 }
 0x7af   :  { %v3695_v52 = vpop.eup %3694 }
 0x7b0   :  { %1147 = vrot.lane.b32.xlu1 %v3695_v52, %s4090_s28  ;;  %v1126_v52 = vsub.f32 1.0, %v4597_v50 }
 0x7b1   :  { %v3697_v17 = vpop.eup %3696 }
 0x7b2   :  { %1149 = vrot.lane.b32.xlu0 %v3697_v17, %s4090_s28 }
 0x816   :  { %v1136_v6 = vpop.permute.xlu1 %1135 }
 0x817   :  { %v1159_v53 = vmul.f32 %v1136_v6, %v1119_v26  ;;  %v1174_v26 = vmul.f32 %v4597_v50, %v4520_v30 }
 0x818   :  { %v1140_v25 = vpop.permute.xlu0 %1139 }
 0x819   :  { %v1161_v43 = vmul.f32 %v1140_v25, %v1121_v24  ;;  %v4638_v32 = vadd.f32 %v1167_v61, %v1159_v53 }
 0x81a   :  { %v1138_v15 = vpop.permute.xlu1 %1137 }
 0x81b   :  { %v1160_v21 = vmul.f32 %v1138_v15, %v1120_v46  ;;  %v4628_v31 = vadd.f32 %v1169_v49, %v1161_v43 }
 0x81c   :  { %v1142_v62 = vpop.permute.xlu0 %1141 }
 0x81d   :  { %v4630_v37 = vadd.f32 %v1168_v56, %v1160_v21  ;;  %v1162_v28 = vmul.f32 %v1142_v62, %v1122_v29  ;;  %v1233_v40 = vrot.slane %v4628_v31, 6 }
 0x81e   :  { %v1144_v51 = vpop.permute.xlu1 %1143 }
 0x81f   :  { %5717 = vst [vmem:[#allocation26_spill] sm:$0xff] %v4630_v37  ;;  %v1231_v3 = vrot.slane %v4630_v37, 7  ;;  %v4641_v47 = vadd.f32 %v1170_v41, %v1162_v28  ;;  %v1163_v34 = vmul.f32 %v1144_v51, %v1123_v9 }
 0x820   :  { %v1146_v39 = vpop.permute.xlu0 %1145 }
 0x821   :  { %5718 = vst [vmem:[#allocation27_spill] sm:$0xff] %v4641_v47  ;;  %v1232_v18 = vsel %vm483_vm2, %v1231_v3, %v4638_v32  ;;  %v1235_v48 = vrot.slane %v4641_v47, 5  ;;  %v4650_v16 = vadd.f32 %v1171_v54, %v1163_v34  ;;  %v1164_v4 = vmul.f32 %v1146_v39, %v1124_v7  ;;  %v4693_v39 = vld [vmem:[#allocation4 + $0x3] sm:$0x1] }
 0x822   :  { %v1148_v44 = vpop.permute.xlu1 %1147  ;;  %v1234_v17 = vsel %vm486_vm3, %v1233_v40, %v1232_v18  ;;  %v4695_v18 = vld [vmem:[#allocation4 + $0x13] sm:$0x1] }
 0x823   :  { %v1237_v27 = vrot.slane %v4650_v16, 4  ;;  %v4657_v6 = vadd.f32 %v1172_v14, %v1164_v4  ;;  %v1165_v24 = vmul.f32 %v1148_v44, %v1125_v19  ;;  %v1236_v25 = vsel %vm489_vm4, %v1235_v48, %v1234_v17  ;;  %v4701_v17 = vld [vmem:[#allocation4 + $0x1b] sm:$0x1] }
 0x824   :  { %v1150_v43 = vpop.permute.xlu0 %1149 }
 0x825   :  { %5719 = vst [vmem:[#allocation28_spill] sm:$0xff] %v4657_v6  ;;  %v1239_v46 = vrot.slane %v4657_v6, 3  ;;  %v4663_v49 = vadd.f32 %v1173_v11, %v1165_v24  ;;  %v1166_v36 = vmul.f32 %v1150_v43, %v1126_v52  ;;  %v1238_v15 = vsel %vm492_vm5, %v1237_v27, %v1236_v25  ;;  %v4698_v11 = vld [vmem:[#allocation4 + $0xb] sm:$0x1] }
 0x827   :  { %v1241_v53 = vrot.slane %v4663_v49, 2  ;;  %v4667_v56 = vadd.f32 %v1174_v26, %v1166_v36  ;;  %v1240_v21 = vsel %vm495_vm6, %v1239_v46, %v1238_v15  ;;  %v4704_v26 = vld [vmem:[#allocation4 + $0x23] sm:$0x1]  ;;  %v4707_v15 = vld [vmem:[#allocation4 + $0x2b] sm:$0x1] }
 0x829   :  { %5720 = vst [vmem:[#allocation29_spill] sm:$0xff] %v4667_v56  ;;  %v1242_v29 = vsel %vm498_vm7, %v1241_v53, %v1240_v21  ;;  %v1243_v61 = vrot.slane %v4667_v56, 1 }
 0x82b   :  { %v1244_v50 = vsel %vm501_vm8, %v1243_v61, %v1242_v29  ;;  %v4710_v61 = vld [vmem:[#allocation4 + $0x33] sm:$0x1] }
 0x82c   :  { %1245 = vrot.lane.b32.xlu1 %v1244_v50, %s4090_s28 }
 0x89e   :  { %v4674_v62 = vpop.permute.xlu1 %1245 }
 0x89f   :  { %3426 = vmatmul.mubr.msk.f32.vlgmr.msra.gmra.mrb[2].mxu1 %vm76_vm0, %v4674_v62 }
 0x8a0   :  { %3515 = vmatpush3.bf16.msra.mxu1 %v4207_v5  ;;  %3447 = vmatprep.mubr.msk.f32.mxu1 %vm4086_vm1, %v5679_v1 }
 0x8a1   :  { %3516 = vmatprep.subr.bf16.mxu1 %v5677_v0 }
 0x8a4   :  { %3518 = vmatpush3.bf16.msra.mxu1 %v4214_v8 }
 0x8a5   :  { %3525 = vmatprep.subr.bf16.mxu1 %v5677_v0 }
 0x972   :  { %v1325_v41 = vpop.f32.mrb[2].mxu1 }
 0x973   :  { %v3427_v28 = vpop.f32.mrb[3].mxu1  ;;  %v1401_v9 = vadd.f32 %v1325_v41, %v4233_v12  ;;  %v1331_v19 = vrot.slane %v1325_v41, 2  ;;  %v1330_v48 = vrot.slane %v1325_v41, 1  ;;  %v1345_v4 = vadd.f32 %v1325_v41, %v4693_v39 }
 0x974   :  { %v1332_v44 = vrot.slane %v1325_v41, 3  ;;  %v1333_v27 = vrot.slane %v1325_v41, 4  ;;  %v1334_v43 = vrot.slane %v1325_v41, 5  ;;  %v1335_v53 = vrot.slane %v1325_v41, 6 }
 0x975   :  { %1410 = vrot.lane.b32.xlu0 %v1401_v9, %s4088_s27  ;;  %v1404_v54 = vrot.slane %v1401_v9, 2  ;;  %v1403_v51 = vrot.slane %v1401_v9, 1  ;;  %v1405_v7 = vrot.slane %v1401_v9, 3  ;;  %v1406_v3 = vrot.slane %v1401_v9, 4 }
 0x976   :  { %v1407_v34 = vrot.slane %v1401_v9, 5  ;;  %v1408_v40 = vrot.slane %v1401_v9, 6  ;;  %v1409_v14 = vrot.slane %v1401_v9, 7  ;;  %v1347_v52 = vadd.f32 %v1331_v19, %v4695_v18 }
 0x977   :  { %1414 = vrot.lane.b32.xlu1 %v1404_v54, %s4088_s27  ;;  %v1346_v24 = vadd.f32 %v1330_v48, %v4698_v11  ;;  %v3292_v25 = vmul.f32 -1.442695, %v1345_v4  ;;  %v1348_v46 = vadd.f32 %v1332_v44, %v4701_v17  ;;  %v1349_v21 = vadd.f32 %v1333_v27, %v4704_v26  ;;  %v4713_v54 = vld [vmem:[#allocation4 + $0x3b] sm:$0x1] }
 0x978   :  { %v3294_v36 = vmul.f32 -1.442695, %v1347_v52  ;;  %v1336_v50 = vrot.slane %v1325_v41, 7  ;;  %v1350_v28 = vadd.f32 %v1334_v43, %v4707_v15 }
 0x979   :  { %1412 = vrot.lane.b32.xlu0 %v1403_v51, %s4088_s27  ;;  %3698 = vpow2.f32 %v3292_v25  ;;  %v3293_v29 = vmul.f32 -1.442695, %v1346_v24  ;;  %v3295_v9 = vmul.f32 -1.442695, %v1348_v46  ;;  %v1351_v51 = vadd.f32 %v1335_v53, %v4710_v61 }
 0x97a   :  { %3700 = vpow2.f32 %v3294_v36 }
 0x97b   :  { %1416 = vrot.lane.b32.xlu1 %v1405_v7, %s4088_s27  ;;  %3702 = vpow2.f32 %v3293_v29  ;;  %v3296_v7 = vmul.f32 -1.442695, %v1349_v21 }
 0x97c   :  { %3704 = vpow2.f32 %v3295_v9 }
 0x97d   :  { %1418 = vrot.lane.b32.xlu0 %v1406_v3, %s4088_s27  ;;  %v1352_v3 = vadd.f32 %v1336_v50, %v4713_v54  ;;  %3706 = vpow2.f32 %v3296_v7 }
 0x97f   :  { %1420 = vrot.lane.b32.xlu1 %v1407_v34, %s4088_s27  ;;  %v3297_v34 = vmul.f32 -1.442695, %v1350_v28  ;;  %v3299_v19 = vmul.f32 -1.442695, %v1352_v3 }
 0x981   :  { %1422 = vrot.lane.b32.xlu0 %v1408_v40, %s4088_s27  ;;  %v3298_v40 = vmul.f32 -1.442695, %v1351_v51  ;;  %3708 = vpow2.f32 %v3297_v34 }
 0x983   :  { %1424 = vrot.lane.b32.xlu1 %v1409_v14, %s4088_s27  ;;  %v3699_v14 = vpop.eup %3698  ;;  %3710 = vpow2.f32 %v3298_v40 }
 0x984   :  { %v3701_v41 = vpop.eup %3700  ;;  %v1377_v48 = vadd.f32 1.0, %v3699_v14  ;;  %3712 = vpow2.f32 %v3299_v19 }
 0x985   :  { %v3703_v4 = vpop.eup %3702  ;;  %v1379_v44 = vadd.f32 1.0, %v3701_v41 }
 0x986   :  { %v3705_v52 = vpop.eup %3704  ;;  %3714 = vrcp.f32 %v1377_v48  ;;  %v1378_v27 = vadd.f32 1.0, %v3703_v4 }
 0x987   :  { %v3707_v24 = vpop.eup %3706  ;;  %3716 = vrcp.f32 %v1379_v44  ;;  %v1380_v25 = vadd.f32 1.0, %v3705_v52 }
 0x988   :  { %3718 = vrcp.f32 %v1378_v27  ;;  %v1381_v46 = vadd.f32 1.0, %v3707_v24 }
 0x989   :  { %3720 = vrcp.f32 %v1380_v25 }
 0x98a   :  { %3722 = vrcp.f32 %v1381_v46 }
 0x98b   :  { %v3709_v43 = vpop.eup %3708 }
 0x98c   :  { %v1382_v53 = vadd.f32 1.0, %v3709_v43 }
 0x98d   :  { %v3711_v36 = vpop.eup %3710 }
 0x98e   :  { %v3713_v21 = vpop.eup %3712  ;;  %v1383_v29 = vadd.f32 1.0, %v3711_v36  ;;  %3724 = vrcp.f32 %v1382_v53 }
 0x98f   :  { %v1384_v9 = vadd.f32 1.0, %v3713_v21 }
 0x990   :  { %v4717_v50 = vpop.eup %3714  ;;  %3726 = vrcp.f32 %v1383_v29 }
 0x991   :  { %v4720_v7 = vpop.eup %3716  ;;  %3728 = vrcp.f32 %v1384_v9 }
 0x992   :  { %v4724_v40 = vpop.eup %3718 }
 0x993   :  { %v4728_v41 = vpop.eup %3720 }
 0x994   :  { %v4732_v44 = vpop.eup %3722 }
 0x998   :  { %v4736_v24 = vpop.eup %3724 }
 0x99a   :  { %v4740_v46 = vpop.eup %3726 }
 0x99b   :  { %v4744_v21 = vpop.eup %3728 }
 0x9e7   :  { %v1411_v28 = vpop.permute.xlu0 %1410 }
 0x9e8   :  { %v1434_v51 = vmul.f32 %v4717_v50, %v1411_v28 }
 0x9e9   :  { %v1415_v3 = vpop.permute.xlu1 %1414 }
 0x9ea   :  { %v1436_v34 = vmul.f32 %v4720_v7, %v1415_v3  ;;  %1450 = vrot.lane.b32.xlu0 %v1434_v51, %s4088_s27 }
 0x9eb   :  { %v1413_v14 = vpop.permute.xlu0 %1412 }
 0x9ec   :  { %v1435_v19 = vmul.f32 %v4724_v40, %v1413_v14  ;;  %1454 = vrot.lane.b32.xlu1 %v1436_v34, %s4088_s27 }
 0x9ed   :  { %v1417_v48 = vpop.permute.xlu1 %1416 }
 0x9ee   :  { %v1437_v4 = vmul.f32 %v4728_v41, %v1417_v48  ;;  %1452 = vrot.lane.b32.xlu0 %v1435_v19, %s4088_s27 }
 0x9ef   :  { %v1419_v52 = vpop.permute.xlu0 %1418 }
 0x9f0   :  { %v1438_v27 = vmul.f32 %v4732_v44, %v1419_v52  ;;  %1456 = vrot.lane.b32.xlu1 %v1437_v4, %s4088_s27 }
 0x9f1   :  { %v1421_v25 = vpop.permute.xlu1 %1420 }
 0x9f2   :  { %v1439_v43 = vmul.f32 %v4736_v24, %v1421_v25  ;;  %1458 = vrot.lane.b32.xlu0 %v1438_v27, %s4088_s27 }
 0x9f3   :  { %v1423_v36 = vpop.permute.xlu0 %1422 }
 0x9f4   :  { %v1440_v53 = vmul.f32 %v4740_v46, %v1423_v36  ;;  %1460 = vrot.lane.b32.xlu1 %v1439_v43, %s4088_s27 }
 0x9f5   :  { %v1425_v29 = vpop.permute.xlu1 %1424 }
 0x9f6   :  { %v1441_v28 = vmul.f32 %v4744_v21, %v1425_v29  ;;  %1462 = vrot.lane.b32.xlu0 %v1440_v53, %s4088_s27 }
 0x9f8   :  { %1464 = vrot.lane.b32.xlu1 %v1441_v28, %s4088_s27 }
 0xa5c   :  { %v1451_v9 = vpop.permute.xlu0 %1450 }
 0xa5d   :  { %v1474_v51 = vadd.f32 %v1451_v9, %v4693_v39 }
 0xa5e   :  { %v1455_v3 = vpop.permute.xlu1 %1454 }
 0xa5f   :  { %3730 = vtanh.f32 %v1474_v51  ;;  %v1476_v34 = vadd.f32 %v1455_v3, %v4695_v18  ;;  %v1492_v51 = vsub.f32 1.0, %v4720_v7 }
 0xa60   :  { %v1453_v14 = vpop.permute.xlu0 %1452 }
 0xa61   :  { %3732 = vtanh.f32 %v1476_v34  ;;  %v1475_v19 = vadd.f32 %v1453_v14, %v4698_v11  ;;  %v1490_v34 = vsub.f32 1.0, %v4717_v50 }
 0xa62   :  { %v1457_v48 = vpop.permute.xlu1 %1456 }
 0xa63   :  { %3734 = vtanh.f32 %v1475_v19  ;;  %v1477_v4 = vadd.f32 %v1457_v48, %v4701_v17  ;;  %v1491_v19 = vsub.f32 1.0, %v4724_v40  ;;  %v1540_v48 = vmul.f32 %v4720_v7, %v4628_v31 }
 0xa64   :  { %v1459_v52 = vpop.permute.xlu0 %1458 }
 0xa65   :  { %3736 = vtanh.f32 %v1477_v4  ;;  %v1478_v27 = vadd.f32 %v1459_v52, %v4704_v26 }
 0xa66   :  { %v1461_v25 = vpop.permute.xlu1 %1460 }
 0xa67   :  { %3738 = vtanh.f32 %v1478_v27  ;;  %v1479_v39 = vadd.f32 %v1461_v25, %v4707_v15  ;;  %v1539_v27 = vmul.f32 %v4724_v40, %v4630_v37  ;;  %v1542_v40 = vmul.f32 %v4732_v44, %v4650_v16 }
 0xa68   :  { %v1463_v43 = vpop.permute.xlu0 %1462 }
 0xa69   :  { %v3731_v36 = vpop.eup %3730  ;;  %3740 = vtanh.f32 %v1479_v39  ;;  %v1480_v18 = vadd.f32 %v1463_v43, %v4710_v61  ;;  %v1493_v39 = vsub.f32 1.0, %v4728_v41  ;;  %v1538_v43 = vmul.f32 %v4717_v50, %v4638_v32 }
 0xa6a   :  { %v1465_v53 = vpop.permute.xlu1 %1464  ;;  %1506 = vrot.lane.b32.xlu0 %v3731_v36, %s4090_s28 }
 0xa6b   :  { %v3733_v11 = vpop.eup %3732  ;;  %3742 = vtanh.f32 %v1480_v18  ;;  %v1481_v17 = vadd.f32 %v1465_v53, %v4713_v54 }
 0xa6c   :  { %1510 = vrot.lane.b32.xlu1 %v3733_v11, %s4090_s28  ;;  %v1541_v11 = vmul.f32 %v4728_v41, %v4641_v47  ;;  %v1543_v41 = vmul.f32 %v4736_v24, %v4657_v6 }
 0xa6d   :  { %v3735_v29 = vpop.eup %3734  ;;  %3744 = vtanh.f32 %v1481_v17  ;;  %v1494_v17 = vsub.f32 1.0, %v4732_v44 }
 0xa6e   :  { %1508 = vrot.lane.b32.xlu0 %v3735_v29, %s4090_s28 }
 0xa6f   :  { %v3737_v26 = vpop.eup %3736 }
 0xa70   :  { %1512 = vrot.lane.b32.xlu1 %v3737_v26, %s4090_s28  ;;  %v1495_v26 = vsub.f32 1.0, %v4736_v24 }
 0xa71   :  { %v3739_v15 = vpop.eup %3738 }
 0xa72   :  { %1514 = vrot.lane.b32.xlu0 %v3739_v15, %s4090_s28 }
 0xa73   :  { %v3741_v61 = vpop.eup %3740 }
 0xa74   :  { %1516 = vrot.lane.b32.xlu1 %v3741_v61, %s4090_s28 }
 0xa75   :  { %v3743_v28 = vpop.eup %3742 }
 0xa76   :  { %1518 = vrot.lane.b32.xlu0 %v3743_v28, %s4090_s28 }
 0xa77   :  { %v3745_v9 = vpop.eup %3744 }
 0xa78   :  { %1520 = vrot.lane.b32.xlu1 %v3745_v9, %s4090_s28 }
 0xadc   :  { %v1507_v54 = vpop.permute.xlu0 %1506 }
 0xadd   :  { %v1530_v52 = vmul.f32 %v1507_v54, %v1490_v34 }
 0xade   :  { %v1511_v3 = vpop.permute.xlu1 %1510 }
 0xadf   :  { %v1532_v14 = vmul.f32 %v1511_v3, %v1492_v51  ;;  %v4785_v15 = vadd.f32 %v1538_v43, %v1530_v52  ;;  %v1496_v51 = vsub.f32 1.0, %v4740_v46  ;;  %v1545_v43 = vmul.f32 %v4744_v21, %v4667_v56 }
 0xae0   :  { %v1509_v4 = vpop.permute.xlu0 %1508 }
 0xae1   :  { %v1531_v25 = vmul.f32 %v1509_v4, %v1491_v19  ;;  %v4775_v36 = vadd.f32 %v1540_v48, %v1532_v14  ;;  %v1544_v19 = vmul.f32 %v4740_v46, %v4663_v49  ;;  %v1497_v4 = vsub.f32 1.0, %v4744_v21 }
 0xae2   :  { %v1513_v18 = vpop.permute.xlu1 %1512 }
 0xae3   :  { %v4777_v53 = vadd.f32 %v1539_v27, %v1531_v25  ;;  %v1533_v7 = vmul.f32 %v1513_v18, %v1493_v39  ;;  %v1604_v9 = vrot.slane %v4775_v36, 6 }
 0xae4   :  { %v1515_v29 = vpop.permute.xlu0 %1514 }
 0xae5   :  { %5721 = vst [vmem:[#allocation30_spill] sm:$0xff] %v4777_v53  ;;  %v1602_v50 = vrot.slane %v4777_v53, 7  ;;  %v4788_v61 = vadd.f32 %v1541_v11, %v1533_v7  ;;  %v1534_v28 = vmul.f32 %v1515_v29, %v1494_v17 }
 0xae6   :  { %v1517_v54 = vpop.permute.xlu1 %1516 }
 0xae7   :  { %5722 = vst [vmem:[#allocation31_spill] sm:$0xff] %v4788_v61  ;;  %v1603_v44 = vsel %vm483_vm2, %v1602_v50, %v4785_v15  ;;  %v1606_v3 = vrot.slane %v4788_v61, 5  ;;  %v4797_v34 = vadd.f32 %v1542_v40, %v1534_v28  ;;  %v1535_v14 = vmul.f32 %v1517_v54, %v1495_v26 }
 0xae8   :  { %v1519_v48 = vpop.permute.xlu0 %1518  ;;  %v1605_v52 = vsel %vm486_vm3, %v1604_v9, %v1603_v44 }
 0xae9   :  { %v1608_v24 = vrot.slane %v4797_v34, 4  ;;  %v4804_v27 = vadd.f32 %v1543_v41, %v1535_v14  ;;  %v1536_v25 = vmul.f32 %v1519_v48, %v1496_v51  ;;  %v1607_v39 = vsel %vm489_vm4, %v1606_v3, %v1605_v52 }
 0xaea   :  { %v1521_v18 = vpop.permute.xlu1 %1520 }
 0xaeb   :  { %5723 = vst [vmem:[#allocation32_spill] sm:$0xff] %v4804_v27  ;;  %v1610_v11 = vrot.slane %v4804_v27, 3  ;;  %v4810_v7 = vadd.f32 %v1544_v19, %v1536_v25  ;;  %v1537_v46 = vmul.f32 %v1521_v18, %v1497_v4  ;;  %v1609_v17 = vsel %vm492_vm5, %v1608_v24, %v1607_v39  ;;  %v4840_v24 = vld [vmem:[#allocation4 + $0x4] sm:$0x1]  ;;  %v4842_v39 = vld [vmem:[#allocation4 + $0x14] sm:$0x1] }
 0xaed   :  { %v1612_v40 = vrot.slane %v4810_v7, 2  ;;  %v4814_v29 = vadd.f32 %v1545_v43, %v1537_v46  ;;  %v1611_v26 = vsel %vm495_vm6, %v1610_v11, %v1609_v17  ;;  %v4845_v11 = vld [vmem:[#allocation4 + $0xc] sm:$0x1] }
 0xaef   :  { %5724 = vst [vmem:[#allocation33_spill] sm:$0xff] %v4814_v29  ;;  %v1613_v50 = vsel %vm498_vm7, %v1612_v40, %v1611_v26  ;;  %v1614_v28 = vrot.slane %v4814_v29, 1  ;;  %v4848_v40 = vld [vmem:[#allocation4 + $0x1c] sm:$0x1] }
 0xaf1   :  { %v1615_v21 = vsel %vm501_vm8, %v1614_v28, %v1613_v50 }
 0xaf2   :  { %1616 = vrot.lane.b32.xlu0 %v1615_v21, %s4090_s28  ;;  %v4851_v21 = vld [vmem:[#allocation4 + $0x24] sm:$0x1] }
 0xb64   :  { %v4821_v9 = vpop.permute.xlu0 %1616 }
 0xb65   :  { %3437 = vmatmul.mubr.msk.f32.vlgmr.msra.gmra.mrb[4].mxu0 %vm76_vm0, %v4821_v9 }
 0xb66   :  { %3521 = vmatpush3.bf16.msra.mxu0 %v4207_v5  ;;  %3458 = vmatprep.mubr.msk.f32.mxu0 %vm4086_vm1, %v5679_v1 }
 0xb67   :  { %3522 = vmatprep.subr.bf16.mxu0 %v5677_v0 }
 0xb6a   :  { %3524 = vmatpush3.bf16.msra.mxu0 %v4214_v8 }
 0xb6b   :  { %3531 = vmatprep.subr.bf16.mxu0 %v5677_v0 }
 0xc38   :  { %v1696_v41 = vpop.f32.mrb[4].mxu0 }
 0xc39   :  { %v3438_v54 = vpop.f32.mrb[5].mxu0  ;;  %v1772_v51 = vadd.f32 %v1696_v41, %v4233_v12  ;;  %v1702_v25 = vrot.slane %v1696_v41, 2  ;;  %v1701_v43 = vrot.slane %v1696_v41, 1  ;;  %v1716_v18 = vadd.f32 %v1696_v41, %v4840_v24 }
 0xc3a   :  { %v1703_v46 = vrot.slane %v1696_v41, 3  ;;  %v1704_v26 = vrot.slane %v1696_v41, 4  ;;  %v1705_v54 = vrot.slane %v1696_v41, 5 }
 0xc3b   :  { %1781 = vrot.lane.b32.xlu1 %v1772_v51, %s4088_s27  ;;  %v1775_v44 = vrot.slane %v1772_v51, 2  ;;  %v1774_v3 = vrot.slane %v1772_v51, 1  ;;  %v1776_v14 = vrot.slane %v1772_v51, 3  ;;  %v1777_v19 = vrot.slane %v1772_v51, 4 }
 0xc3c   :  { %v1778_v48 = vrot.slane %v1772_v51, 5  ;;  %v1779_v4 = vrot.slane %v1772_v51, 6  ;;  %v1780_v52 = vrot.slane %v1772_v51, 7  ;;  %v1718_v17 = vadd.f32 %v1702_v25, %v4842_v39 }
 0xc3d   :  { %1785 = vrot.lane.b32.xlu0 %v1775_v44, %s4088_s27  ;;  %v1717_v50 = vadd.f32 %v1701_v43, %v4845_v11  ;;  %v3301_v28 = vmul.f32 -1.442695, %v1716_v18  ;;  %v1719_v51 = vadd.f32 %v1703_v46, %v4848_v40  ;;  %v4860_v18 = vld [vmem:[#allocation4 + $0x3c] sm:$0x1] }
 0xc3e   :  { %v3303_v44 = vmul.f32 -1.442695, %v1718_v17 }
 0xc3f   :  { %1783 = vrot.lane.b32.xlu1 %v1774_v3, %s4088_s27  ;;  %v4854_v3 = vld [vmem:[#allocation4 + $0x2c] sm:$0x1]  ;;  %3746 = vpow2.f32 %v3301_v28  ;;  %v3304_v43 = vmul.f32 -1.442695, %v1719_v51 }
 0xc40   :  { %v1721_v25 = vadd.f32 %v1705_v54, %v4854_v3  ;;  %3748 = vpow2.f32 %v3303_v44 }
 0xc41   :  { %1787 = vrot.lane.b32.xlu0 %v1776_v14, %s4088_s27  ;;  %v1706_v14 = vrot.slane %v1696_v41, 6 }
 0xc42   :  { %v3306_v1 = vmul.f32 -1.442695, %v1721_v25 }
 0xc43   :  { %1789 = vrot.lane.b32.xlu1 %v1777_v19, %s4088_s27  ;;  %v1720_v19 = vadd.f32 %v1704_v26, %v4851_v21 }
 0xc45   :  { %1791 = vrot.lane.b32.xlu0 %v1778_v48, %s4088_s27  ;;  %v3302_v48 = vmul.f32 -1.442695, %v1717_v50  ;;  %v3305_v46 = vmul.f32 -1.442695, %v1720_v19 }
 0xc47   :  { %1793 = vrot.lane.b32.xlu1 %v1779_v4, %s4088_s27  ;;  %v4857_v4 = vld [vmem:[#allocation4 + $0x34] sm:$0x1]  ;;  %3750 = vpow2.f32 %v3302_v48 }
 0xc48   :  { %v1722_v0 = vadd.f32 %v1706_v14, %v4857_v4  ;;  %3752 = vpow2.f32 %v3304_v43 }
 0xc49   :  { %1795 = vrot.lane.b32.xlu0 %v1780_v52, %s4088_s27  ;;  %v1707_v52 = vrot.slane %v1696_v41, 7  ;;  %3754 = vpow2.f32 %v3305_v46  ;;  %v3747_v50 = vpop.eup %3746 }
 0xc4a   :  { %v3307_v26 = vmul.f32 -1.442695, %v1722_v0  ;;  %3756 = vpow2.f32 %v3306_v1  ;;  %v3749_v41 = vpop.eup %3748  ;;  %v1748_v54 = vadd.f32 1.0, %v3747_v50 }
 0xc4b   :  { %v1723_v17 = vadd.f32 %v1707_v52, %v4860_v18  ;;  %v1750_v51 = vadd.f32 1.0, %v3749_v41 }
 0xc4c   :  { %3758 = vpow2.f32 %v3307_v26 }
 0xc4d   :  { %v3308_v28 = vmul.f32 -1.442695, %v1723_v17 }
 0xc4f   :  { %3760 = vpow2.f32 %v3308_v28 }
 0xc50   :  { %3762 = vrcp.f32 %v1748_v54 }
 0xc51   :  { %v3751_v44 = vpop.eup %3750  ;;  %3764 = vrcp.f32 %v1750_v51 }
 0xc52   :  { %v3753_v56 = vpop.eup %3752  ;;  %v1749_v14 = vadd.f32 1.0, %v3751_v44 }
 0xc53   :  { %v3755_v48 = vpop.eup %3754  ;;  %v1751_v19 = vadd.f32 1.0, %v3753_v56 }
 0xc54   :  { %v3757_v52 = vpop.eup %3756  ;;  %3766 = vrcp.f32 %v1749_v14  ;;  %v1752_v25 = vadd.f32 1.0, %v3755_v48 }
 0xc55   :  { %3768 = vrcp.f32 %v1751_v19  ;;  %v1753_v0 = vadd.f32 1.0, %v3757_v52 }
 0xc56   :  { %v3759_v43 = vpop.eup %3758  ;;  %3770 = vrcp.f32 %v1752_v25 }
 0xc57   :  { %v1754_v46 = vadd.f32 1.0, %v3759_v43  ;;  %3772 = vrcp.f32 %v1753_v0 }
 0xc59   :  { %v3761_v1 = vpop.eup %3760  ;;  %3774 = vrcp.f32 %v1754_v46 }
 0xc5a   :  { %v4864_v17 = vpop.eup %3762  ;;  %v1755_v50 = vadd.f32 1.0, %v3761_v1 }
 0xc5b   :  { %v4867_v41 = vpop.eup %3764 }
 0xc5c   :  { %3776 = vrcp.f32 %v1755_v50 }
 0xc5e   :  { %v4871_v44 = vpop.eup %3766 }
 0xc5f   :  { %v4875_v48 = vpop.eup %3768 }
 0xc60   :  { %v4879_v25 = vpop.eup %3770 }
 0xc61   :  { %v4883_v1 = vpop.eup %3772 }
 0xc63   :  { %v4887_v50 = vpop.eup %3774 }
 0xcad   :  { %v1782_v26 = vpop.permute.xlu1 %1781 }
 0xcae   :  { %v1805_v28 = vmul.f32 %v4864_v17, %v1782_v26 }
 0xcaf   :  { %v1786_v54 = vpop.permute.xlu0 %1785 }
 0xcb0   :  { %v1807_v56 = vmul.f32 %v4867_v41, %v1786_v54  ;;  %1821 = vrot.lane.b32.xlu1 %v1805_v28, %s4088_s27 }
 0xcb1   :  { %v1784_v51 = vpop.permute.xlu1 %1783 }
 0xcb2   :  { %v1806_v14 = vmul.f32 %v4871_v44, %v1784_v51  ;;  %1825 = vrot.lane.b32.xlu0 %v1807_v56, %s4088_s27  ;;  %v4891_v56 = vpop.eup %3776 }
 0xcb3   :  { %v1788_v19 = vpop.permute.xlu0 %1787 }
 0xcb4   :  { %v1808_v52 = vmul.f32 %v4875_v48, %v1788_v19  ;;  %1823 = vrot.lane.b32.xlu1 %v1806_v14, %s4088_s27 }
 0xcb5   :  { %v1790_v43 = vpop.permute.xlu1 %1789 }
 0xcb6   :  { %v1809_v0 = vmul.f32 %v4879_v25, %v1790_v43  ;;  %1827 = vrot.lane.b32.xlu0 %v1808_v52, %s4088_s27 }
 0xcb7   :  { %v1792_v46 = vpop.permute.xlu0 %1791 }
 0xcb8   :  { %v1810_v26 = vmul.f32 %v4883_v1, %v1792_v46  ;;  %1829 = vrot.lane.b32.xlu1 %v1809_v0, %s4088_s27 }
 0xcb9   :  { %v1794_v28 = vpop.permute.xlu1 %1793 }
 0xcba   :  { %v1811_v54 = vmul.f32 %v4887_v50, %v1794_v28  ;;  %1831 = vrot.lane.b32.xlu0 %v1810_v26, %s4088_s27 }
 0xcbb   :  { %v1796_v51 = vpop.permute.xlu0 %1795 }
 0xcbc   :  { %v1812_v14 = vmul.f32 %v4891_v56, %v1796_v51  ;;  %1833 = vrot.lane.b32.xlu1 %v1811_v54, %s4088_s27 }
 0xcbe   :  { %1835 = vrot.lane.b32.xlu0 %v1812_v14, %s4088_s27 }
 0xd22   :  { %v1822_v19 = vpop.permute.xlu1 %1821 }
 0xd23   :  { %v1845_v52 = vadd.f32 %v1822_v19, %v4840_v24 }
 0xd24   :  { %v1826_v43 = vpop.permute.xlu0 %1825 }
 0xd25   :  { %3778 = vtanh.f32 %v1845_v52  ;;  %v1847_v0 = vadd.f32 %v1826_v43, %v4842_v39 }
 0xd26   :  { %v1824_v46 = vpop.permute.xlu1 %1823 }
 0xd27   :  { %3780 = vtanh.f32 %v1847_v0  ;;  %v1846_v26 = vadd.f32 %v1824_v46, %v4845_v11 }
 0xd28   :  { %v1828_v28 = vpop.permute.xlu0 %1827 }
 0xd29   :  { %3782 = vtanh.f32 %v1846_v26  ;;  %v1848_v6 = vadd.f32 %v1828_v28, %v4848_v40  ;;  %v1863_v26 = vsub.f32 1.0, %v4867_v41 }
 0xd2a   :  { %v1830_v51 = vpop.permute.xlu1 %1829 }
 0xd2b   :  { %3784 = vtanh.f32 %v1848_v6  ;;  %v1849_v54 = vadd.f32 %v1830_v51, %v4851_v21  ;;  %v1861_v51 = vsub.f32 1.0, %v4864_v17 }
 0xd2c   :  { %v1832_v14 = vpop.permute.xlu0 %1831 }
 0xd2d   :  { %3786 = vtanh.f32 %v1849_v54  ;;  %v1850_v24 = vadd.f32 %v1832_v14, %v4854_v3  ;;  %v1862_v14 = vsub.f32 1.0, %v4871_v44 }
 0xd2e   :  { %v1834_v19 = vpop.permute.xlu1 %1833 }
 0xd2f   :  { %v3779_v52 = vpop.eup %3778  ;;  %3788 = vtanh.f32 %v1850_v24  ;;  %v1851_v39 = vadd.f32 %v1834_v19, %v4857_v4  ;;  %v1911_v24 = vmul.f32 %v4867_v41, %v4775_v36 }
 0xd30   :  { %v1836_v43 = vpop.permute.xlu0 %1835  ;;  %1877 = vrot.lane.b32.xlu1 %v3779_v52, %s4090_s28 }
 0xd31   :  { %v3781_v11 = vpop.eup %3780  ;;  %3790 = vtanh.f32 %v1851_v39  ;;  %v1852_v40 = vadd.f32 %v1836_v43, %v4860_v18  ;;  %v1910_v39 = vmul.f32 %v4871_v44, %v4777_v53  ;;  %v1913_v44 = vmul.f32 %v4879_v25, %v4797_v34 }
 0xd32   :  { %1881 = vrot.lane.b32.xlu0 %v3781_v11, %s4090_s28  ;;  %v1864_v11 = vsub.f32 1.0, %v4875_v48 }
 0xd33   :  { %v3783_v6 = vpop.eup %3782  ;;  %3792 = vtanh.f32 %v1852_v40  ;;  %v1909_v40 = vmul.f32 %v4864_v17, %v4785_v15 }
 0xd34   :  { %1879 = vrot.lane.b32.xlu1 %v3783_v6, %s4090_s28 }
 0xd35   :  { %v3785_v21 = vpop.eup %3784 }
 0xd36   :  { %1883 = vrot.lane.b32.xlu0 %v3785_v21, %s4090_s28 }
 0xd37   :  { %v3787_v3 = vpop.eup %3786 }
 0xd38   :  { %1885 = vrot.lane.b32.xlu1 %v3787_v3, %s4090_s28 }
 0xd39   :  { %v3789_v4 = vpop.eup %3788 }
 0xd3a   :  { %1887 = vrot.lane.b32.xlu0 %v3789_v4, %s4090_s28  ;;  %v1912_v4 = vmul.f32 %v4875_v48, %v4788_v61  ;;  %v1914_v48 = vmul.f32 %v4883_v1, %v4804_v27 }
 0xd3b   :  { %v3791_v0 = vpop.eup %3790 }
 0xd3c   :  { %1889 = vrot.lane.b32.xlu1 %v3791_v0, %s4090_s28  ;;  %v1865_v0 = vsub.f32 1.0, %v4879_v25 }
 0xd3d   :  { %v3793_v46 = vpop.eup %3792 }
 0xd3e   :  { %1891 = vrot.lane.b32.xlu0 %v3793_v46, %s4090_s28 }
 0xda2   :  { %v1878_v18 = vpop.permute.xlu1 %1877 }
 0xda3   :  { %v1901_v52 = vmul.f32 %v1878_v18, %v1861_v51  ;;  %v1866_v18 = vsub.f32 1.0, %v4883_v1 }
 0xda4   :  { %v1882_v28 = vpop.permute.xlu0 %1881 }
 0xda5   :  { %v1903_v54 = vmul.f32 %v1882_v28, %v1863_v26  ;;  %v4932_v26 = vadd.f32 %v1909_v40, %v1901_v52  ;;  %v1868_v40 = vsub.f32 1.0, %v4891_v56 }
 0xda6   :  { %v1880_v19 = vpop.permute.xlu1 %1879 }
 0xda7   :  { %v1902_v43 = vmul.f32 %v1880_v19, %v1862_v14  ;;  %v4922_v6 = vadd.f32 %v1911_v24, %v1903_v54  ;;  %v1867_v24 = vsub.f32 1.0, %v4887_v50 }
 0xda8   :  { %v1884_v21 = vpop.permute.xlu0 %1883 }
 0xda9   :  { %v4924_v3 = vadd.f32 %v1910_v39, %v1902_v43  ;;  %v1904_v41 = vmul.f32 %v1884_v21, %v1864_v11  ;;  %v1975_v54 = vrot.slane %v4922_v6, 6  ;;  %v1915_v43 = vmul.f32 %v4887_v50, %v4810_v7 }
 0xdaa   :  { %v1886_v46 = vpop.permute.xlu1 %1885 }
 0xdab   :  { %5725 = vst [vmem:[#allocation34_spill] sm:$0xff] %v4924_v3  ;;  %v1973_v17 = vrot.slane %v4924_v3, 7  ;;  %v4935_v28 = vadd.f32 %v1912_v4, %v1904_v41  ;;  %v1905_v51 = vmul.f32 %v1886_v46, %v1865_v0 }
 0xdac   :  { %v1888_v14 = vpop.permute.xlu0 %1887 }
 0xdad   :  { %5726 = vst [vmem:[#allocation35_spill] sm:$0xff] %v4935_v28  ;;  %v1974_v25 = vsel %vm483_vm2, %v1973_v17, %v4932_v26  ;;  %v1977_v19 = vrot.slane %v4935_v28, 5  ;;  %v4944_v52 = vadd.f32 %v1913_v44, %v1905_v51  ;;  %v1906_v39 = vmul.f32 %v1888_v14, %v1866_v18 }
 0xdae   :  { %v1890_v11 = vpop.permute.xlu1 %1889  ;;  %v1976_v21 = vsel %vm486_vm3, %v1975_v54, %v1974_v25  ;;  %v1916_v44 = vmul.f32 %v4891_v56, %v4814_v29 }
 0xdaf   :  { %v1979_v1 = vrot.slane %v4944_v52, 4  ;;  %v4951_v4 = vadd.f32 %v1914_v48, %v1906_v39  ;;  %v1907_v41 = vmul.f32 %v1890_v11, %v1867_v24  ;;  %v1978_v0 = vsel %vm489_vm4, %v1977_v19, %v1976_v21 }
 0xdb0   :  { %v1892_v46 = vpop.permute.xlu0 %1891  ;;  %v5729_v39 = vmov 0.0  }
 0xdb1   :  { %5727 = vst [vmem:[#allocation36_spill] sm:$0xff] %v4951_v4  ;;  %v1981_v18 = vrot.slane %v4951_v4, 3  ;;  %v4957_v17 = vadd.f32 %v1915_v43, %v1907_v41  ;;  %v1908_v50 = vmul.f32 %v1892_v46, %v1868_v40  ;;  %v1980_v51 = vsel %vm492_vm5, %v1979_v1, %v1978_v0 }
 0xdb2   :  { %v5730_v43 = vmov 0.0|0.0  }
 0xdb3   :  { %v1983_v54 = vrot.slane %v4957_v17, 2  ;;  %v4961_v14 = vadd.f32 %v1916_v44, %v1908_v50  ;;  %v1982_v48 = vsel %vm495_vm6, %v1981_v18, %v1980_v51  ;;  %v4986_v18 = vld [vmem:[#allocation4 + $0x5] sm:$0x1]  ;;  %v4988_v51 = vld [vmem:[#allocation4 + $0x15] sm:$0x1] }
 0xdb5   :  { %5728 = vst [vmem:[#allocation37_spill] sm:$0xff] %v4961_v14  ;;  %v1984_v24 = vsel %vm498_vm7, %v1983_v54, %v1982_v48  ;;  %v1985_v25 = vrot.slane %v4961_v14, 1 }
 0xdb7   :  { %v1986_v56 = vsel %vm501_vm8, %v1985_v25, %v1984_v24  ;;  %v4991_v24 = vld [vmem:[#allocation4 + $0xd] sm:$0x1] }
 0xdb8   :  { %1987 = vrot.lane.b32.xlu1 %v1986_v56, %s4090_s28 }
 0xe2a   :  { %v4968_v19 = vpop.permute.xlu1 %1987 }
 0xe2b   :  { %3448 = vmatmul.mubr.msk.f32.vlgmr.msra.gmra.mrb[4].mxu1 %vm76_vm0, %v4968_v19 }
 0xe2c   :  { %3527 = vmatpush3.bf16.msra.mxu1 %v4207_v5  ;;  %3469 = vmatprep.mubr.msk.f32.mxu1 %vm4086_vm1, %v5729_v39 }
 0xe2d   :  { %3528 = vmatprep.subr.bf16.mxu1 %v5730_v43 }
 0xe30   :  { %3530 = vmatpush3.bf16.msra.mxu1 %v4214_v8 }
 0xefe   :  { %v2067_v11 = vpop.f32.mrb[4].mxu1 }
 0xeff   :  { %v3449_v40 = vpop.f32.mrb[5].mxu1  ;;  %v2143_v21 = vadd.f32 %v2067_v11, %v4233_v12  ;;  %v2073_v50 = vrot.slane %v2067_v11, 2  ;;  %v2072_v54 = vrot.slane %v2067_v11, 1  ;;  %v2087_v48 = vadd.f32 %v2067_v11, %v4986_v18 }
 0xf00   :  { %v2074_v25 = vrot.slane %v2067_v11, 3  ;;  %v4994_v40 = vld [vmem:[#allocation4 + $0x1d] sm:$0x1]  ;;  %v2077_v29 = vrot.slane %v2067_v11, 6  ;;  %v2078_v53 = vrot.slane %v2067_v11, 7 }
 0xf01   :  { %2152 = vrot.lane.b32.xlu0 %v2143_v21, %s4088_s27  ;;  %v2146_v1 = vrot.slane %v2143_v21, 2  ;;  %v2145_v41 = vrot.slane %v2143_v21, 1  ;;  %v2147_v5 = vrot.slane %v2143_v21, 3  ;;  %v2148_v0 = vrot.slane %v2143_v21, 4 }
 0xf02   :  { %v2149_v44 = vrot.slane %v2143_v21, 5  ;;  %v2150_v8 = vrot.slane %v2143_v21, 6  ;;  %v2151_v46 = vrot.slane %v2143_v21, 7  ;;  %v2089_v56 = vadd.f32 %v2073_v50, %v4988_v51  ;;  %v5003_v50 = vld [vmem:[#allocation4 + $0x35] sm:$0x1] }
 0xf03   :  { %2156 = vrot.lane.b32.xlu1 %v2146_v1, %s4088_s27  ;;  %v2075_v1 = vrot.slane %v2067_v11, 4  ;;  %v2088_v21 = vadd.f32 %v2072_v54, %v4991_v24  ;;  %v2093_v37 = vadd.f32 %v2077_v29, %v5003_v50 }
 0xf05   :  { %2154 = vrot.lane.b32.xlu0 %v2145_v41, %s4088_s27  ;;  %v3310_v41 = vmul.f32 -1.442695, %v2087_v48  ;;  %v3311_v61 = vmul.f32 -1.442695, %v2088_v21  ;;  %v5006_v48 = vld [vmem:[#allocation4 + $0x3d] sm:$0x1] }
 0xf07   :  { %2158 = vrot.lane.b32.xlu1 %v2147_v5, %s4088_s27  ;;  %v4997_v5 = vld [vmem:[#allocation4 + $0x25] sm:$0x1]  ;;  %3794 = vpow2.f32 %v3310_v41 }
 0xf08   :  { %v2091_v27 = vadd.f32 %v2075_v1, %v4997_v5  ;;  %v3316_v1 = vmul.f32 -1.442695, %v2093_v37 }
 0xf09   :  { %2160 = vrot.lane.b32.xlu0 %v2148_v0, %s4088_s27  ;;  %v2076_v0 = vrot.slane %v2067_v11, 5 }
 0xf0b   :  { %2162 = vrot.lane.b32.xlu1 %v2149_v44, %s4088_s27  ;;  %v2090_v44 = vadd.f32 %v2074_v25, %v4994_v40  ;;  %v3314_v25 = vmul.f32 -1.442695, %v2091_v27 }
 0xf0d   :  { %2164 = vrot.lane.b32.xlu0 %v2150_v8, %s4088_s27  ;;  %v3312_v8 = vmul.f32 -1.442695, %v2089_v56  ;;  %v3313_v54 = vmul.f32 -1.442695, %v2090_v44  ;;  %v2094_v56 = vadd.f32 %v2078_v53, %v5006_v48 }
 0xf0f   :  { %2166 = vrot.lane.b32.xlu1 %v2151_v46, %s4088_s27  ;;  %v5000_v46 = vld [vmem:[#allocation4 + $0x2d] sm:$0x1]  ;;  %3796 = vpow2.f32 %v3312_v8  ;;  %v3317_v41 = vmul.f32 -1.442695, %v2094_v56 }
 0xf10   :  { %v2092_v47 = vadd.f32 %v2076_v0, %v5000_v46  ;;  %3798 = vpow2.f32 %v3311_v61 }
 0xf11   :  { %3800 = vpow2.f32 %v3313_v54  ;;  %v3795_v21 = vpop.eup %3794 }
 0xf12   :  { %v3315_v30 = vmul.f32 -1.442695, %v2092_v47  ;;  %3802 = vpow2.f32 %v3314_v25  ;;  %v2119_v0 = vadd.f32 1.0, %v3795_v21 }
 0xf14   :  { %3804 = vpow2.f32 %v3315_v30 }
 0xf15   :  { %3806 = vpow2.f32 %v3316_v1 }
 0xf16   :  { %3808 = vpow2.f32 %v3317_v41 }
 0xf17   :  { %3810 = vrcp.f32 %v2119_v0 }
 0xf19   :  { %v3797_v11 = vpop.eup %3796 }
 0xf1a   :  { %v3799_v8 = vpop.eup %3798  ;;  %v2121_v44 = vadd.f32 1.0, %v3797_v11 }
 0xf1b   :  { %v3801_v13 = vpop.eup %3800  ;;  %v2120_v29 = vadd.f32 1.0, %v3799_v8 }
 0xf1c   :  { %v3803_v61 = vpop.eup %3802  ;;  %3812 = vrcp.f32 %v2121_v44  ;;  %v2122_v27 = vadd.f32 1.0, %v3801_v13 }
 0xf1d   :  { %3814 = vrcp.f32 %v2120_v29  ;;  %v2123_v47 = vadd.f32 1.0, %v3803_v61 }
 0xf1e   :  { %v3805_v53 = vpop.eup %3804  ;;  %3816 = vrcp.f32 %v2122_v27 }
 0xf1f   :  { %v3807_v54 = vpop.eup %3806  ;;  %v2124_v37 = vadd.f32 1.0, %v3805_v53  ;;  %3818 = vrcp.f32 %v2123_v47 }
 0xf20   :  { %v3809_v30 = vpop.eup %3808  ;;  %v2125_v25 = vadd.f32 1.0, %v3807_v54 }
 0xf21   :  { %v5010_v56 = vpop.eup %3810  ;;  %3820 = vrcp.f32 %v2124_v37  ;;  %v2126_v21 = vadd.f32 1.0, %v3809_v30 }
 0xf22   :  { %3822 = vrcp.f32 %v2125_v25 }
 0xf23   :  { %3824 = vrcp.f32 %v2126_v21 }
 0xf26   :  { %v5013_v11 = vpop.eup %3812 }
 0xf27   :  { %v5017_v8 = vpop.eup %3814 }
 0xf28   :  { %v5021_v61 = vpop.eup %3816 }
 0xf29   :  { %v5025_v47 = vpop.eup %3818 }
 0xf2b   :  { %v5029_v30 = vpop.eup %3820 }
 0xf2c   :  { %v5033_v21 = vpop.eup %3822 }
 0xf73   :  { %v2153_v1 = vpop.permute.xlu0 %2152 }
 0xf74   :  { %v2176_v41 = vmul.f32 %v5010_v56, %v2153_v1 }
 0xf75   :  { %v2157_v0 = vpop.permute.xlu1 %2156 }
 0xf76   :  { %v2178_v13 = vmul.f32 %v5013_v11, %v2157_v0  ;;  %2192 = vrot.lane.b32.xlu0 %v2176_v41, %s4088_s27 }
 0xf77   :  { %v2155_v44 = vpop.permute.xlu0 %2154 }
 0xf78   :  { %v2177_v29 = vmul.f32 %v5017_v8, %v2155_v44  ;;  %2196 = vrot.lane.b32.xlu1 %v2178_v13, %s4088_s27  ;;  %v5037_v13 = vpop.eup %3824 }
 0xf79   :  { %v2159_v27 = vpop.permute.xlu1 %2158 }
 0xf7a   :  { %v2179_v53 = vmul.f32 %v5021_v61, %v2159_v27  ;;  %2194 = vrot.lane.b32.xlu0 %v2177_v29, %s4088_s27 }
 0xf7b   :  { %v2161_v54 = vpop.permute.xlu0 %2160 }
 0xf7c   :  { %v2180_v37 = vmul.f32 %v5025_v47, %v2161_v54  ;;  %2198 = vrot.lane.b32.xlu1 %v2179_v53, %s4088_s27 }
 0xf7d   :  { %v2163_v25 = vpop.permute.xlu1 %2162 }
 0xf7e   :  { %v2181_v1 = vmul.f32 %v5029_v30, %v2163_v25  ;;  %2200 = vrot.lane.b32.xlu0 %v2180_v37, %s4088_s27 }
 0xf7f   :  { %v2165_v41 = vpop.permute.xlu0 %2164 }
 0xf80   :  { %v2182_v0 = vmul.f32 %v5033_v21, %v2165_v41  ;;  %2202 = vrot.lane.b32.xlu1 %v2181_v1, %s4088_s27 }
 0xf81   :  { %v2167_v44 = vpop.permute.xlu1 %2166 }
 0xf82   :  { %v2183_v29 = vmul.f32 %v5037_v13, %v2167_v44  ;;  %2204 = vrot.lane.b32.xlu0 %v2182_v0, %s4088_s27 }
 0xf84   :  { %2206 = vrot.lane.b32.xlu1 %v2183_v29, %s4088_s27 }
 0xfe8   :  { %v2193_v27 = vpop.permute.xlu0 %2192 }
 0xfe9   :  { %v2216_v53 = vadd.f32 %v2193_v27, %v4986_v18 }
 0xfea   :  { %v2197_v54 = vpop.permute.xlu1 %2196 }
 0xfeb   :  { %3826 = vtanh.f32 %v2216_v53  ;;  %v2218_v37 = vadd.f32 %v2197_v54, %v4988_v51 }
 0xfec   :  { %v2195_v25 = vpop.permute.xlu0 %2194 }
 0xfed   :  { %3828 = vtanh.f32 %v2218_v37  ;;  %v2217_v1 = vadd.f32 %v2195_v25, %v4991_v24 }
 0xfee   :  { %v2199_v41 = vpop.permute.xlu1 %2198 }
 0xfef   :  { %3830 = vtanh.f32 %v2217_v1  ;;  %v2219_v63 = vadd.f32 %v2199_v41, %v4994_v40  ;;  %v2234_v1 = vsub.f32 1.0, %v5013_v11 }
 0xff0   :  { %v2201_v44 = vpop.permute.xlu0 %2200 }
 0xff1   :  { %3832 = vtanh.f32 %v2219_v63  ;;  %v2220_v0 = vadd.f32 %v2201_v44, %v4997_v5  ;;  %v2232_v44 = vsub.f32 1.0, %v5010_v56 }
 0xff2   :  { %v2203_v29 = vpop.permute.xlu1 %2202 }
 0xff3   :  { %3834 = vtanh.f32 %v2220_v0  ;;  %v2221_v18 = vadd.f32 %v2203_v29, %v5000_v46  ;;  %v2233_v29 = vsub.f32 1.0, %v5017_v8 }
 0xff4   :  { %v2205_v27 = vpop.permute.xlu0 %2204 }
 0xff5   :  { %v3827_v53 = vpop.eup %3826  ;;  %3836 = vtanh.f32 %v2221_v18  ;;  %v2222_v51 = vadd.f32 %v2205_v27, %v5003_v50  ;;  %v2282_v18 = vmul.f32 %v5013_v11, %v4922_v6 }
 0xff6   :  { %v2207_v54 = vpop.permute.xlu1 %2206  ;;  %2248 = vrot.lane.b32.xlu0 %v3827_v53, %s4090_s28 }
 0xff7   :  { %v3829_v24 = vpop.eup %3828  ;;  %3838 = vtanh.f32 %v2222_v51  ;;  %v2223_v40 = vadd.f32 %v2207_v54, %v5006_v48  ;;  %v2281_v51 = vmul.f32 %v5017_v8, %v4924_v3  ;;  %v2284_v8 = vmul.f32 %v5025_v47, %v4944_v52 }
 0xff8   :  { %2252 = vrot.lane.b32.xlu1 %v3829_v24, %s4090_s28  ;;  %v2235_v24 = vsub.f32 1.0, %v5021_v61 }
 0xff9   :  { %v3831_v63 = vpop.eup %3830  ;;  %3840 = vtanh.f32 %v2223_v40  ;;  %v2280_v40 = vmul.f32 %v5010_v56, %v4932_v26 }
 0xffa   :  { %2250 = vrot.lane.b32.xlu0 %v3831_v63, %s4090_s28 }
 0xffb   :  { %v3833_v5 = vpop.eup %3832 }
 0xffc   :  { %2254 = vrot.lane.b32.xlu1 %v3833_v5, %s4090_s28 }
 0xffd   :  { %v3835_v46 = vpop.eup %3834 }
 0xffe   :  { %2256 = vrot.lane.b32.xlu0 %v3835_v46, %s4090_s28 }
 0xfff   :  { %v3837_v50 = vpop.eup %3836 }
0x1000   :  { %2258 = vrot.lane.b32.xlu1 %v3837_v50, %s4090_s28  ;;  %v2283_v50 = vmul.f32 %v5021_v61, %v4935_v28  ;;  %v2285_v61 = vmul.f32 %v5029_v30, %v4951_v4 }
0x1001   :  { %v3839_v37 = vpop.eup %3838 }
0x1002   :  { %2260 = vrot.lane.b32.xlu0 %v3839_v37, %s4090_s28  ;;  %v2236_v37 = vsub.f32 1.0, %v5025_v47 }
0x1003   :  { %v3841_v25 = vpop.eup %3840 }
0x1004   :  { %2262 = vrot.lane.b32.xlu1 %v3841_v25, %s4090_s28 }
0x1068   :  { %v2249_v48 = vpop.permute.xlu0 %2248 }
0x1069   :  { %v2272_v53 = vmul.f32 %v2249_v48, %v2232_v44  ;;  %v2237_v48 = vsub.f32 1.0, %v5029_v30 }
0x106a   :  { %v2253_v41 = vpop.permute.xlu1 %2252 }
0x106b   :  { %v2274_v0 = vmul.f32 %v2253_v41, %v2234_v1  ;;  %v5078_v1 = vadd.f32 %v2280_v40, %v2272_v53  ;;  %v2239_v40 = vsub.f32 1.0, %v5037_v13 }
0x106c   :  { %v2251_v27 = vpop.permute.xlu0 %2250 }
0x106d   :  { %v2273_v54 = vmul.f32 %v2251_v27, %v2233_v29  ;;  %v5068_v63 = vadd.f32 %v2282_v18, %v2274_v0  ;;  %v2238_v18 = vsub.f32 1.0, %v5033_v21 }
0x106e   :  { %v2255_v5 = vpop.permute.xlu1 %2254 }
0x106f   :  { %v5070_v46 = vadd.f32 %v2281_v51, %v2273_v54  ;;  %v2275_v11 = vmul.f32 %v2255_v5, %v2235_v24  ;;  %v2346_v0 = vrot.slane %v5068_v63, 6  ;;  %v2286_v54 = vmul.f32 %v5033_v21, %v4957_v17 }
0x1070   :  { %v2257_v25 = vpop.permute.xlu0 %2256 }
0x1071   :  { %5731 = vst [vmem:[#allocation38_spill] sm:$0xff] %v5070_v46  ;;  %v2344_v56 = vrot.slane %v5070_v46, 7  ;;  %v5081_v41 = vadd.f32 %v2283_v50, %v2275_v11  ;;  %v2276_v44 = vmul.f32 %v2257_v25, %v2236_v37 }
0x1072   :  { %v2259_v29 = vpop.permute.xlu1 %2258 }
0x1073   :  { %5732 = vst [vmem:[#allocation39_spill] sm:$0xff] %v5081_v41  ;;  %v2345_v47 = vsel %vm483_vm2, %v2344_v56, %v5078_v1  ;;  %v2348_v27 = vrot.slane %v5081_v41, 5  ;;  %v5090_v53 = vadd.f32 %v2284_v8, %v2276_v44  ;;  %v2277_v51 = vmul.f32 %v2259_v29, %v2237_v48 }
0x1074   :  { %v2261_v24 = vpop.permute.xlu0 %2260  ;;  %v2347_v5 = vsel %vm486_vm3, %v2346_v0, %v2345_v47  ;;  %v2287_v8 = vmul.f32 %v5037_v13, %v4961_v14 }
0x1075   :  { %5733 = vst [vmem:[#allocation40_spill] sm:$0xff] %v5090_v53  ;;  %v2350_v30 = vrot.slane %v5090_v53, 4  ;;  %v5097_v50 = vadd.f32 %v2285_v61, %v2277_v51  ;;  %v2278_v11 = vmul.f32 %v2261_v24, %v2238_v18  ;;  %v2349_v37 = vsel %vm489_vm4, %v2348_v27, %v2347_v5 }
0x1076   :  { %v2263_v25 = vpop.permute.xlu1 %2262 }
0x1077   :  { %5734 = vst [vmem:[#allocation41_spill] sm:$0xff] %v5097_v50  ;;  %v2352_v48 = vrot.slane %v5097_v50, 3  ;;  %v5103_v56 = vadd.f32 %v2286_v54, %v2278_v11  ;;  %v2279_v21 = vmul.f32 %v2263_v25, %v2239_v40  ;;  %v2351_v44 = vsel %vm492_vm5, %v2350_v30, %v2349_v37  ;;  %v5129_v25 = vld [vmem:[#allocation4 + $0x6] sm:$0x1] }
0x1079   :  { %5735 = vst [vmem:[#allocation42_spill] sm:$0xff] %v5103_v56  ;;  %v2354_v0 = vrot.slane %v5103_v56, 2  ;;  %v5107_v29 = vadd.f32 %v2287_v8, %v2279_v21  ;;  %v2353_v61 = vsel %vm495_vm6, %v2352_v48, %v2351_v44  ;;  %v5131_v21 = vld [vmem:[#allocation4 + $0x16] sm:$0x1] }
0x107b   :  { %5736 = vst [vmem:[#allocation43_spill] sm:$0xff] %v5107_v29  ;;  %v2355_v18 = vsel %vm498_vm7, %v2354_v0, %v2353_v61  ;;  %v2356_v47 = vrot.slane %v5107_v29, 1  ;;  %v5134_v61 = vld [vmem:[#allocation4 + $0xe] sm:$0x1] }
0x107d   :  { %v2357_v13 = vsel %vm501_vm8, %v2356_v47, %v2355_v18 }
0x107e   :  { %2358 = vrot.lane.b32.xlu0 %v2357_v13, %s4090_s28  ;;  %v5137_v13 = vld [vmem:[#allocation4 + $0x1e] sm:$0x1] }
0x10f0   :  { %v5114_v27 = vpop.permute.xlu0 %2358 }
0x10f1   :  { %3459 = vmatmul.mubr.msk.f32.vlgmr.msra.gmra.mrb[6].mxu0 %vm76_vm0, %v5114_v27 }
0x10f2   :  { %3480 = vmatprep.mubr.msk.f32.mxu0 %vm4086_vm1, %v5729_v39 }
0x11c4   :  { %v2438_v51 = vpop.f32.mrb[6].mxu0 }
0x11c5   :  { %v3460_v54 = vpop.f32.mrb[7].mxu0  ;;  %v2514_v24 = vadd.f32 %v2438_v51, %v4233_v12  ;;  %v2444_v48 = vrot.slane %v2438_v51, 2  ;;  %v2443_v44 = vrot.slane %v2438_v51, 1  ;;  %v2458_v0 = vadd.f32 %v2438_v51, %v5129_v25 }
0x11c6   :  { %v2445_v18 = vrot.slane %v2438_v51, 3  ;;  %v2446_v54 = vrot.slane %v2438_v51, 4  ;;  %v2449_v28 = vrot.slane %v2438_v51, 7 }
0x11c7   :  { %2523 = vrot.lane.b32.xlu1 %v2514_v24, %s4088_s27  ;;  %v2517_v40 = vrot.slane %v2514_v24, 2  ;;  %v2516_v5 = vrot.slane %v2514_v24, 1  ;;  %v2518_v30 = vrot.slane %v2514_v24, 3  ;;  %v2519_v11 = vrot.slane %v2514_v24, 4 }
0x11c8   :  { %v2520_v37 = vrot.slane %v2514_v24, 5  ;;  %v2521_v39 = vrot.slane %v2514_v24, 6  ;;  %v2522_v8 = vrot.slane %v2514_v24, 7  ;;  %v2460_v47 = vadd.f32 %v2444_v48, %v5131_v21  ;;  %v5146_v48 = vld [vmem:[#allocation4 + $0x36] sm:$0x1] }
0x11c9   :  { %2527 = vrot.lane.b32.xlu0 %v2517_v40, %s4088_s27  ;;  %v2459_v24 = vadd.f32 %v2443_v44, %v5134_v61  ;;  %v3319_v40 = vmul.f32 -1.442695, %v2458_v0  ;;  %v5149_v0 = vld [vmem:[#allocation4 + $0x3e] sm:$0x1] }
0x11cb   :  { %2525 = vrot.lane.b32.xlu1 %v2516_v5, %s4088_s27  ;;  %v5140_v5 = vld [vmem:[#allocation4 + $0x26] sm:$0x1]  ;;  %3842 = vpow2.f32 %v3319_v40  ;;  %v3320_v4 = vmul.f32 -1.442695, %v2459_v24 }
0x11cc   :  { %v2462_v14 = vadd.f32 %v2446_v54, %v5140_v5 }
0x11cd   :  { %2529 = vrot.lane.b32.xlu0 %v2518_v30, %s4088_s27  ;;  %v2447_v30 = vrot.slane %v2438_v51, 5 }
0x11cf   :  { %2531 = vrot.lane.b32.xlu1 %v2519_v11, %s4088_s27  ;;  %v2461_v11 = vadd.f32 %v2445_v18, %v5137_v13  ;;  %v3323_v18 = vmul.f32 -1.442695, %v2462_v14 }
0x11d1   :  { %2533 = vrot.lane.b32.xlu0 %v2520_v37, %s4088_s27  ;;  %v3321_v37 = vmul.f32 -1.442695, %v2460_v47  ;;  %v3322_v44 = vmul.f32 -1.442695, %v2461_v11  ;;  %v2465_v47 = vadd.f32 %v2449_v28, %v5149_v0 }
0x11d3   :  { %2535 = vrot.lane.b32.xlu1 %v2521_v39, %s4088_s27  ;;  %v5143_v39 = vld [vmem:[#allocation4 + $0x2e] sm:$0x1]  ;;  %3844 = vpow2.f32 %v3321_v37  ;;  %v3326_v40 = vmul.f32 -1.442695, %v2465_v47 }
0x11d4   :  { %v2463_v3 = vadd.f32 %v2447_v30, %v5143_v39  ;;  %3846 = vpow2.f32 %v3320_v4 }
0x11d5   :  { %2537 = vrot.lane.b32.xlu0 %v2522_v8, %s4088_s27  ;;  %v2448_v8 = vrot.slane %v2438_v51, 6  ;;  %3848 = vpow2.f32 %v3322_v44  ;;  %v3843_v24 = vpop.eup %3842 }
0x11d6   :  { %v3324_v43 = vmul.f32 -1.442695, %v2463_v3  ;;  %3850 = vpow2.f32 %v3323_v18  ;;  %v2490_v30 = vadd.f32 1.0, %v3843_v24 }
0x11d7   :  { %v2464_v23 = vadd.f32 %v2448_v8, %v5146_v48 }
0x11d8   :  { %3852 = vpow2.f32 %v3324_v43 }
0x11d9   :  { %v3325_v54 = vmul.f32 -1.442695, %v2464_v23 }
0x11db   :  { %3854 = vpow2.f32 %v3325_v54 }
0x11dc   :  { %3856 = vpow2.f32 %v3326_v40 }
0x11dd   :  { %v3845_v51 = vpop.eup %3844  ;;  %3858 = vrcp.f32 %v2490_v30 }
0x11de   :  { %v3847_v37 = vpop.eup %3846  ;;  %v2492_v11 = vadd.f32 1.0, %v3845_v51 }
0x11df   :  { %v3849_v2 = vpop.eup %3848  ;;  %v2491_v8 = vadd.f32 1.0, %v3847_v37 }
0x11e0   :  { %v3851_v4 = vpop.eup %3850  ;;  %3860 = vrcp.f32 %v2492_v11  ;;  %v2493_v14 = vadd.f32 1.0, %v3849_v2 }
0x11e1   :  { %3862 = vrcp.f32 %v2491_v8  ;;  %v2494_v3 = vadd.f32 1.0, %v3851_v4 }
0x11e2   :  { %v3853_v28 = vpop.eup %3852  ;;  %3864 = vrcp.f32 %v2493_v14 }
0x11e3   :  { %v2495_v23 = vadd.f32 1.0, %v3853_v28  ;;  %3866 = vrcp.f32 %v2494_v3 }
0x11e5   :  { %v3855_v44 = vpop.eup %3854  ;;  %3868 = vrcp.f32 %v2495_v23 }
0x11e6   :  { %v3857_v43 = vpop.eup %3856  ;;  %v2496_v18 = vadd.f32 1.0, %v3855_v44 }
0x11e7   :  { %v5153_v47 = vpop.eup %3858  ;;  %v2497_v24 = vadd.f32 1.0, %v3857_v43 }
0x11e8   :  { %3870 = vrcp.f32 %v2496_v18 }
0x11e9   :  { %3872 = vrcp.f32 %v2497_v24 }
0x11ea   :  { %v5156_v51 = vpop.eup %3860 }
0x11eb   :  { %v5160_v37 = vpop.eup %3862 }
0x11ec   :  { %v5164_v4 = vpop.eup %3864 }
0x11ed   :  { %v5168_v3 = vpop.eup %3866 }
0x11ef   :  { %v5172_v43 = vpop.eup %3868 }
0x11f2   :  { %v5176_v24 = vpop.eup %3870 }
0x1239   :  { %v2524_v54 = vpop.permute.xlu1 %2523 }
0x123a   :  { %v2547_v40 = vmul.f32 %v5153_v47, %v2524_v54 }
0x123b   :  { %v2528_v30 = vpop.permute.xlu0 %2527 }
0x123c   :  { %v2549_v2 = vmul.f32 %v5156_v51, %v2528_v30  ;;  %2563 = vrot.lane.b32.xlu1 %v2547_v40, %s4088_s27 }
0x123d   :  { %v2526_v11 = vpop.permute.xlu1 %2525 }
0x123e   :  { %v2548_v8 = vmul.f32 %v5160_v37, %v2526_v11  ;;  %2567 = vrot.lane.b32.xlu0 %v2549_v2, %s4088_s27  ;;  %v5180_v2 = vpop.eup %3872 }
0x123f   :  { %v2530_v14 = vpop.permute.xlu0 %2529 }
0x1240   :  { %v2550_v28 = vmul.f32 %v5164_v4, %v2530_v14  ;;  %2565 = vrot.lane.b32.xlu1 %v2548_v8, %s4088_s27 }
0x1241   :  { %v2532_v44 = vpop.permute.xlu1 %2531 }
0x1242   :  { %v2551_v23 = vmul.f32 %v5168_v3, %v2532_v44  ;;  %2569 = vrot.lane.b32.xlu0 %v2550_v28, %s4088_s27 }
0x1243   :  { %v2534_v18 = vpop.permute.xlu0 %2533 }
0x1244   :  { %v2552_v54 = vmul.f32 %v5172_v43, %v2534_v18  ;;  %2571 = vrot.lane.b32.xlu1 %v2551_v23, %s4088_s27 }
0x1245   :  { %v2536_v40 = vpop.permute.xlu1 %2535 }
0x1246   :  { %v2553_v30 = vmul.f32 %v5176_v24, %v2536_v40  ;;  %2573 = vrot.lane.b32.xlu0 %v2552_v54, %s4088_s27 }
0x1247   :  { %v2538_v11 = vpop.permute.xlu0 %2537 }
0x1248   :  { %v2554_v8 = vmul.f32 %v5180_v2, %v2538_v11  ;;  %2575 = vrot.lane.b32.xlu1 %v2553_v30, %s4088_s27 }
0x124a   :  { %2577 = vrot.lane.b32.xlu0 %v2554_v8, %s4088_s27 }
0x12ae   :  { %v2564_v14 = vpop.permute.xlu1 %2563 }
0x12af   :  { %v2587_v28 = vadd.f32 %v2564_v14, %v5129_v25 }
0x12b0   :  { %v2568_v44 = vpop.permute.xlu0 %2567 }
0x12b1   :  { %3874 = vtanh.f32 %v2587_v28  ;;  %v2589_v23 = vadd.f32 %v2568_v44, %v5131_v21 }
0x12b2   :  { %v2566_v18 = vpop.permute.xlu1 %2565 }
0x12b3   :  { %3876 = vtanh.f32 %v2589_v23  ;;  %v2588_v54 = vadd.f32 %v2566_v18, %v5134_v61 }
0x12b4   :  { %v2570_v40 = vpop.permute.xlu0 %2569 }
0x12b5   :  { %3878 = vtanh.f32 %v2588_v54  ;;  %v2590_v59 = vadd.f32 %v2570_v40, %v5137_v13  ;;  %v2605_v54 = vsub.f32 1.0, %v5156_v51 }
0x12b6   :  { %v2572_v11 = vpop.permute.xlu1 %2571 }
0x12b7   :  { %3880 = vtanh.f32 %v2590_v59  ;;  %v2591_v30 = vadd.f32 %v2572_v11, %v5140_v5  ;;  %v2603_v11 = vsub.f32 1.0, %v5153_v47 }
0x12b8   :  { %v2574_v8 = vpop.permute.xlu0 %2573 }
0x12b9   :  { %3882 = vtanh.f32 %v2591_v30  ;;  %v2592_v25 = vadd.f32 %v2574_v8, %v5143_v39  ;;  %v2604_v8 = vsub.f32 1.0, %v5160_v37 }
0x12ba   :  { %v2576_v14 = vpop.permute.xlu1 %2575 }
0x12bb   :  { %v3875_v28 = vpop.eup %3874  ;;  %3884 = vtanh.f32 %v2592_v25  ;;  %v2593_v21 = vadd.f32 %v2576_v14, %v5146_v48  ;;  %v2653_v25 = vmul.f32 %v5156_v51, %v5068_v63 }
0x12bc   :  { %v2578_v44 = vpop.permute.xlu0 %2577  ;;  %2619 = vrot.lane.b32.xlu1 %v3875_v28, %s4090_s28 }
0x12bd   :  { %v3877_v61 = vpop.eup %3876  ;;  %3886 = vtanh.f32 %v2593_v21  ;;  %v2594_v13 = vadd.f32 %v2578_v44, %v5149_v0  ;;  %v2652_v21 = vmul.f32 %v5160_v37, %v5070_v46  ;;  %v2655_v37 = vmul.f32 %v5168_v3, %v5090_v53 }
0x12be   :  { %2623 = vrot.lane.b32.xlu0 %v3877_v61, %s4090_s28  ;;  %v2606_v61 = vsub.f32 1.0, %v5164_v4 }
0x12bf   :  { %v3879_v59 = vpop.eup %3878  ;;  %3888 = vtanh.f32 %v2594_v13  ;;  %v2651_v13 = vmul.f32 %v5153_v47, %v5078_v1 }
0x12c0   :  { %2621 = vrot.lane.b32.xlu1 %v3879_v59, %s4090_s28 }
0x12c1   :  { %v3881_v5 = vpop.eup %3880 }
0x12c2   :  { %2625 = vrot.lane.b32.xlu0 %v3881_v5, %s4090_s28 }
0x12c3   :  { %v3883_v39 = vpop.eup %3882 }
0x12c4   :  { %2627 = vrot.lane.b32.xlu1 %v3883_v39, %s4090_s28 }
0x12c5   :  { %v3885_v48 = vpop.eup %3884 }
0x12c6   :  { %2629 = vrot.lane.b32.xlu0 %v3885_v48, %s4090_s28  ;;  %v2654_v48 = vmul.f32 %v5164_v4, %v5081_v41  ;;  %v2656_v4 = vmul.f32 %v5172_v43, %v5097_v50 }
0x12c7   :  { %v3887_v23 = vpop.eup %3886 }
0x12c8   :  { %2631 = vrot.lane.b32.xlu1 %v3887_v23, %s4090_s28  ;;  %v2607_v23 = vsub.f32 1.0, %v5168_v3 }
0x12c9   :  { %v3889_v18 = vpop.eup %3888 }
0x12ca   :  { %2633 = vrot.lane.b32.xlu0 %v3889_v18, %s4090_s28 }
0x132e   :  { %v2620_v0 = vpop.permute.xlu1 %2619 }
0x132f   :  { %v2643_v28 = vmul.f32 %v2620_v0, %v2603_v11  ;;  %v2608_v0 = vsub.f32 1.0, %v5172_v43 }
0x1330   :  { %v2624_v40 = vpop.permute.xlu0 %2623 }
0x1331   :  { %v2645_v30 = vmul.f32 %v2624_v40, %v2605_v54  ;;  %v5221_v54 = vadd.f32 %v2651_v13, %v2643_v28  ;;  %v2610_v13 = vsub.f32 1.0, %v5180_v2 }
0x1332   :  { %v2622_v14 = vpop.permute.xlu1 %2621 }
0x1333   :  { %v2644_v44 = vmul.f32 %v2622_v14, %v2604_v8  ;;  %v5211_v59 = vadd.f32 %v2653_v25, %v2645_v30  ;;  %v2609_v25 = vsub.f32 1.0, %v5176_v24 }
0x1334   :  { %v2626_v5 = vpop.permute.xlu0 %2625 }
0x1335   :  { %v5213_v39 = vadd.f32 %v2652_v21, %v2644_v44  ;;  %v2646_v51 = vmul.f32 %v2626_v5, %v2606_v61  ;;  %v2717_v30 = vrot.slane %v5211_v59, 6  ;;  %v2657_v44 = vmul.f32 %v5176_v24, %v5103_v56 }
0x1336   :  { %v2628_v18 = vpop.permute.xlu1 %2627 }
0x1337   :  { %v2715_v47 = vrot.slane %v5213_v39, 7  ;;  %v5224_v40 = vadd.f32 %v2654_v48, %v2646_v51  ;;  %v2647_v11 = vmul.f32 %v2628_v18, %v2607_v23 }
0x1338   :  { %v2630_v8 = vpop.permute.xlu0 %2629 }
0x1339   :  { %v2716_v3 = vsel %vm483_vm2, %v2715_v47, %v5221_v54  ;;  %v2719_v14 = vrot.slane %v5224_v40, 5  ;;  %v5233_v28 = vadd.f32 %v2655_v37, %v2647_v11  ;;  %v2648_v21 = vmul.f32 %v2630_v8, %v2608_v0 }
0x133a   :  { %v2632_v61 = vpop.permute.xlu1 %2631  ;;  %v2718_v5 = vsel %vm486_vm3, %v2717_v30, %v2716_v3  ;;  %v2658_v37 = vmul.f32 %v5180_v2, %v5107_v29 }
0x133b   :  { %v2721_v43 = vrot.slane %v5233_v28, 4  ;;  %v5240_v48 = vadd.f32 %v2656_v4, %v2648_v21  ;;  %v2649_v51 = vmul.f32 %v2632_v61, %v2609_v25  ;;  %v2720_v23 = vsel %vm489_vm4, %v2719_v14, %v2718_v5 }
0x133c   :  { %v2634_v18 = vpop.permute.xlu0 %2633 }
0x133d   :  { %v2723_v0 = vrot.slane %v5240_v48, 3  ;;  %v5246_v47 = vadd.f32 %v2657_v44, %v2649_v51  ;;  %v2650_v24 = vmul.f32 %v2634_v18, %v2610_v13  ;;  %v2722_v11 = vsel %vm492_vm5, %v2721_v43, %v2720_v23  ;;  %v5270_v18 = vld [vmem:[#allocation4 + $0x7] sm:$0x1] }
0x133f   :  { %v2725_v30 = vrot.slane %v5246_v47, 2  ;;  %v5250_v8 = vadd.f32 %v2658_v37, %v2650_v24  ;;  %v2724_v4 = vsel %vm495_vm6, %v2723_v0, %v2722_v11  ;;  %v5272_v24 = vld [vmem:[#allocation4 + $0x17] sm:$0x1] }
0x1341   :  { %v2726_v25 = vsel %vm498_vm7, %v2725_v30, %v2724_v4  ;;  %v2727_v3 = vrot.slane %v5250_v8, 1  ;;  %v5275_v4 = vld [vmem:[#allocation4 + $0xf] sm:$0x1] }
0x1343   :  { %v2728_v2 = vsel %vm501_vm8, %v2727_v3, %v2726_v25 }
0x1344   :  { %2729 = vrot.lane.b32.xlu1 %v2728_v2, %s4090_s28  ;;  %v5278_v2 = vld [vmem:[#allocation4 + $0x1f] sm:$0x1] }
0x13b6   :  { %v5257_v14 = vpop.permute.xlu1 %2729 }
0x13b7   :  { %3470 = vmatmul.mubr.msk.f32.vlgmr.msra.gmra.mrb[6].mxu1 %vm76_vm0, %v5257_v14 }
0x148a   :  { %v2809_v21 = vpop.f32.mrb[6].mxu1 }
0x148b   :  { %v3471_v44 = vpop.f32.mrb[7].mxu1  ;;  %v2885_v61 = vadd.f32 %v2809_v21, %v4233_v12  ;;  %v2815_v0 = vrot.slane %v2809_v21, 2  ;;  %v2814_v11 = vrot.slane %v2809_v21, 1  ;;  %v2829_v30 = vadd.f32 %v2809_v21, %v5270_v18 }
0x148c   :  { %v2816_v25 = vrot.slane %v2809_v21, 3  ;;  %v2817_v44 = vrot.slane %v2809_v21, 4  ;;  %v2820_v41 = vrot.slane %v2809_v21, 7 }
0x148d   :  { %2894 = vrot.lane.b32.xlu0 %v2885_v61, %s4088_s27  ;;  %v2888_v13 = vrot.slane %v2885_v61, 2  ;;  %v2887_v5 = vrot.slane %v2885_v61, 1  ;;  %v2889_v43 = vrot.slane %v2885_v61, 3  ;;  %v2890_v51 = vrot.slane %v2885_v61, 4 }
0x148e   :  { %v2891_v23 = vrot.slane %v2885_v61, 5  ;;  %v2892_v37 = vrot.slane %v2885_v61, 6  ;;  %v2893_v12 = vrot.slane %v2885_v61, 7  ;;  %v2831_v3 = vadd.f32 %v2815_v0, %v5272_v24  ;;  %v5287_v0 = vld [vmem:[#allocation4 + $0x37] sm:$0x1] }
0x148f   :  { %2898 = vrot.lane.b32.xlu1 %v2888_v13, %s4088_s27  ;;  %v2830_v61 = vadd.f32 %v2814_v11, %v5275_v4  ;;  %v3328_v13 = vmul.f32 -1.442695, %v2829_v30  ;;  %v5290_v30 = vld [vmem:[#allocation4 + $0x3f] sm:$0x1] }
0x1491   :  { %2896 = vrot.lane.b32.xlu0 %v2887_v5, %s4088_s27  ;;  %v5281_v5 = vld [vmem:[#allocation4 + $0x27] sm:$0x1]  ;;  %3890 = vpow2.f32 %v3328_v13  ;;  %v3329_v50 = vmul.f32 -1.442695, %v2830_v61 }
0x1492   :  { %v2833_v29 = vadd.f32 %v2817_v44, %v5281_v5 }
0x1493   :  { %2900 = vrot.lane.b32.xlu1 %v2889_v43, %s4088_s27  ;;  %v2818_v43 = vrot.slane %v2809_v21, 5 }
0x1495   :  { %2902 = vrot.lane.b32.xlu0 %v2890_v51, %s4088_s27  ;;  %v2832_v51 = vadd.f32 %v2816_v25, %v5278_v2  ;;  %v3332_v25 = vmul.f32 -1.442695, %v2833_v29 }
0x1497   :  { %2904 = vrot.lane.b32.xlu1 %v2891_v23, %s4088_s27  ;;  %v3330_v23 = vmul.f32 -1.442695, %v2831_v3  ;;  %v3331_v11 = vmul.f32 -1.442695, %v2832_v51  ;;  %v2836_v3 = vadd.f32 %v2820_v41, %v5290_v30 }
0x1499   :  { %2906 = vrot.lane.b32.xlu0 %v2892_v37, %s4088_s27  ;;  %v5284_v37 = vld [vmem:[#allocation4 + $0x2f] sm:$0x1]  ;;  %3892 = vpow2.f32 %v3330_v23  ;;  %v3335_v13 = vmul.f32 -1.442695, %v2836_v3 }
0x149a   :  { %v2834_v46 = vadd.f32 %v2818_v43, %v5284_v37  ;;  %3894 = vpow2.f32 %v3329_v50 }
0x149b   :  { %2908 = vrot.lane.b32.xlu1 %v2893_v12, %s4088_s27  ;;  %v2819_v12 = vrot.slane %v2809_v21, 6  ;;  %3896 = vpow2.f32 %v3331_v11  ;;  %v3891_v61 = vpop.eup %3890 }
0x149c   :  { %v3333_v42 = vmul.f32 -1.442695, %v2834_v46  ;;  %3898 = vpow2.f32 %v3332_v25  ;;  %v2861_v43 = vadd.f32 1.0, %v3891_v61 }
0x149d   :  { %v2835_v55 = vadd.f32 %v2819_v12, %v5287_v0 }
0x149e   :  { %3900 = vpow2.f32 %v3333_v42 }
0x149f   :  { %v3334_v44 = vmul.f32 -1.442695, %v2835_v55 }
0x14a1   :  { %3902 = vpow2.f32 %v3334_v44 }
0x14a2   :  { %3904 = vpow2.f32 %v3335_v13 }
0x14a3   :  { %v3893_v21 = vpop.eup %3892  ;;  %3906 = vrcp.f32 %v2861_v43 }
0x14a4   :  { %v3895_v23 = vpop.eup %3894  ;;  %v2863_v51 = vadd.f32 1.0, %v3893_v21 }
0x14a5   :  { %v3897_v56 = vpop.eup %3896  ;;  %v2862_v12 = vadd.f32 1.0, %v3895_v23 }
0x14a6   :  { %v3899_v50 = vpop.eup %3898  ;;  %3908 = vrcp.f32 %v2863_v51  ;;  %v2864_v29 = vadd.f32 1.0, %v3897_v56 }
0x14a7   :  { %3910 = vrcp.f32 %v2862_v12  ;;  %v2865_v46 = vadd.f32 1.0, %v3899_v50 }
0x14a8   :  { %v3901_v41 = vpop.eup %3900  ;;  %3912 = vrcp.f32 %v2864_v29 }
0x14a9   :  { %v2866_v55 = vadd.f32 1.0, %v3901_v41  ;;  %3914 = vrcp.f32 %v2865_v46 }
0x14ab   :  { %v3903_v11 = vpop.eup %3902  ;;  %3916 = vrcp.f32 %v2866_v55 }
0x14ac   :  { %v3905_v42 = vpop.eup %3904  ;;  %v2867_v25 = vadd.f32 1.0, %v3903_v11 }
0x14ad   :  { %v5294_v3 = vpop.eup %3906  ;;  %v2868_v61 = vadd.f32 1.0, %v3905_v42 }
0x14ae   :  { %3918 = vrcp.f32 %v2867_v25 }
0x14af   :  { %3920 = vrcp.f32 %v2868_v61 }
0x14b0   :  { %v5297_v21 = vpop.eup %3908 }
0x14b1   :  { %v5301_v23 = vpop.eup %3910 }
0x14b2   :  { %v5305_v50 = vpop.eup %3912 }
0x14b3   :  { %v5309_v46 = vpop.eup %3914 }
0x14b5   :  { %v5313_v42 = vpop.eup %3916 }
0x14b8   :  { %v5317_v61 = vpop.eup %3918 }
0x14ff   :  { %v2895_v44 = vpop.permute.xlu0 %2894 }
0x1500   :  { %v2918_v13 = vmul.f32 %v5294_v3, %v2895_v44 }
0x1501   :  { %v2899_v43 = vpop.permute.xlu1 %2898 }
0x1502   :  { %v2920_v56 = vmul.f32 %v5297_v21, %v2899_v43  ;;  %2934 = vrot.lane.b32.xlu0 %v2918_v13, %s4088_s27 }
0x1503   :  { %v2897_v51 = vpop.permute.xlu0 %2896 }
0x1504   :  { %v2919_v12 = vmul.f32 %v5301_v23, %v2897_v51  ;;  %2938 = vrot.lane.b32.xlu1 %v2920_v56, %s4088_s27  ;;  %v5321_v56 = vpop.eup %3920 }
0x1505   :  { %v2901_v29 = vpop.permute.xlu1 %2900 }
0x1506   :  { %v2921_v41 = vmul.f32 %v5305_v50, %v2901_v29  ;;  %2936 = vrot.lane.b32.xlu0 %v2919_v12, %s4088_s27  ;;  %v5707_v29 = vmov 0  }
0x1507   :  { %v2903_v11 = vpop.permute.xlu0 %2902  ;;  %3552 = vset.pattern.permute.xlu0 %v5707_v29  ;;  %3553 = vset.pattern.permute.xlu1 %v5707_v29 }
0x1508   :  { %v2922_v55 = vmul.f32 %v5309_v46, %v2903_v11  ;;  %2940 = vrot.lane.b32.xlu1 %v2921_v41, %s4088_s27 }
0x1509   :  { %v2905_v25 = vpop.permute.xlu1 %2904 }
0x150a   :  { %v2923_v44 = vmul.f32 %v5313_v42, %v2905_v25  ;;  %2942 = vrot.lane.b32.xlu0 %v2922_v55, %s4088_s27 }
0x150b   :  { %v2907_v13 = vpop.permute.xlu0 %2906 }
0x150c   :  { %v2924_v43 = vmul.f32 %v5317_v61, %v2907_v13  ;;  %2944 = vrot.lane.b32.xlu1 %v2923_v44, %s4088_s27 }
0x150d   :  { %v2909_v51 = vpop.permute.xlu1 %2908 }
0x150e   :  { %v2925_v12 = vmul.f32 %v5321_v56, %v2909_v51  ;;  %2946 = vrot.lane.b32.xlu0 %v2924_v43, %s4088_s27 }
0x1510   :  { %2948 = vrot.lane.b32.xlu1 %v2925_v12, %s4088_s27 }
0x1574   :  { %v2935_v41 = vpop.permute.xlu0 %2934 }
0x1575   :  { %v2958_v11 = vadd.f32 %v2935_v41, %v5270_v18 }
0x1576   :  { %v2939_v55 = vpop.permute.xlu1 %2938 }
0x1577   :  { %3922 = vtanh.f32 %v2958_v11  ;;  %v2960_v25 = vadd.f32 %v2939_v55, %v5272_v24 }
0x1578   :  { %v2937_v44 = vpop.permute.xlu0 %2936 }
0x1579   :  { %3924 = vtanh.f32 %v2960_v25  ;;  %v2959_v13 = vadd.f32 %v2937_v44, %v5275_v4  ;;  %v5737_v44 = vmov 0  }
0x157a   :  { %v2941_v51 = vpop.permute.xlu1 %2940 }
0x157b   :  { %3926 = vtanh.f32 %v2959_v13  ;;  %v2961_v43 = vadd.f32 %v2941_v51, %v5278_v2 }
0x157c   :  { %v2943_v12 = vpop.permute.xlu0 %2942 }
0x157d   :  { %3928 = vtanh.f32 %v2961_v43  ;;  %v2962_v53 = vadd.f32 %v2943_v12, %v5281_v5 }
0x157e   :  { %v2945_v29 = vpop.permute.xlu1 %2944 }
0x157f   :  { %3930 = vtanh.f32 %v2962_v53  ;;  %v2963_v18 = vadd.f32 %v2945_v29, %v5284_v37  ;;  %v84_v37 = vld [vmem:[%s5670_s3] sm:$0xff] }
0x1580   :  { %v2947_v41 = vpop.permute.xlu0 %2946  ;;  %vm476_vm9 = vcmp.eq.s32.totalorder %v84_v37, 0  ;;  %vm854_vm10 = vcmp.eq.s32.totalorder %v84_v37, 1  ;;  %vm1596_vm11 = vcmp.eq.s32.totalorder %v84_v37, 3  ;;  %vm1225_vm12 = vcmp.eq.s32.totalorder %v84_v37, 2 }
0x1581   :  { %v3923_v11 = vpop.eup %3922  ;;  %3932 = vtanh.f32 %v2963_v18  ;;  %v2964_v24 = vadd.f32 %v2947_v41, %v5287_v0  ;;  %v477_v13 = vsel %vm476_vm9, 1, %v5737_v44  ;;  %v855_v51 = vsel %vm854_vm10, 1, %v5737_v44 }
0x1582   :  { %v2949_v55 = vpop.permute.xlu1 %2948  ;;  %2990 = vrot.lane.b32.xlu0 %v3923_v11, %s4090_s28  ;;  %v1597_v43 = vsel %vm1596_vm11, 1, %v5737_v44  ;;  %vm2338_vm13 = vcmp.eq.s32.totalorder %v84_v37, 5  ;;  %v1226_v12 = vsel %vm1225_vm12, 1, %v5737_v44  ;;  %vm1967_vm14 = vcmp.eq.s32.totalorder %v84_v37, 4 }
0x1583   :  { %v3925_v4 = vpop.eup %3924  ;;  %3934 = vtanh.f32 %v2964_v24  ;;  %v2965_v2 = vadd.f32 %v2949_v55, %v5290_v30  ;;  %v2339_v18 = vsel %vm2338_vm13, 1, %v5737_v44  ;;  %vm3080_vm15 = vcmp.eq.s32.totalorder %v84_v37, 7 }
0x1584   :  { %2994 = vrot.lane.b32.xlu1 %v3925_v4, %s4090_s28  ;;  %v1968_v41 = vsel %vm1967_vm14, 1, %v5737_v44  ;;  %vm2709_vm1 = vcmp.eq.s32.totalorder %v84_v37, 6  ;;  %v3081_v11 = vsel %vm3080_vm15, 1, %v5737_v44  ;;  %v2976_v4 = vsub.f32 1.0, %v5297_v21 }
0x1585   :  { %v3927_v25 = vpop.eup %3926  ;;  %3936 = vtanh.f32 %v2965_v2  ;;  %v2710_v24 = vsel %vm2709_vm1, 1, %v5737_v44  ;;  %vm466_vm10 = vcmask 253952  }
0x1586   :  { %2992 = vrot.lane.b32.xlu0 %v3927_v25, %s4090_s28  ;;  %v2974_v25 = vsub.f32 1.0, %v5294_v3 }
0x1587   :  { %v3929_v53 = vpop.eup %3928 }
0x1588   :  { %2996 = vrot.lane.b32.xlu1 %v3929_v53, %s4090_s28 }
0x1589   :  { %v3931_v5 = vpop.eup %3930 }
0x158a   :  { %2998 = vrot.lane.b32.xlu0 %v3931_v5, %s4090_s28  ;;  %v2975_v5 = vsub.f32 1.0, %v5301_v23 }
0x158b   :  { %v3933_v0 = vpop.eup %3932 }
0x158c   :  { %3000 = vrot.lane.b32.xlu1 %v3933_v0, %s4090_s28  ;;  %v3024_v0 = vmul.f32 %v5297_v21, %v5211_v59 }
0x158d   :  { %v3935_v30 = vpop.eup %3934 }
0x158e   :  { %3002 = vrot.lane.b32.xlu0 %v3935_v30, %s4090_s28 }
0x158f   :  { %v3937_v29 = vpop.eup %3936 }
0x1590   :  { %3004 = vrot.lane.b32.xlu1 %v3937_v29, %s4090_s28  ;;  %v3023_v29 = vmul.f32 %v5301_v23, %v5213_v39  ;;  %v3026_v23 = vmul.f32 %v5309_v46, %v5233_v28 }
0x1592   :  { %479 = vperm.xlu0 %3552, %v477_v13   ;;  %v2977_v13 = vsub.f32 1.0, %v5305_v50 }
0x1594   :  { %857 = vperm.xlu1 %3553, %v855_v51   ;;  %v3022_v51 = vmul.f32 %v5294_v3, %v5221_v54 }
0x1596   :  { %1599 = vperm.xlu0 %3552, %v1597_v43  }
0x1598   :  { %1228 = vperm.xlu1 %3553, %v1226_v12  }
0x159a   :  { %2341 = vperm.xlu0 %3552, %v2339_v18  }
0x159c   :  { %1970 = vperm.xlu1 %3553, %v1968_v41   ;;  %v3025_v41 = vmul.f32 %v5305_v50, %v5224_v40  ;;  %v3027_v50 = vmul.f32 %v5313_v42, %v5240_v48 }
0x159e   :  { %3083 = vperm.xlu0 %3552, %v3081_v11   ;;  %v2978_v11 = vsub.f32 1.0, %v5309_v46 }
0x15a0   :  { %2712 = vperm.xlu1 %3553, %v2710_v24  }
0x15f4   :  { %v2991_v55 = vpop.permute.xlu0 %2990 }
0x15f5   :  { %v3014_v30 = vmul.f32 %v2991_v55, %v2974_v25  ;;  %v2979_v55 = vsub.f32 1.0, %v5313_v42 }
0x15f6   :  { %v2995_v2 = vpop.permute.xlu1 %2994 }
0x15f7   :  { %v3016_v53 = vmul.f32 %v2995_v2, %v2976_v4  ;;  %v5375_v4 = vadd.f32 %v3022_v51, %v3014_v30 }
0x15f8   :  { %v2993_v37 = vpop.permute.xlu0 %2992 }
0x15f9   :  { %v3015_v44 = vmul.f32 %v2993_v37, %v2975_v5  ;;  %v5365_v43 = vadd.f32 %v3024_v0, %v3016_v53  ;;  %v2980_v0 = vsub.f32 1.0, %v5317_v61 }
0x15fa   :  { %v2997_v12 = vpop.permute.xlu1 %2996 }
0x15fb   :  { %v5367_v18 = vadd.f32 %v3023_v29, %v3015_v44  ;;  %v3017_v21 = vmul.f32 %v2997_v12, %v2977_v13  ;;  %v3088_v53 = vrot.slane %v5365_v43, 6  ;;  %v3028_v13 = vmul.f32 %v5317_v61, %v5246_v47 }
0x15fc   :  { %v2999_v24 = vpop.permute.xlu0 %2998  ;;  %v2981_v12 = vsub.f32 1.0, %v5321_v56 }
0x15fd   :  { %v3086_v3 = vrot.slane %v5367_v18, 7  ;;  %v5378_v2 = vadd.f32 %v3025_v41, %v3017_v21  ;;  %v3018_v25 = vmul.f32 %v2999_v24, %v2978_v11 }
0x15fe   :  { %v3001_v5 = vpop.permute.xlu1 %3000 }
0x15ff   :  { %v3087_v46 = vsel %vm483_vm2, %v3086_v3, %v5375_v4  ;;  %v3090_v37 = vrot.slane %v5378_v2, 5  ;;  %v5387_v30 = vadd.f32 %v3026_v23, %v3018_v25  ;;  %v3019_v29 = vmul.f32 %v3001_v5, %v2979_v55 }
0x1600   :  { %v3089_v44 = vsel %vm486_vm3, %v3088_v53, %v3087_v46  ;;  %v3003_v51 = vpop.permute.xlu0 %3002  ;;  %v3029_v23 = vmul.f32 %v5321_v56, %v5250_v8 }
0x1601   :  { %v3091_v42 = vsel %vm489_vm4, %v3090_v37, %v3089_v44  ;;  %v3092_v41 = vrot.slane %v5387_v30, 4  ;;  %v5395_v21 = vadd.f32 %v3027_v50, %v3019_v29  ;;  %v3020_v11 = vmul.f32 %v3003_v51, %v2980_v0 }
0x1602   :  { %v3005_v24 = vpop.permute.xlu1 %3004 }
0x1603   :  { %v3093_v55 = vsel %vm492_vm5, %v3092_v41, %v3091_v42  ;;  %v3094_v3 = vrot.slane %v5395_v21, 3  ;;  %v5401_v25 = vadd.f32 %v3028_v13, %v3020_v11  ;;  %v3021_v61 = vmul.f32 %v3005_v24, %v2981_v12  ;;  %v87_v13 = vld [vmem:[#allocation3] sm:$0xff] }
0x1605   :  { %v3096_v53 = vrot.slane %v5401_v25, 2  ;;  %v5404_v5 = vadd.f32 %v3029_v23, %v3021_v61  ;;  %v3095_v46 = vsel %vm495_vm6, %v3094_v3, %v3093_v55 }
0x1607   :  { %v3098_v50 = vrot.slane %v5404_v5, 1  ;;  %v3097_v0 = vsel %vm498_vm7, %v3096_v53, %v3095_v46 }
0x1609   :  { %v3099_v56 = vsel %vm501_vm8, %v3098_v50, %v3097_v0  ;;  %v5748_v50 = vld [vmem:[#allocation25_spill] sm:$0xff] }
0x160a   :  { %3100 = vrot.lane.b32.xlu1 %v3099_v56, %s4090_s28  ;;  %v5749_v56 = vld [vmem:[#allocation26_spill] sm:$0xff] }
0x1611   :  { %v480_v29 = vpop.permute.xlu0 %479 }
0x1612   :  { %vm481_vm2 = vcmp.eq.s32.totalorder %v480_v29, 1  ;;  %v5750_v29 = vld [vmem:[#allocation27_spill] sm:$0xff] }
0x1613   :  { %v858_v37 = vpop.permute.xlu1 %857  ;;  %v506_v12 = vsel %vm481_vm2, %v4380_v10, %v87_v13  ;;  %v5751_v13 = vld [vmem:[#allocation28_spill] sm:$0xff] }
0x1614   :  { %vm859_vm3 = vcmp.eq.s32.totalorder %v858_v37, 1 }
0x1615   :  { %v1600_v51 = vpop.permute.xlu0 %1599  ;;  %v877_v41 = vsel %vm859_vm3, %v4527_v35, %v506_v12  ;;  %v5752_v12 = vld [vmem:[#allocation29_spill] sm:$0xff] }
0x1616   :  { %vm1601_vm5 = vcmp.eq.s32.totalorder %v1600_v51, 1 }
0x1617   :  { %v1229_v44 = vpop.permute.xlu1 %1228 }
0x1618   :  { %vm1230_vm4 = vcmp.eq.s32.totalorder %v1229_v44, 1 }
0x1619   :  { %v1248_v11 = vsel %vm1230_vm4, %v4674_v62, %v877_v41  ;;  %v2342_v23 = vpop.permute.xlu0 %2341  ;;  %v5753_v41 = vld [vmem:[#allocation30_spill] sm:$0xff] }
0x161a   :  { %v1619_v55 = vsel %vm1601_vm5, %v4821_v9, %v1248_v11  ;;  %vm2343_vm7 = vcmp.eq.s32.totalorder %v2342_v23, 1  ;;  %v5754_v23 = vld [vmem:[#allocation31_spill] sm:$0xff] }
0x161b   :  { %v1971_v42 = vpop.permute.xlu1 %1970 }
0x161c   :  { %vm1972_vm6 = vcmp.eq.s32.totalorder %v1971_v42, 1 }
0x161d   :  { %v1990_v3 = vsel %vm1972_vm6, %v4968_v19, %v1619_v55  ;;  %v3084_v61 = vpop.permute.xlu0 %3083  ;;  %v5755_v55 = vld [vmem:[#allocation32_spill] sm:$0xff] }
0x161e   :  { %v2361_v10 = vsel %vm2343_vm7, %v5114_v27, %v1990_v3  ;;  %vm3085_vm9 = vcmp.eq.s32.totalorder %v3084_v61, 1  ;;  %v3143_v27 = vld [vmem:[#allocation9 + $0x18] sm:$0xff]  ;;  %v5756_v61 = vld [vmem:[#allocation33_spill] sm:$0xff] }
0x161f   :  { %v2713_v24 = vpop.permute.xlu1 %2712 }
0x1620   :  { %vm2714_vm8 = vcmp.eq.s32.totalorder %v2713_v24, 1 }
0x1621   :  { %v2732_v53 = vsel %vm2714_vm8, %v5257_v14, %v2361_v10 }
0x167c   :  { %v3101_v46 = vpop.permute.xlu1 %3100 }
0x167d   :  { %v3103_v35 = vsel %vm3085_vm9, %v3101_v46, %v2732_v53  ;;  %3104 = vst.msk [vmem:[#allocation2] sm:$0xff] %vm76_vm0, %v3101_v46  ;;  %3109 = vst.msk [vmem:[#allocation13] sm:$0xff] %vm76_vm0, %v3101_v46  ;;  %v5757_v53 = vld [vmem:[#allocation34_spill] sm:$0xff] }
0x167e   :  { %3105 = vst.msk [vmem:[#allocation3] sm:$0xff] %vm76_vm0, %v3103_v35  ;;  %v3110_v62 = vsel %vm76_vm0, %v3103_v35, 0.0 }
0x167f   :  { %3111 = vadd.xlane.f32.xlu0 %v3110_v62 }
0x1695   :  { %442 = vrot.lane.b32.xlu0 %v4356_v22, %s4090_s28 }
0x1699   :  { %446 = vrot.lane.b32.xlu0 %v4342_v45, %s4090_s28  ;;  %v5738_v45 = vld [vmem:[#allocation40_spill] sm:$0xff] }
0x169d   :  { %450 = vrot.lane.b32.xlu0 %v4353_v57, %s4090_s28  ;;  %v5739_v57 = vld [vmem:[#allocation42_spill] sm:$0xff] }
0x16a1   :  { %454 = vrot.lane.b32.xlu0 %v4363_v60, %s4090_s28 }
0x16a5   :  { %820 = vrot.lane.b32.xlu0 %v4491_v33, %s4090_s28 }
0x16a9   :  { %824 = vrot.lane.b32.xlu0 %v4481_v58, %s4090_s28 }
0x16ad   :  { %828 = vrot.lane.b32.xlu0 %v4503_v38, %s4090_s28 }
0x16b1   :  { %832 = vrot.lane.b32.xlu0 %v4516_v20, %s4090_s28 }
0x16b5   :  { %1191 = vrot.lane.b32.xlu0 %v4638_v32, %s4090_s28 }
0x16b9   :  { %1195 = vrot.lane.b32.xlu0 %v4628_v31, %s4090_s28 }
0x16bd   :  { %1199 = vrot.lane.b32.xlu0 %v4650_v16, %s4090_s28 }
0x16c1   :  { %1203 = vrot.lane.b32.xlu0 %v4663_v49, %s4090_s28 }
0x16c5   :  { %1562 = vrot.lane.b32.xlu0 %v4785_v15, %s4090_s28  ;;  %v5740_v15 = vld [vmem:[#allocation18_spill] sm:$0xff] }
0x16c9   :  { %1566 = vrot.lane.b32.xlu0 %v4775_v36, %s4090_s28 }
0x16cd   :  { %1570 = vrot.lane.b32.xlu0 %v4797_v34, %s4090_s28 }
0x16d1   :  { %1574 = vrot.lane.b32.xlu0 %v4810_v7, %s4090_s28  ;;  %v5741_v7 = vld [vmem:[#allocation19_spill] sm:$0xff] }
0x16d5   :  { %1933 = vrot.lane.b32.xlu0 %v4932_v26, %s4090_s28  ;;  %v3140_v26 = vld [vmem:[#allocation9] sm:$0xff] }
0x16d9   :  { %1937 = vrot.lane.b32.xlu0 %v4922_v6, %s4090_s28  ;;  %v5742_v6 = vld [vmem:[#allocation20_spill] sm:$0xff] }
0x16dd   :  { %1941 = vrot.lane.b32.xlu0 %v4944_v52, %s4090_s28  ;;  %v3141_v52 = vld [vmem:[#allocation9 + $0x8] sm:$0xff] }
0x16de   :  { %v3532_v19 = vpack.c.bf16 %v3141_v52, %v3140_v26 }
0x16e0   :  { %3533 = vmatpush3.bf16.msra.mxu0 %v3532_v19 }
0x16e1   :  { %1945 = vrot.lane.b32.xlu0 %v4957_v17, %s4090_s28 }
0x16e5   :  { %2304 = vrot.lane.b32.xlu0 %v5078_v1, %s4090_s28  ;;  %v3142_v1 = vld [vmem:[#allocation9 + $0x10] sm:$0xff] }
0x16e9   :  { %2308 = vrot.lane.b32.xlu0 %v5068_v63, %s4090_s28  ;;  %v5743_v63 = vld [vmem:[#allocation21_spill] sm:$0xff] }
0x16ed   :  { %2312 = vrot.lane.b32.xlu0 %v5738_v45, %s4090_s28  ;;  %v5759_v45 = vld [vmem:[#allocation36_spill] sm:$0xff] }
0x16f1   :  { %2316 = vrot.lane.b32.xlu0 %v5739_v57, %s4090_s28 }
0x16f5   :  { %2675 = vrot.lane.b32.xlu0 %v5221_v54, %s4090_s28  ;;  %v3535_v54 = vpack.c.bf16 %v3143_v27, %v3142_v1 }
0x16f9   :  { %2679 = vrot.lane.b32.xlu0 %v5211_v59, %s4090_s28  ;;  %v5744_v59 = vmov 0.0|0.0  }
0x16fa   :  { %3534 = vmatprep.subr.bf16.mxu0 %v5744_v59 }
0x16fb   :  { %3536 = vmatpush3.bf16.msra.mxu0 %v3535_v54 }
0x16fd   :  { %2683 = vrot.lane.b32.xlu0 %v5233_v28, %s4090_s28 }
0x1701   :  { %2687 = vrot.lane.b32.xlu0 %v5246_v47, %s4090_s28  ;;  %v5745_v47 = vld [vmem:[#allocation22_spill] sm:$0xff] }
0x1705   :  { %3046 = vrot.lane.b32.xlu0 %v5375_v4, %s4090_s28 }
0x1709   :  { %3050 = vrot.lane.b32.xlu0 %v5365_v43, %s4090_s28  ;;  %v5746_v43 = vld [vmem:[#allocation23_spill] sm:$0xff] }
0x170c   :  { %v3112_v22 = vpop.xlane.xlu0 %3111 }
0x170d   :  { %v3114_v60 = vmul.f32 0.03125, %v3112_v22  ;;  %3054 = vrot.lane.b32.xlu0 %v5387_v30, %s4090_s28  ;;  %v5747_v30 = vld [vmem:[#allocation24_spill] sm:$0xff]  ;;  %v5760_v22 = vld [vmem:[#allocation37_spill] sm:$0xff] }
0x170f   :  { %v5484_v58 = vsub.f32 %v3103_v35, %v3114_v60  ;;  %v5758_v35 = vld [vmem:[#allocation35_spill] sm:$0xff] }
0x1710   :  { %v443_v33 = vpop.permute.xlu0 %442 }
0x1711   :  { %467 = vst.msk [vmem:[#allocation11] sm:$0x1] %vm466_vm10, %v443_v33  ;;  %3058 = vrot.lane.b32.xlu0 %v5401_v25, %s4090_s28  ;;  %v3116_v38 = vmul.f32 %v5484_v58, %v5484_v58  ;;  %v5761_v33 = vld [vmem:[#allocation38_spill] sm:$0xff] }
0x1713   :  { %v3117_v20 = vsel %vm76_vm0, %v3116_v38, 0.0 }
0x1714   :  { %3118 = vadd.xlane.f32.xlu1 %v3117_v20  ;;  %v447_v31 = vpop.permute.xlu0 %446  ;;  %v5762_v20 = vld [vmem:[#allocation39_spill] sm:$0xff] }
0x1715   :  { %469 = vst.msk [vmem:[#allocation11 + $0x10] sm:$0x1] %vm466_vm10, %v447_v31 }
0x1718   :  { %v451_v32 = vpop.permute.xlu0 %450 }
0x1719   :  { %471 = vst.msk [vmem:[#allocation11 + $0x20] sm:$0x1] %vm466_vm10, %v451_v32  ;;  %v5763_v32 = vld [vmem:[#allocation41_spill] sm:$0xff] }
0x171c   :  { %v455_v16 = vpop.permute.xlu0 %454 }
0x171d   :  { %473 = vst.msk [vmem:[#allocation11 + $0x30] sm:$0x1] %vm466_vm10, %v455_v16 }
0x1720   :  { %v821_v49 = vpop.permute.xlu0 %820 }
0x1721   :  { %844 = vst.msk [vmem:[#allocation11 + $0x1] sm:$0x1] %vm466_vm10, %v821_v49  ;;  %v5764_v49 = vld [vmem:[#allocation43_spill] sm:$0xff] }
0x1724   :  { %v825_v36 = vpop.permute.xlu0 %824 }
0x1725   :  { %846 = vst.msk [vmem:[#allocation11 + $0x11] sm:$0x1] %vm466_vm10, %v825_v36  ;;  %444 = vrot.lane.b32.xlu1 %v5740_v15, %s4090_s28 }
0x1728   :  { %v829_v34 = vpop.permute.xlu0 %828 }
0x1729   :  { %848 = vst.msk [vmem:[#allocation11 + $0x21] sm:$0x1] %vm466_vm10, %v829_v34  ;;  %448 = vrot.lane.b32.xlu1 %v5741_v7, %s4090_s28 }
0x172c   :  { %v833_v9 = vpop.permute.xlu0 %832 }
0x172d   :  { %850 = vst.msk [vmem:[#allocation11 + $0x31] sm:$0x1] %vm466_vm10, %v833_v9  ;;  %452 = vrot.lane.b32.xlu1 %v5742_v6, %s4090_s28  ;;  %v3337_v6 = vld [vmem:[%s5672_s5] ss:$0 sm:$0xff] }
0x1730   :  { %v1192_v17 = vpop.permute.xlu0 %1191 }
0x1731   :  { %1215 = vst.msk [vmem:[#allocation11 + $0x2] sm:$0x1] %vm466_vm10, %v1192_v17  ;;  %456 = vrot.lane.b32.xlu1 %v5743_v63, %s4090_s28 }
0x1734   :  { %v1196_v28 = vpop.permute.xlu0 %1195 }
0x1735   :  { %1217 = vst.msk [vmem:[#allocation11 + $0x12] sm:$0x1] %vm466_vm10, %v1196_v28  ;;  %822 = vrot.lane.b32.xlu1 %v5745_v47, %s4090_s28 }
0x1738   :  { %v1200_v14 = vpop.permute.xlu0 %1199 }
0x1739   :  { %1219 = vst.msk [vmem:[#allocation11 + $0x22] sm:$0x1] %vm466_vm10, %v1200_v14  ;;  %826 = vrot.lane.b32.xlu1 %v5746_v43, %s4090_s28 }
0x173c   :  { %v1204_v4 = vpop.permute.xlu0 %1203 }
0x173d   :  { %1221 = vst.msk [vmem:[#allocation11 + $0x32] sm:$0x1] %vm466_vm10, %v1204_v4  ;;  %830 = vrot.lane.b32.xlu1 %v5747_v30, %s4090_s28 }
0x1740   :  { %v1563_v25 = vpop.permute.xlu0 %1562 }
0x1741   :  { %1586 = vst.msk [vmem:[#allocation11 + $0x3] sm:$0x1] %vm466_vm10, %v1563_v25  ;;  %834 = vrot.lane.b32.xlu1 %v5748_v50, %s4090_s28 }
0x1744   :  { %v1567_v0 = vpop.permute.xlu0 %1566 }
0x1745   :  { %1588 = vst.msk [vmem:[#allocation11 + $0x13] sm:$0x1] %vm466_vm10, %v1567_v0  ;;  %1193 = vrot.lane.b32.xlu1 %v5749_v56, %s4090_s28 }
0x1748   :  { %v1571_v37 = vpop.permute.xlu0 %1570 }
0x1749   :  { %1590 = vst.msk [vmem:[#allocation11 + $0x23] sm:$0x1] %vm466_vm10, %v1571_v37  ;;  %1197 = vrot.lane.b32.xlu1 %v5750_v29, %s4090_s28 }
0x174c   :  { %v1575_v44 = vpop.permute.xlu0 %1574 }
0x174d   :  { %1592 = vst.msk [vmem:[#allocation11 + $0x33] sm:$0x1] %vm466_vm10, %v1575_v44  ;;  %1201 = vrot.lane.b32.xlu1 %v5751_v13, %s4090_s28 }
0x1750   :  { %v1934_v51 = vpop.permute.xlu0 %1933 }
0x1751   :  { %1957 = vst.msk [vmem:[#allocation11 + $0x4] sm:$0x1] %vm466_vm10, %v1934_v51  ;;  %1205 = vrot.lane.b32.xlu1 %v5752_v12, %s4090_s28 }
0x1754   :  { %v1938_v42 = vpop.permute.xlu0 %1937 }
0x1755   :  { %1959 = vst.msk [vmem:[#allocation11 + $0x14] sm:$0x1] %vm466_vm10, %v1938_v42  ;;  %1564 = vrot.lane.b32.xlu1 %v5753_v41, %s4090_s28 }
0x1758   :  { %v1942_v11 = vpop.permute.xlu0 %1941 }
0x1759   :  { %1961 = vst.msk [vmem:[#allocation11 + $0x24] sm:$0x1] %vm466_vm10, %v1942_v11  ;;  %1568 = vrot.lane.b32.xlu1 %v5754_v23, %s4090_s28 }
0x175c   :  { %v1946_v24 = vpop.permute.xlu0 %1945 }
0x175d   :  { %1963 = vst.msk [vmem:[#allocation11 + $0x34] sm:$0x1] %vm466_vm10, %v1946_v24  ;;  %1572 = vrot.lane.b32.xlu1 %v5755_v55, %s4090_s28 }
0x1760   :  { %v2305_v3 = vpop.permute.xlu0 %2304 }
0x1761   :  { %2328 = vst.msk [vmem:[#allocation11 + $0x5] sm:$0x1] %vm466_vm10, %v2305_v3  ;;  %1576 = vrot.lane.b32.xlu1 %v5756_v61, %s4090_s28 }
0x1764   :  { %v2309_v10 = vpop.permute.xlu0 %2308 }
0x1765   :  { %2330 = vst.msk [vmem:[#allocation11 + $0x15] sm:$0x1] %vm466_vm10, %v2309_v10  ;;  %1935 = vrot.lane.b32.xlu1 %v5757_v53, %s4090_s28 }
0x1768   :  { %v2313_v46 = vpop.permute.xlu0 %2312 }
0x1769   :  { %2332 = vst.msk [vmem:[#allocation11 + $0x25] sm:$0x1] %vm466_vm10, %v2313_v46  ;;  %1939 = vrot.lane.b32.xlu1 %v5758_v35, %s4090_s28 }
0x176c   :  { %v2317_v62 = vpop.permute.xlu0 %2316 }
0x176d   :  { %2334 = vst.msk [vmem:[#allocation11 + $0x35] sm:$0x1] %vm466_vm10, %v2317_v62  ;;  %1943 = vrot.lane.b32.xlu1 %v5759_v45, %s4090_s28 }
0x1770   :  { %v2676_v57 = vpop.permute.xlu0 %2675 }
0x1771   :  { %2699 = vst.msk [vmem:[#allocation11 + $0x6] sm:$0x1] %vm466_vm10, %v2676_v57  ;;  %1947 = vrot.lane.b32.xlu1 %v5760_v22, %s4090_s28 }
0x1774   :  { %v2680_v60 = vpop.permute.xlu0 %2679 }
0x1775   :  { %2701 = vst.msk [vmem:[#allocation11 + $0x16] sm:$0x1] %vm466_vm10, %v2680_v60  ;;  %2306 = vrot.lane.b32.xlu1 %v5761_v33, %s4090_s28 }
0x1778   :  { %v2684_v38 = vpop.permute.xlu0 %2683 }
0x1779   :  { %2703 = vst.msk [vmem:[#allocation11 + $0x26] sm:$0x1] %vm466_vm10, %v2684_v38  ;;  %2310 = vrot.lane.b32.xlu1 %v5762_v20, %s4090_s28 }
0x177c   :  { %v2688_v31 = vpop.permute.xlu0 %2687 }
0x177d   :  { %2705 = vst.msk [vmem:[#allocation11 + $0x36] sm:$0x1] %vm466_vm10, %v2688_v31  ;;  %2314 = vrot.lane.b32.xlu1 %v5763_v32, %s4090_s28 }
0x1780   :  { %v3047_v16 = vpop.permute.xlu0 %3046 }
0x1781   :  { %3070 = vst.msk [vmem:[#allocation11 + $0x7] sm:$0x1] %vm466_vm10, %v3047_v16  ;;  %2318 = vrot.lane.b32.xlu1 %v5764_v49, %s4090_s28 }
0x1784   :  { %v3051_v36 = vpop.permute.xlu0 %3050 }
0x1785   :  { %3072 = vst.msk [vmem:[#allocation11 + $0x17] sm:$0x1] %vm466_vm10, %v3051_v36  ;;  %2677 = vrot.lane.b32.xlu1 %v5213_v39, %s4090_s28 }
0x1788   :  { %v3055_v15 = vpop.permute.xlu0 %3054 }
0x1789   :  { %3074 = vst.msk [vmem:[#allocation11 + $0x27] sm:$0x1] %vm466_vm10, %v3055_v15  ;;  %2681 = vrot.lane.b32.xlu1 %v5224_v40, %s4090_s28 }
0x178c   :  { %v3059_v34 = vpop.permute.xlu0 %3058 }
0x178d   :  { %3076 = vst.msk [vmem:[#allocation11 + $0x37] sm:$0x1] %vm466_vm10, %v3059_v34  ;;  %2685 = vrot.lane.b32.xlu1 %v5240_v48, %s4090_s28 }
0x1791   :  { %2689 = vrot.lane.b32.xlu1 %v5250_v8, %s4090_s28 }
0x1795   :  { %3048 = vrot.lane.b32.xlu1 %v5367_v18, %s4090_s28 }
0x1799   :  { %3052 = vrot.lane.b32.xlu1 %v5378_v2, %s4090_s28  ;;  %v3336_v2 = vld [vmem:[%s5671_s4] ss:$0 sm:$0xff]  ;;  %s4092_s4 = smov [#allocation11]  }
0x179a   :  { %s3233_s5 = sshll.u32 %s4092_s4, 4  ;;  %s3234_s5 = int_to_ptr.vmem [resolvable:$true] %s3233_s5 }
0x179b   :  { %s4006_s15 = scalar_lea.vmem %s3234_s5, 1024  ;;  %p4011_p11 = scmp.lt.s32.totalorder %s3234_s5, %s3234_s5 }
0x179c   :  { %p4007_p10 = scmp.ne.s32.totalorder %s3234_s5, %s4006_s15  ;;  %p4012_p12 = scmp.lt.s32.totalorder %s4006_s15, %s4006_s15 }
0x179d   :  { %3056 = vrot.lane.b32.xlu1 %v5395_v21, %s4090_s28 }
0x179e   :  { %p4013_p13 = por %p4012_p12, %p4011_p11 }
0x17a0   :  { %p4014_p0 = pnand %p4013_p13, %p4007_p10 }
0x17a1   :  { %3060 = vrot.lane.b32.xlu1 %v5404_v5, %s4090_s28  ;;  %v3119_v39 = vpop.xlane.xlu1 %3118 }
0x17a2   :  { %v3120_v40 = vmul.f32 0.03125, %v3119_v39 }
0x17a4   :  { %v3121_v7 = vadd.f32 1e-05, %v3120_v40 }
0x17a5   :  { %v445_v9 = vpop.permute.xlu1 %444 }
0x17a6   :  { %3938 = vrsqrt.f32 %v3121_v7  ;;  %468 = vst.msk [vmem:[#allocation11 + $0x8] sm:$0x1] %vm466_vm10, %v445_v9 }
0x17a9   :  { %v449_v48 = vpop.permute.xlu1 %448 }
0x17aa   :  { %470 = vst.msk [vmem:[#allocation11 + $0x18] sm:$0x1] %vm466_vm10, %v449_v48 }
0x17ad   :  { %v453_v8 = vpop.permute.xlu1 %452 }
0x17ae   :  { %472 = vst.msk [vmem:[#allocation11 + $0x28] sm:$0x1] %vm466_vm10, %v453_v8 }
0x17b0   :  { %v3939_v18 = vpop.eup %3938 }
0x17b1   :  { %v3123_v21 = vmul.f32 %v3939_v18, %v5484_v58  ;;  %v457_v5 = vpop.permute.xlu1 %456 }
0x17b2   :  { %474 = vst.msk [vmem:[#allocation11 + $0x38] sm:$0x1] %vm466_vm10, %v457_v5 }
0x17b3   :  { %v3131_v26 = vmul.f32 %v3336_v2, %v3123_v21 }
0x17b5   :  { %v823_v52 = vpop.permute.xlu1 %822  ;;  %v3139_v17 = vadd.f32 %v3337_v6, %v3131_v26 }
0x17b6   :  { %845 = vst.msk [vmem:[#allocation11 + $0x9] sm:$0x1] %vm466_vm10, %v823_v52 }
0x17b7   :  { %3481 = vmatmul.mubr.msk.f32.vlgmr.msra.gmra.mrb[8].mxu0 %vm76_vm0, %v3139_v17 }
0x17b9   :  { %v827_v19 = vpop.permute.xlu1 %826 }
0x17ba   :  { %847 = vst.msk [vmem:[#allocation11 + $0x19] sm:$0x1] %vm466_vm10, %v827_v19 }
0x17bd   :  { %v831_v63 = vpop.permute.xlu1 %830 }
0x17be   :  { %849 = vst.msk [vmem:[#allocation11 + $0x29] sm:$0x1] %vm466_vm10, %v831_v63 }
0x17c1   :  { %v835_v58 = vpop.permute.xlu1 %834 }
0x17c2   :  { %851 = vst.msk [vmem:[#allocation11 + $0x39] sm:$0x1] %vm466_vm10, %v835_v58 }
0x17c5   :  { %v1194_v1 = vpop.permute.xlu1 %1193 }
0x17c6   :  { %1216 = vst.msk [vmem:[#allocation11 + $0xa] sm:$0x1] %vm466_vm10, %v1194_v1 }
0x17c9   :  { %v1198_v27 = vpop.permute.xlu1 %1197 }
0x17ca   :  { %1218 = vst.msk [vmem:[#allocation11 + $0x1a] sm:$0x1] %vm466_vm10, %v1198_v27 }
0x17cd   :  { %v1202_v59 = vpop.permute.xlu1 %1201 }
0x17ce   :  { %1220 = vst.msk [vmem:[#allocation11 + $0x2a] sm:$0x1] %vm466_vm10, %v1202_v59 }
0x17d1   :  { %v1206_v54 = vpop.permute.xlu1 %1205 }
0x17d2   :  { %1222 = vst.msk [vmem:[#allocation11 + $0x3a] sm:$0x1] %vm466_vm10, %v1206_v54 }
0x17d5   :  { %v1565_v28 = vpop.permute.xlu1 %1564 }
0x17d6   :  { %1587 = vst.msk [vmem:[#allocation11 + $0xb] sm:$0x1] %vm466_vm10, %v1565_v28 }
0x17d9   :  { %v1569_v47 = vpop.permute.xlu1 %1568 }
0x17da   :  { %1589 = vst.msk [vmem:[#allocation11 + $0x1b] sm:$0x1] %vm466_vm10, %v1569_v47 }
0x17dd   :  { %v1573_v14 = vpop.permute.xlu1 %1572 }
0x17de   :  { %1591 = vst.msk [vmem:[#allocation11 + $0x2b] sm:$0x1] %vm466_vm10, %v1573_v14 }
0x17e1   :  { %v1577_v43 = vpop.permute.xlu1 %1576 }
0x17e2   :  { %1593 = vst.msk [vmem:[#allocation11 + $0x3b] sm:$0x1] %vm466_vm10, %v1577_v43 }
0x17e5   :  { %v1936_v4 = vpop.permute.xlu1 %1935 }
0x17e6   :  { %1958 = vst.msk [vmem:[#allocation11 + $0xc] sm:$0x1] %vm466_vm10, %v1936_v4 }
0x17e9   :  { %v1940_v30 = vpop.permute.xlu1 %1939 }
0x17ea   :  { %1960 = vst.msk [vmem:[#allocation11 + $0x1c] sm:$0x1] %vm466_vm10, %v1940_v30 }
0x17ed   :  { %v1944_v25 = vpop.permute.xlu1 %1943 }
0x17ee   :  { %1962 = vst.msk [vmem:[#allocation11 + $0x2c] sm:$0x1] %vm466_vm10, %v1944_v25 }
0x17f1   :  { %v1948_v50 = vpop.permute.xlu1 %1947 }
0x17f2   :  { %1964 = vst.msk [vmem:[#allocation11 + $0x3c] sm:$0x1] %vm466_vm10, %v1948_v50 }
0x17f5   :  { %v2307_v0 = vpop.permute.xlu1 %2306 }
0x17f6   :  { %2329 = vst.msk [vmem:[#allocation11 + $0xd] sm:$0x1] %vm466_vm10, %v2307_v0 }
0x17f9   :  { %v2311_v56 = vpop.permute.xlu1 %2310 }
0x17fa   :  { %2331 = vst.msk [vmem:[#allocation11 + $0x1d] sm:$0x1] %vm466_vm10, %v2311_v56 }
0x17fd   :  { %v2315_v37 = vpop.permute.xlu1 %2314 }
0x17fe   :  { %2333 = vst.msk [vmem:[#allocation11 + $0x2d] sm:$0x1] %vm466_vm10, %v2315_v37 }
0x1801   :  { %v2319_v29 = vpop.permute.xlu1 %2318 }
0x1802   :  { %2335 = vst.msk [vmem:[#allocation11 + $0x3d] sm:$0x1] %vm466_vm10, %v2319_v29 }
0x1805   :  { %v2678_v44 = vpop.permute.xlu1 %2677 }
0x1806   :  { %2700 = vst.msk [vmem:[#allocation11 + $0xe] sm:$0x1] %vm466_vm10, %v2678_v44 }
0x1809   :  { %v2682_v13 = vpop.permute.xlu1 %2681 }
0x180a   :  { %2702 = vst.msk [vmem:[#allocation11 + $0x1e] sm:$0x1] %vm466_vm10, %v2682_v13 }
0x180d   :  { %v2686_v51 = vpop.permute.xlu1 %2685 }
0x180e   :  { %2704 = vst.msk [vmem:[#allocation11 + $0x2e] sm:$0x1] %vm466_vm10, %v2686_v51 }
0x1811   :  { %v2690_v12 = vpop.permute.xlu1 %2689 }
0x1812   :  { %2706 = vst.msk [vmem:[#allocation11 + $0x3e] sm:$0x1] %vm466_vm10, %v2690_v12 }
0x1815   :  { %v3049_v42 = vpop.permute.xlu1 %3048 }
0x1816   :  { %3071 = vst.msk [vmem:[#allocation11 + $0xf] sm:$0x1] %vm466_vm10, %v3049_v42 }
0x1819   :  { %v3053_v41 = vpop.permute.xlu1 %3052 }
0x181a   :  { %3073 = vst.msk [vmem:[#allocation11 + $0x1f] sm:$0x1] %vm466_vm10, %v3053_v41 }
0x181d   :  { %v3057_v11 = vpop.permute.xlu1 %3056 }
0x181e   :  { %3075 = vst.msk [vmem:[#allocation11 + $0x2f] sm:$0x1] %vm466_vm10, %v3057_v11 }
0x1821   :  { %v3061_v23 = vpop.permute.xlu1 %3060 }
0x1822   :  { %3077 = vst.msk [vmem:[#allocation11 + $0x3f] sm:$0x1] %vm466_vm10, %v3061_v23 }
0x1823   :  { %4017 = shalt.err (!%p4014_p0)
}
0x1824   :  { %s4018_s18 = scalar_lea.hbm %s5675_s8, 1024 }
0x1825   :  { %p4019_p1 = scmp.ne.s32.totalorder %s5675_s8, %s4018_s18  ;;  %p4022_p2 = scmp.lt.u32.totalorder %s4018_s18, %s5675_s8 }
0x1827   :  { %p4024_p3 = pnand %p4022_p2, %p4019_p1 }
0x1829   :  { %4027 = shalt.err (!%p4024_p3)
}
0x182a   :  { %3239 = dma.vmem_to_hbm [thread:$0]  %s3234_s5, 1024, %s5675_s8, [#allocation12], %s4082_s21, %s4082_s21, %s4083_s22  }
0x182b   :  { %s4028_s12 = scalar_lea.vmem %s3247_s14, 128  ;;  %p4033_p5 = scmp.lt.s32.totalorder %s3247_s14, %s3247_s14 }
0x182c   :  { %p4029_p4 = scmp.ne.s32.totalorder %s3247_s14, %s4028_s12  ;;  %p4034_p6 = scmp.lt.s32.totalorder %s4028_s12, %s4028_s12 }
0x182e   :  { %p4035_p7 = por %p4034_p6, %p4033_p5 }
0x1830   :  { %p4036_p8 = pnand %p4035_p7, %p4029_p4 }
0x1832   :  { %4039 = shalt.err (!%p4036_p8)
}
0x1833   :  { %s4040_s27 = scalar_lea.hbm %s5676_s9, 128 }
0x1834   :  { %p4041_p9 = scmp.ne.s32.totalorder %s5676_s9, %s4040_s27  ;;  %p4044_p10 = scmp.lt.u32.totalorder %s4040_s27, %s5676_s9 }
0x1836   :  { %p4046_p11 = pnand %p4044_p10, %p4041_p9 }
0x1838   :  { %4049 = shalt.err (!%p4046_p11)
}
0x1839   :  { %3249 = dma.vmem_to_hbm [thread:$0]  %s3247_s14, 128, %s5676_s9, [#allocation12]  }
0x183a   :  { %s4094_s22 = smov [#allocation10]  }
0x183b   :  { %s3224_s3 = sshll.u32 %s4094_s22, 4  ;;  %s3225_s3 = int_to_ptr.vmem [resolvable:$true] %s3224_s3 }
0x183c   :  { %s4050_s11 = scalar_lea.vmem %s3225_s3, 128  ;;  %p4055_p13 = scmp.lt.s32.totalorder %s3225_s3, %s3225_s3 }
0x183d   :  { %p4051_p12 = scmp.ne.s32.totalorder %s3225_s3, %s4050_s11  ;;  %p4056_p0 = scmp.lt.s32.totalorder %s4050_s11, %s4050_s11 }
0x183f   :  { %p4057_p1 = por %p4056_p0, %p4055_p13 }
0x1841   :  { %p4058_p2 = pnand %p4057_p1, %p4051_p12 }
0x188a   :  { %v3213_v24 = vpop.f32.mrb[8].mxu0 }
0x188b   :  { %3217 = vst [vmem:[#allocation10] sm:$0xff] %v3213_v24  ;;  %v3482_v55 = vpop.f32.mrb[9].mxu0 }
0x188c   :  { %4061 = shalt.err (!%p4058_p2)
}
0x188d   :  { %s4062_s4 = scalar_lea.hbm %s5674_s7, 128 }
0x188e   :  { %p4063_p3 = scmp.ne.s32.totalorder %s5674_s7, %s4062_s4  ;;  %p4066_p4 = scmp.lt.u32.totalorder %s4062_s4, %s5674_s7 }
0x1890   :  { %p4068_p5 = pnand %p4066_p4, %p4063_p3 }
0x1892   :  { %4071 = shalt.err (!%p4068_p5)
}
0x1893   :  { %3227 = dma.vmem_to_hbm [thread:$0]  %s3225_s3, 128, %s5674_s7, [#allocation6]  }
0x1894   :  { %4076 = dma.done.wait [#allocation6], 128  }
0x1895   :  { %4077 = vsyncadd [#allocation6], 4294967168 }
0x1896   :  { %4078 = dma.done.wait [#allocation12], 1152  }
0x1897   :  { %4079 = vsyncadd [#allocation12], 4294966144 }
0x1898   :  { %3259 = vsyncpa [#allocation5], 1 }
0x1899   :  { %3260 = vsyncpa [#allocation8], 1 }
0x189a   :  { %3261 = vsyncpa [#allocation6], 1 }
0x189b   :  { %3262 = vsyncpa [#allocation12], 1 }

</bundles_post_ra>
